<compile_context>
chip_gen: v7x
topology: tpu7x:2x2x1
jax: 0.10.0
libtpu: 0.0.40
codegen_flags: <defaults>
</compile_context>

<pallas_src>
import math
from functools import partial

import jax
import jax.numpy as jnp
from jax import lax
from jax.experimental import pallas as pl
from jax.experimental.pallas import tpu as pltpu

BN_EPS = 1e-5


# ---------------------------------------------------------------------------
# Weight preparation (plain JAX, tiny tensors, traced once)
# ---------------------------------------------------------------------------
def _up_band_weight(w_up, W):
    """Banded matrix folding bilinear column taps + column parity interleave +
    1x1 conv:  ((W+2)*Cin, 2W*Cout), bf16."""
    Cout, Cin = w_up.shape[0], w_up.shape[1]
    w1 = w_up.reshape(Cout, Cin).T.astype(jnp.float32)          # (Cin, Cout)
    Wp, W2 = W + 2, 2 * W
    pw = jnp.arange(Wp)[:, None]                                # padded coarse col
    wf = jnp.arange(W2)[None, :]                                # fine col
    wc = wf // 2                                                # coarse col
    cp = wf % 2                                                 # col parity
    S = (0.75 * (pw == wc + 1) + 0.25 * (pw == wc + 2 * cp)).astype(jnp.float32)
    B = jnp.einsum("pq,io->piqo", S, w1).reshape(Wp * Cin, W2 * Cout)
    return B.astype(jnp.bfloat16)


def _conv_band_weights(w, W2):
    """Per-kd banded weights folding the kh taps into K and the kw taps +
    w-'same' padding into the band: (3, 3*W2*Cin, W2*Cout), bf16.
    w is PyTorch (Cout, Cin, 3, 3, 3)."""
    Cout, Cin = w.shape[0], w.shape[1]
    wt = jnp.transpose(w, (2, 3, 4, 1, 0)).astype(jnp.float32)  # (kd,kh,kw,Cin,Cout)
    p = jnp.arange(W2)[:, None]                                 # input w
    q = jnp.arange(W2)[None, :]                                 # output w
    band = jnp.zeros((3, 3, W2, Cin, W2, Cout), jnp.float32)
    for kw in range(3):
        ind = (p == q + kw - 1).astype(jnp.float32)             # clip == zero pad
        band = band + jnp.einsum("pq,dhio->dhpiqo", ind, wt[:, :, kw])
    band = band.reshape(3, 3, W2 * Cin, W2 * Cout)              # (kd, kh, K-block, N)
    band = band.reshape(3, 3 * W2 * Cin, W2 * Cout)             # kh stacked along K
    return band.astype(jnp.bfloat16)


def _bn_scale_shift(ssum, ssq, count, gamma, beta, W2, C):
    """Finish the fused (per-n) batch-stat reduction and pre-tile scale/shift
    to the merged (w*C + c) lane layout."""
    s = ssum.reshape(-1, W2, C).sum(axis=(0, 1))
    q = ssq.reshape(-1, W2, C).sum(axis=(0, 1))
    mean = s / count
    # NOTE: E[x^2]-E[x]^2 in f32; fine for normalized activations at these
    # sizes, switch to a shifted two-pass if means grow large.
    var = q / count - mean * mean
    scale = gamma / jnp.sqrt(var + BN_EPS)
    shift = beta - mean * scale
    sc = jnp.tile(scale, W2).reshape(1, W2 * C)
    sh = jnp.tile(shift, W2).reshape(1, W2 * C)
    return sc, sh


# ---------------------------------------------------------------------------
# Kernel 1: bilinear 2x upsample (H,W) + 1x1 conv + skip add.  D folded into
# the matmul (M = 2*D*H).  Writes the row-interleaved merged-lane layout in
# bf16 and emits per-n BN1 batch statistics.
# ---------------------------------------------------------------------------
def _upblock_kernel(xp_ref, b_ref, skip_ref, o_ref, sum_ref, sq_ref, *, D, H, WCo):
    # xp_ref:   (1, D, H+2, (W+2)*Cin)  zero-padded coarse input (one n)
    # b_ref:    ((W+2)*Cin, W2*Cout)    banded up-weight, bf16
    # skip_ref: (1, D, H, 2*W2*Cout)    skip, two fine rows per coarse row
    # o_ref:    (1, D, H, 2*W2*Cout)    bf16
    # sum/sq:   (1, 1, W2*Cout)         per-n BN1 partial sums
    pc = xp_ref[0, :, 1:H + 1, :].astype(jnp.float32)       # (D, H, WpCi) centre
    pt = xp_ref[0, :, 0:H, :].astype(jnp.float32)           # rows above
    pb = xp_ref[0, :, 2:H + 2, :].astype(jnp.float32)       # rows below
    v0 = 0.75 * pc + 0.25 * pt                               # even fine rows
    v1 = 0.75 * pc + 0.25 * pb                               # odd  fine rows

    v = jnp.concatenate([v0, v1], axis=0)                    # (2D, H, WpCi)
    v = v.reshape(2 * D * H, v.shape[-1])
    r = jnp.dot(v.astype(jnp.bfloat16), b_ref[...],
                preferred_element_type=jnp.float32)          # (2DH, WCo)
    r = r.reshape(2, D, H, WCo)

    skip = skip_ref[0].astype(jnp.float32)                   # (D, H, 2*WCo)
    y0 = r[0] + skip[:, :, 0:WCo]
    y1 = r[1] + skip[:, :, WCo:2 * WCo]
    o_ref[0, :, :, 0:WCo] = y0.astype(o_ref.dtype)
    o_ref[0, :, :, WCo:2 * WCo] = y1.astype(o_ref.dtype)

    y0f = y0.reshape(D * H, WCo)
    y1f = y1.reshape(D * H, WCo)
    sum_ref[0] = (jnp.sum(y0f, axis=0, keepdims=True)
                  + jnp.sum(y1f, axis=0, keepdims=True))
    sq_ref[0] = (jnp.sum(y0f * y0f, axis=0, keepdims=True)
                 + jnp.sum(y1f * y1f, axis=0, keepdims=True))


def upblock(x_ncdhw, skip_ncdhw, w_up):
    # x: (N, Cin, D, H, W); skip: (N, Cout, D, 2H, 2W); w_up: (Cout, Cin, 1,1,1)
    N, Cin, D, H, W = x_ncdhw.shape
    Cout = skip_ncdhw.shape[1]
    W2 = 2 * W
    Wp = W + 2
    WCo = W2 * Cout
    WpCi = Wp * Cin

    x = jnp.transpose(x_ncdhw, (0, 2, 3, 4, 1))                      # NDHWC (coarse)
    xp = jnp.pad(x, ((0, 0), (0, 0), (1, 1), (1, 1), (0, 0)))
    xp = xp.reshape(N, D, H + 2, WpCi)                               # merged lanes
    skip = jnp.transpose(skip_ncdhw, (0, 2, 3, 4, 1))                # (N,D,H2,W2,Cout)
    skip_m = skip.reshape(N, D, H, 2 * WCo)                          # contiguous view
    B = _up_band_weight(w_up, W)

    flops = 2 * N * (2 * D * H) * WpCi * WCo
    bytes_accessed = (xp.size * 4 + skip_m.size * 4 + B.size * 2
                      + N * D * H * 2 * WCo * 2 + 2 * N * WCo * 4)

    y, ssum, ssq = pl.pallas_call(
        partial(_upblock_kernel, D=D, H=H, WCo=WCo),
        out_shape=(jax.ShapeDtypeStruct((N, D, H, 2 * WCo), jnp.bfloat16),
                   jax.ShapeDtypeStruct((N, 1, WCo), jnp.float32),
                   jax.ShapeDtypeStruct((N, 1, WCo), jnp.float32)),
        grid=(N,),
        in_specs=[
            pl.BlockSpec((1, D, H + 2, WpCi), lambda n: (n, 0, 0, 0)),
            pl.BlockSpec((WpCi, WCo), lambda n: (0, 0)),
            pl.BlockSpec((1, D, H, 2 * WCo), lambda n: (n, 0, 0, 0)),
        ],
        out_specs=(pl.BlockSpec((1, D, H, 2 * WCo), lambda n: (n, 0, 0, 0)),
                   pl.BlockSpec((1, 1, WCo), lambda n: (n, 0, 0)),
                   pl.BlockSpec((1, 1, WCo), lambda n: (n, 0, 0))),
        compiler_params=pltpu.CompilerParams(
            dimension_semantics=("parallel",)),
        cost_estimate=pl.CostEstimate(flops=int(flops), transcendentals=0,
                                      bytes_accessed=int(bytes_accessed)),
    )(xp, B, skip_m)

    y = y.reshape(N, D, 2 * H, WCo)     # free contiguous reshape to merged layout
    return y, ssum, ssq


# ---------------------------------------------------------------------------
# Kernel 2: fused BN(train, affine) + ReLU + 3x3x3 "same" conv (+residual),
# emitting next stage's per-n BN batch statistics.  kh taps are folded into K
# via an im2col scratch; kw taps are folded into the banded weight.
# ---------------------------------------------------------------------------
def _bnreluconv_kernel(h_ref, sc_ref, sh_ref, wb_ref, *rest,
                       D, H2, WCi, WCo, has_residual):
    # h_ref:  (1, D, H2, W2*Cin) bf16      sc/sh: (1, W2*Cin) f32
    # wb_ref: (3, 3*W2*Cin, W2*Cout) bf16  [res_ref: (1, D, H2, W2*Cout) bf16]
    # o_ref:  (1, D, H2, W2*Cout)          sum/sq: (1, 1, W2*Cout) f32
    # im_ref: ((D+2)*H2, 3*W2*Cin) bf16 scratch (im2col over kh, d-halo rows)
    if has_residual:
        res_ref, o_ref, sum_ref, sq_ref, im_ref = rest
    else:
        o_ref, sum_ref, sq_ref, im_ref = rest

    M = D * H2

    # BN + ReLU on the flattened (D*H2, WCi) slab, f32.
    x = h_ref[0].astype(jnp.float32).reshape(M, WCi)
    a = jnp.maximum(x * sc_ref[...] + sh_ref[...], 0.0)          # (M, WCi)

    # kh-shifted copies: rotate along the flattened (d*H2 + h) row axis (XLU)
    # and zero the rows that wrapped across a d-slab (h == 0 / h == H2-1).
    row = lax.broadcasted_iota(jnp.int32, (M, WCi), 0)
    h_of_row = row % H2
    a_m1 = jnp.where(h_of_row == 0, 0.0, pltpu.roll(a, shift=1, axis=0))
    a_p1 = jnp.where(h_of_row == H2 - 1, 0.0, pltpu.roll(a, shift=M - 1, axis=0))

    # im2col scratch: row (dp*H2 + h), lane block kh  ->  act[dp-1, h+kh-1]
    # (zero outside).  All offsets are multiples of H2 / 128 -> aligned stores.
    # Halo slabs are re-zeroed every grid step so the kernel is safe under
    # "parallel" grid semantics (per-core scratch, no pid==0 init).
    zslab = jnp.zeros((H2, 3 * WCi), jnp.bfloat16)
    im_ref[0:H2, :] = zslab
    im_ref[(D + 1) * H2:(D + 2) * H2, :] = zslab
    im_ref[H2:(D + 1) * H2, 0:WCi] = a_m1.astype(jnp.bfloat16)
    im_ref[H2:(D + 1) * H2, WCi:2 * WCi] = a.astype(jnp.bfloat16)
    im_ref[H2:(D + 1) * H2, 2 * WCi:3 * WCi] = a_p1.astype(jnp.bfloat16)

    # 3 MXU matmuls, K = 3*WCi (kh folded into K, kw folded into the band).
    if has_residual:
        acc = res_ref[0].astype(jnp.float32).reshape(M, WCo)
    else:
        acc = None
    for kd in range(3):
        slab = im_ref[kd * H2:(kd + D) * H2, :]                   # aligned read
        part = jnp.dot(slab, wb_ref[kd], preferred_element_type=jnp.float32)
        acc = part if acc is None else acc + part

    o_ref[0] = acc.reshape(D, H2, WCo).astype(o_ref.dtype)
    sum_ref[0] = jnp.sum(acc, axis=0, keepdims=True)
    sq_ref[0] = jnp.sum(acc * acc, axis=0, keepdims=True)


def bnreluconv(h, sc, sh, wband, residual=None, out_dtype=jnp.bfloat16):
    # h: (N, D, H2, W2*Cin) bf16; sc/sh: (1, W2*Cin); wband: (3, 3*W2*Cin, W2*Cout)
    N, D, H2, WCi = h.shape
    WCo = wband.shape[-1]
    has_res = residual is not None

    in_specs = [
        pl.BlockSpec((1, D, H2, WCi), lambda n: (n, 0, 0, 0)),
        pl.BlockSpec((1, WCi), lambda n: (0, 0)),
        pl.BlockSpec((1, WCi), lambda n: (0, 0)),
        pl.BlockSpec((3, 3 * WCi, WCo), lambda n: (0, 0, 0)),
    ]
    args = [h, sc, sh, wband]
    if has_res:
        in_specs.append(pl.BlockSpec((1, D, H2, WCo), lambda n: (n, 0, 0, 0)))
        args.append(residual)

    flops = 2 * N * 3 * (D * H2) * (3 * WCi) * WCo
    bytes_accessed = (h.size * h.dtype.itemsize + wband.size * 2
                      + (residual.size * residual.dtype.itemsize if has_res else 0)
                      + N * D * H2 * WCo * jnp.dtype(out_dtype).itemsize
                      + 2 * N * WCo * 4 + 2 * WCi * 4)

    out, ssum, ssq = pl.pallas_call(
        partial(_bnreluconv_kernel, D=D, H2=H2, WCi=WCi, WCo=WCo,
                has_residual=has_res),
        out_shape=(jax.ShapeDtypeStruct((N, D, H2, WCo), out_dtype),
                   jax.ShapeDtypeStruct((N, 1, WCo), jnp.float32),
                   jax.ShapeDtypeStruct((N, 1, WCo), jnp.float32)),
        grid=(N,),
        in_specs=in_specs,
        out_specs=(pl.BlockSpec((1, D, H2, WCo), lambda n: (n, 0, 0, 0)),
                   pl.BlockSpec((1, 1, WCo), lambda n: (n, 0, 0)),
                   pl.BlockSpec((1, 1, WCo), lambda n: (n, 0, 0))),
        scratch_shapes=[pltpu.VMEM(((D + 2) * H2, 3 * WCi), jnp.bfloat16)],
        compiler_params=pltpu.CompilerParams(
            dimension_semantics=("parallel",)),
        cost_estimate=pl.CostEstimate(flops=int(flops), transcendentals=0,
                                      bytes_accessed=int(bytes_accessed)),
    )(*args)
    return out, ssum, ssq


# ---------------------------------------------------------------------------
# Full UpConvBlock forward
# ---------------------------------------------------------------------------
def upconvblock_forward(x, skip, params):
    # x: (N, Cin, D, H, W), skip: (N, Cout, D, 2H, 2W)   -- PyTorch NCDHW
    N, Cin, D, H, W = x.shape
    Cout = skip.shape[1]
    H2, W2 = 2 * H, 2 * W
    cnt = float(N * D * H2 * W2)

    y, s0, q0 = upblock(x, skip, params["w_up"])          # bf16 merged layout + BN1 stats
    residual = y

    wb1 = _conv_band_weights(params["w_c1"], W2)
    wb2 = _conv_band_weights(params["w_c2"], W2)
    wb3 = _conv_band_weights(params["w_c3"], W2)

    sc1, sh1 = _bn_scale_shift(s0, q0, cnt, params["bn1_g"], params["bn1_b"], W2, Cout)
    t1, s1, q1 = bnreluconv(y, sc1, sh1, wb1)

    sc2, sh2 = _bn_scale_shift(s1, q1, cnt, params["bn2_g"], params["bn2_b"], W2, Cout)
    t2, s2, q2 = bnreluconv(t1, sc2, sh2, wb2, residual=residual)   # x += residual fused

    sc3, sh3 = _bn_scale_shift(s2, q2, cnt, params["bn3_g"], params["bn3_b"], W2, Cout)
    out, _, _ = bnreluconv(t2, sc3, sh3, wb3, out_dtype=jnp.float32)

    out = out.reshape(N, D, H2, W2, Cout)
    return jnp.transpose(out, (0, 4, 1, 2, 3))            # back to NCDHW


# ---------------------------------------------------------------------------
# Pure-JAX (lax) reference mirroring the PyTorch module exactly
# ---------------------------------------------------------------------------
def _bilinear_up_weight(channels):
    f = 2.0
    c = (4 - 1) / (2.0 * f)
    w1d = 1.0 - jnp.abs(jnp.arange(4, dtype=jnp.float32) / f - c)   # [.25,.75,.75,.25]
    w2d = jnp.outer(w1d, w1d)
    return jnp.broadcast_to(w2d, (channels, 1, 1, 4, 4))


def reference_forward(x, skip, params):
    Cin = x.shape[1]
    dn = ("NCDHW", "OIDHW", "NCDHW")
    hp = lax.Precision.HIGHEST
    wb = _bilinear_up_weight(Cin)
    up = lax.conv_general_dilated(
        x, wb[..., ::-1, ::-1], window_strides=(1, 1, 1),
        padding=((0, 0), (2, 2), (2, 2)), lhs_dilation=(1, 2, 2),
        dimension_numbers=dn, feature_group_count=Cin, precision=hp)
    y = lax.conv_general_dilated(up, params["w_up"], (1, 1, 1),
                                 ((0, 0), (0, 0), (0, 0)),
                                 dimension_numbers=dn, precision=hp) + skip

    def bnrc(h, g, b, w):
        mean = jnp.mean(h, axis=(0, 2, 3, 4), keepdims=True)
        var = jnp.var(h, axis=(0, 2, 3, 4), keepdims=True)
        hn = (h - mean) / jnp.sqrt(var + BN_EPS)
        hn = hn * g.reshape(1, -1, 1, 1, 1) + b.reshape(1, -1, 1, 1, 1)
        hr = jnp.maximum(hn, 0.0)
        return lax.conv_general_dilated(hr, w, (1, 1, 1),
                                        ((1, 1), (1, 1), (1, 1)),
                                        dimension_numbers=dn, precision=hp)

    r = y
    t = bnrc(y, params["bn1_g"], params["bn1_b"], params["w_c1"])
    t = bnrc(t, params["bn2_g"], params["bn2_b"], params["w_c2"]) + r
    return bnrc(t, params["bn3_g"], params["bn3_b"], params["w_c3"])


if __name__ == "__main__":
    N, Cin, Cout = 2, 8, 4
    D, H, W = 4, 16, 16

    key = jax.random.PRNGKey(0)
    ks = jax.random.split(key, 6)
    x = jax.random.normal(ks[0], (N, Cin, D, H, W), jnp.float32)
    skip = jax.random.normal(ks[1], (N, Cout, D, 2 * H, 2 * W), jnp.float32)

    params = {
        "w_up": jax.random.normal(ks[2], (Cout, Cin, 1, 1, 1), jnp.float32)
                / math.sqrt(Cin),
        "w_c1": jax.random.normal(ks[3], (Cout, Cout, 3, 3, 3), jnp.float32)
                / math.sqrt(27 * Cout),
        "w_c2": jax.random.normal(ks[4], (Cout, Cout, 3, 3, 3), jnp.float32)
                / math.sqrt(27 * Cout),
        "w_c3": jax.random.normal(ks[5], (Cout, Cout, 3, 3, 3), jnp.float32)
                / math.sqrt(27 * Cout),
        "bn1_g": jnp.ones((Cout,), jnp.float32), "bn1_b": jnp.zeros((Cout,), jnp.float32),
        "bn2_g": jnp.ones((Cout,), jnp.float32), "bn2_b": jnp.zeros((Cout,), jnp.float32),
        "bn3_g": jnp.ones((Cout,), jnp.float32), "bn3_b": jnp.zeros((Cout,), jnp.float32),
    }

    out = jax.jit(upconvblock_forward)(x, skip, params)
    out = jax.block_until_ready(out)
    assert out.shape == (N, Cout, D, 2 * H, 2 * W), out.shape

    ref = reference_forward(x, skip, params)
    err = float(jnp.max(jnp.abs(out - ref)))
    scale = float(jnp.max(jnp.abs(ref)))
    # bf16 MXU operands + bf16 inter-stage activation storage -> ~1e-2-level
    # absolute deltas vs the f32 HIGHEST-precision reference are expected.
    assert err < 4e-2 * max(scale, 1.0), f"max abs error vs reference: {err} (scale {scale})"

    print("KERNEL_OK")
</pallas_src>

<mosaic_0001>
module attributes {stable_mosaic.version = 11 : i64} {
  func.func @_upblock_kernel(%arg0: i32, %arg1: memref<1x4x18x144xf32, #tpu.memory_space<vmem>>, %arg2: memref<144x128xbf16, #tpu.memory_space<vmem>>, %arg3: memref<1x4x16x256xf32, #tpu.memory_space<vmem>>, %arg4: memref<1x4x16x256xbf16, #tpu.memory_space<vmem>>, %arg5: memref<1x1x128xf32, #tpu.memory_space<vmem>>, %arg6: memref<1x1x128xf32, #tpu.memory_space<vmem>>) attributes {dimension_semantics = [#tpu.dimension_semantics<parallel>], iteration_bounds = array<i64: 2>, scalar_prefetch = 0 : i64, scratch_operands = 0 : i64, tpu.core_type = #tpu.core_type<tc>, window_params = [{transform_indices = @transform_0, window_bounds = array<i64: 1, 4, 18, 144>}, {pipeline_mode = #tpu.pipeline_mode<synchronous>, transform_indices = @transform_1, window_bounds = array<i64: 144, 128>}, {transform_indices = @transform_2, window_bounds = array<i64: 1, 4, 16, 256>}, {transform_indices = @transform_3, window_bounds = array<i64: 1, 4, 16, 256>}, {transform_indices = @transform_4, window_bounds = array<i64: 1, 1, 128>}, {transform_indices = @transform_5, window_bounds = array<i64: 1, 1, 128>}]} {
    %c0 = arith.constant 0 : index
    %c0_0 = arith.constant 0 : index
    %c1 = arith.constant 1 : index
    %c0_1 = arith.constant 0 : index
    %0 = vector.load %arg1[%c0, %c0_0, %c1, %c0_1] : memref<1x4x18x144xf32, #tpu.memory_space<vmem>>, vector<1x4x16x144xf32>
    %1 = vector.shape_cast %0 : vector<1x4x16x144xf32> to vector<4x16x144xf32>
    %c0_2 = arith.constant 0 : index
    %c0_3 = arith.constant 0 : index
    %c0_4 = arith.constant 0 : index
    %c0_5 = arith.constant 0 : index
    %2 = vector.load %arg1[%c0_2, %c0_3, %c0_4, %c0_5] : memref<1x4x18x144xf32, #tpu.memory_space<vmem>>, vector<1x4x16x144xf32>
    %3 = vector.shape_cast %2 : vector<1x4x16x144xf32> to vector<4x16x144xf32>
    %c0_6 = arith.constant 0 : index
    %c0_7 = arith.constant 0 : index
    %c2 = arith.constant 2 : index
    %c0_8 = arith.constant 0 : index
    %4 = vector.load %arg1[%c0_6, %c0_7, %c2, %c0_8] : memref<1x4x18x144xf32, #tpu.memory_space<vmem>>, vector<1x4x16x144xf32>
    %5 = vector.shape_cast %4 : vector<1x4x16x144xf32> to vector<4x16x144xf32>
    %cst = arith.constant 7.500000e-01 : f32
    %6 = vector.broadcast %cst : f32 to vector<4x16x144xf32>
    %7 = arith.mulf %6, %1 : vector<4x16x144xf32>
    %cst_9 = arith.constant 2.500000e-01 : f32
    %8 = vector.broadcast %cst_9 : f32 to vector<4x16x144xf32>
    %9 = arith.mulf %8, %3 : vector<4x16x144xf32>
    %10 = arith.addf %7, %9 : vector<4x16x144xf32>
    %cst_10 = arith.constant 7.500000e-01 : f32
    %11 = vector.broadcast %cst_10 : f32 to vector<4x16x144xf32>
    %12 = arith.mulf %11, %1 : vector<4x16x144xf32>
    %cst_11 = arith.constant 2.500000e-01 : f32
    %13 = vector.broadcast %cst_11 : f32 to vector<4x16x144xf32>
    %14 = arith.mulf %13, %5 : vector<4x16x144xf32>
    %15 = arith.addf %12, %14 : vector<4x16x144xf32>
    %16 = tpu.concatenate %10, %15 in 0 : vector<4x16x144xf32>, vector<4x16x144xf32> -> vector<8x16x144xf32>
    %17 = vector.shape_cast %16 : vector<8x16x144xf32> to vector<128x144xf32>
    %18 = arith.truncf %17 : vector<128x144xf32> to vector<128x144xbf16>
    %c0_12 = arith.constant 0 : index
    %c0_13 = arith.constant 0 : index
    %19 = vector.load %arg2[%c0_12, %c0_13] : memref<144x128xbf16, #tpu.memory_space<vmem>>, vector<144x128xbf16>
    %cst_14 = arith.constant dense<0.000000e+00> : vector<128x128xf32>
    %20 = tpu.matmul %18, %19, %cst_14 {dimension_numbers = #tpu.dot_dimension_numbers<[1], [0], [0], [1], [0, 0, 1, 1], [], []>} : vector<128x144xbf16>, vector<144x128xbf16>, vector<128x128xf32> -> vector<128x128xf32>
    %21 = vector.shape_cast %20 : vector<128x128xf32> to vector<2x4x16x128xf32>
    %c0_15 = arith.constant 0 : index
    %c0_16 = arith.constant 0 : index
    %c0_17 = arith.constant 0 : index
    %c0_18 = arith.constant 0 : index
    %22 = vector.load %arg3[%c0_15, %c0_16, %c0_17, %c0_18] : memref<1x4x16x256xf32, #tpu.memory_space<vmem>>, vector<1x4x16x256xf32>
    %23 = vector.shape_cast %22 : vector<1x4x16x256xf32> to vector<4x16x256xf32>
    %24 = vector.extract_strided_slice %21 {offsets = [0, 0, 0, 0], sizes = [1, 4, 16, 128], strides = [1, 1, 1, 1]} : vector<2x4x16x128xf32> to vector<1x4x16x128xf32>
    %25 = vector.shape_cast %24 : vector<1x4x16x128xf32> to vector<4x16x128xf32>
    %26 = vector.extract_strided_slice %23 {offsets = [0, 0, 0], sizes = [4, 16, 128], strides = [1, 1, 1]} : vector<4x16x256xf32> to vector<4x16x128xf32>
    %27 = arith.addf %25, %26 : vector<4x16x128xf32>
    %28 = vector.extract_strided_slice %21 {offsets = [1, 0, 0, 0], sizes = [1, 4, 16, 128], strides = [1, 1, 1, 1]} : vector<2x4x16x128xf32> to vector<1x4x16x128xf32>
    %29 = vector.shape_cast %28 : vector<1x4x16x128xf32> to vector<4x16x128xf32>
    %30 = vector.extract_strided_slice %23 {offsets = [0, 0, 128], sizes = [4, 16, 128], strides = [1, 1, 1]} : vector<4x16x256xf32> to vector<4x16x128xf32>
    %31 = arith.addf %29, %30 : vector<4x16x128xf32>
    %32 = arith.truncf %27 : vector<4x16x128xf32> to vector<4x16x128xbf16>
    %c0_19 = arith.constant 0 : index
    %c0_20 = arith.constant 0 : index
    %c0_21 = arith.constant 0 : index
    %c0_22 = arith.constant 0 : index
    %33 = vector.load %arg4[%c0_19, %c0_20, %c0_21, %c0_22] : memref<1x4x16x256xbf16, #tpu.memory_space<vmem>>, vector<1x4x16x128xbf16>
    %34 = vector.shape_cast %33 : vector<1x4x16x128xbf16> to vector<4x16x128xbf16>
    %35 = vector.shape_cast %32 : vector<4x16x128xbf16> to vector<1x4x16x128xbf16>
    tpu.vector_store %arg4[%c0_19, %c0_20, %c0_21, %c0_22], %35 {strides = array<i32>} : memref<1x4x16x256xbf16, #tpu.memory_space<vmem>>, vector<1x4x16x128xbf16>,
    %36 = arith.truncf %31 : vector<4x16x128xf32> to vector<4x16x128xbf16>
    %c0_23 = arith.constant 0 : index
    %c0_24 = arith.constant 0 : index
    %c0_25 = arith.constant 0 : index
    %c128 = arith.constant 128 : index
    %37 = vector.load %arg4[%c0_23, %c0_24, %c0_25, %c128] : memref<1x4x16x256xbf16, #tpu.memory_space<vmem>>, vector<1x4x16x128xbf16>
    %38 = vector.shape_cast %37 : vector<1x4x16x128xbf16> to vector<4x16x128xbf16>
    %39 = vector.shape_cast %36 : vector<4x16x128xbf16> to vector<1x4x16x128xbf16>
    tpu.vector_store %arg4[%c0_23, %c0_24, %c0_25, %c128], %39 {strides = array<i32>} : memref<1x4x16x256xbf16, #tpu.memory_space<vmem>>, vector<1x4x16x128xbf16>,
    %40 = vector.shape_cast %27 : vector<4x16x128xf32> to vector<64x128xf32>
    %41 = vector.shape_cast %31 : vector<4x16x128xf32> to vector<64x128xf32>
    %cst_26 = arith.constant dense<0.000000e+00> : vector<128xf32>
    %42 = vector.multi_reduction <add>, %40, %cst_26 [0] : vector<64x128xf32> to vector<128xf32>
    %43 = vector.shape_cast %42 : vector<128xf32> to vector<1x128xf32>
    %cst_27 = arith.constant dense<0.000000e+00> : vector<128xf32>
    %44 = vector.multi_reduction <add>, %41, %cst_27 [0] : vector<64x128xf32> to vector<128xf32>
    %45 = vector.shape_cast %44 : vector<128xf32> to vector<1x128xf32>
    %46 = arith.addf %43, %45 : vector<1x128xf32>
    %c0_28 = arith.constant 0 : index
    %c0_29 = arith.constant 0 : index
    %c0_30 = arith.constant 0 : index
    %47 = vector.load %arg5[%c0_28, %c0_29, %c0_30] : memref<1x1x128xf32, #tpu.memory_space<vmem>>, vector<1x1x128xf32>
    %48 = vector.shape_cast %47 : vector<1x1x128xf32> to vector<1x128xf32>
    %49 = vector.shape_cast %46 : vector<1x128xf32> to vector<1x1x128xf32>
    tpu.vector_store %arg5[%c0_28, %c0_29, %c0_30], %49 {strides = array<i32>} : memref<1x1x128xf32, #tpu.memory_space<vmem>>, vector<1x1x128xf32>,
    %50 = arith.mulf %40, %40 : vector<64x128xf32>
    %cst_31 = arith.constant dense<0.000000e+00> : vector<128xf32>
    %51 = vector.multi_reduction <add>, %50, %cst_31 [0] : vector<64x128xf32> to vector<128xf32>
    %52 = vector.shape_cast %51 : vector<128xf32> to vector<1x128xf32>
    %53 = arith.mulf %41, %41 : vector<64x128xf32>
    %cst_32 = arith.constant dense<0.000000e+00> : vector<128xf32>
    %54 = vector.multi_reduction <add>, %53, %cst_32 [0] : vector<64x128xf32> to vector<128xf32>
    %55 = vector.shape_cast %54 : vector<128xf32> to vector<1x128xf32>
    %56 = arith.addf %52, %55 : vector<1x128xf32>
    %c0_33 = arith.constant 0 : index
    %c0_34 = arith.constant 0 : index
    %c0_35 = arith.constant 0 : index
    %57 = vector.load %arg6[%c0_33, %c0_34, %c0_35] : memref<1x1x128xf32, #tpu.memory_space<vmem>>, vector<1x1x128xf32>
    %58 = vector.shape_cast %57 : vector<1x1x128xf32> to vector<1x128xf32>
    %59 = vector.shape_cast %56 : vector<1x128xf32> to vector<1x1x128xf32>
    tpu.vector_store %arg6[%c0_33, %c0_34, %c0_35], %59 {strides = array<i32>} : memref<1x1x128xf32, #tpu.memory_space<vmem>>, vector<1x1x128xf32>,
    return
  }
  func.func @transform_0(%arg0: i32) -> (i32, i32, i32, i32) {
    %c0_i32 = arith.constant 0 : i32
    %c0_i32_0 = arith.constant 0 : i32
    %c0_i32_1 = arith.constant 0 : i32
    %c0_i32_2 = arith.constant 0 : i32
    return %arg0, %c0_i32, %c0_i32_0, %c0_i32_1 : i32, i32, i32, i32
  }
  func.func @transform_1(%arg0: i32) -> (i32, i32) {
    %c0_i32 = arith.constant 0 : i32
    %c0_i32_0 = arith.constant 0 : i32
    %c0_i32_1 = arith.constant 0 : i32
    return %c0_i32, %c0_i32_0 : i32, i32
  }
  func.func @transform_2(%arg0: i32) -> (i32, i32, i32, i32) {
    %c0_i32 = arith.constant 0 : i32
    %c0_i32_0 = arith.constant 0 : i32
    %c0_i32_1 = arith.constant 0 : i32
    %c0_i32_2 = arith.constant 0 : i32
    return %arg0, %c0_i32, %c0_i32_0, %c0_i32_1 : i32, i32, i32, i32
  }
  func.func @transform_3(%arg0: i32) -> (i32, i32, i32, i32) {
    %c0_i32 = arith.constant 0 : i32
    %c0_i32_0 = arith.constant 0 : i32
    %c0_i32_1 = arith.constant 0 : i32
    %c0_i32_2 = arith.constant 0 : i32
    return %arg0, %c0_i32, %c0_i32_0, %c0_i32_1 : i32, i32, i32, i32
  }
  func.func @transform_4(%arg0: i32) -> (i32, i32, i32) {
    %c0_i32 = arith.constant 0 : i32
    %c0_i32_0 = arith.constant 0 : i32
    %c0_i32_1 = arith.constant 0 : i32
    return %arg0, %c0_i32, %c0_i32_0 : i32, i32, i32
  }
  func.func @transform_5(%arg0: i32) -> (i32, i32, i32) {
    %c0_i32 = arith.constant 0 : i32
    %c0_i32_0 = arith.constant 0 : i32
    %c0_i32_1 = arith.constant 0 : i32
    return %arg0, %c0_i32, %c0_i32_0 : i32, i32, i32
  }
}

module attributes {stable_mosaic.version = 11 : i64} {
  func.func @_bnreluconv_kernel(%arg0: i32, %arg1: memref<1x4x32x128xbf16, #tpu.memory_space<vmem>>, %arg2: memref<1x128xf32, #tpu.memory_space<vmem>>, %arg3: memref<1x128xf32, #tpu.memory_space<vmem>>, %arg4: memref<3x384x128xbf16, #tpu.memory_space<vmem>>, %arg5: memref<1x4x32x128xbf16, #tpu.memory_space<vmem>>, %arg6: memref<1x1x128xf32, #tpu.memory_space<vmem>>, %arg7: memref<1x1x128xf32, #tpu.memory_space<vmem>>, %arg8: memref<192x384xbf16, #tpu.memory_space<vmem>>) attributes {dimension_semantics = [#tpu.dimension_semantics<parallel>], iteration_bounds = array<i64: 2>, scalar_prefetch = 0 : i64, scratch_operands = 1 : i64, tpu.core_type = #tpu.core_type<tc>, window_params = [{transform_indices = @transform_0, window_bounds = array<i64: 1, 4, 32, 128>}, {pipeline_mode = #tpu.pipeline_mode<synchronous>, transform_indices = @transform_1, window_bounds = array<i64: 1, 128>}, {pipeline_mode = #tpu.pipeline_mode<synchronous>, transform_indices = @transform_2, window_bounds = array<i64: 1, 128>}, {pipeline_mode = #tpu.pipeline_mode<synchronous>, transform_indices = @transform_3, window_bounds = array<i64: 3, 384, 128>}, {transform_indices = @transform_4, window_bounds = array<i64: 1, 4, 32, 128>}, {transform_indices = @transform_5, window_bounds = array<i64: 1, 1, 128>}, {transform_indices = @transform_6, window_bounds = array<i64: 1, 1, 128>}]} {
    %c0 = arith.constant 0 : index
    %c0_0 = arith.constant 0 : index
    %c0_1 = arith.constant 0 : index
    %c0_2 = arith.constant 0 : index
    %0 = vector.load %arg1[%c0, %c0_0, %c0_1, %c0_2] : memref<1x4x32x128xbf16, #tpu.memory_space<vmem>>, vector<1x4x32x128xbf16>
    %1 = vector.shape_cast %0 : vector<1x4x32x128xbf16> to vector<4x32x128xbf16>
    %2 = arith.extf %1 : vector<4x32x128xbf16> to vector<4x32x128xf32>
    %3 = vector.shape_cast %2 : vector<4x32x128xf32> to vector<128x128xf32>
    %c0_3 = arith.constant 0 : index
    %c0_4 = arith.constant 0 : index
    %4 = vector.load %arg2[%c0_3, %c0_4] : memref<1x128xf32, #tpu.memory_space<vmem>>, vector<1x128xf32>
    %5 = vector.broadcast %4 : vector<1x128xf32> to vector<128x128xf32>
    %6 = arith.mulf %3, %5 : vector<128x128xf32>
    %c0_5 = arith.constant 0 : index
    %c0_6 = arith.constant 0 : index
    %7 = vector.load %arg3[%c0_5, %c0_6] : memref<1x128xf32, #tpu.memory_space<vmem>>, vector<1x128xf32>
    %8 = vector.broadcast %7 : vector<1x128xf32> to vector<128x128xf32>
    %9 = arith.addf %6, %8 : vector<128x128xf32>
    %cst = arith.constant 0.000000e+00 : f32
    %10 = vector.broadcast %cst : f32 to vector<128x128xf32>
    %11 = arith.maximumf %9, %10 : vector<128x128xf32>
    %12 = tpu.iota {dimensions = array<i32: 0>} : vector<128x128xi32>
    %c32_i32 = arith.constant 32 : i32
    %c0_i32 = arith.constant 0 : i32
    %13 = arith.cmpi eq, %c32_i32, %c0_i32 : i32
    %c1_i32 = arith.constant 1 : i32
    %14 = arith.select %13, %c1_i32, %c32_i32 : i32
    %15 = vector.broadcast %14 : i32 to vector<128x128xi32>
    %16 = arith.remsi %12, %15 : vector<128x128xi32>
    %c0_i32_7 = arith.constant 0 : i32
    %17 = vector.broadcast %c0_i32_7 : i32 to vector<128x128xi32>
    %18 = arith.cmpi ne, %16, %17 : vector<128x128xi32>
    %c0_i32_8 = arith.constant 0 : i32
    %19 = vector.broadcast %c0_i32_8 : i32 to vector<128x128xi32>
    %20 = arith.cmpi slt, %16, %19 : vector<128x128xi32>
    %c0_i32_9 = arith.constant 0 : i32
    %21 = arith.cmpi slt, %14, %c0_i32_9 : i32
    %22 = vector.broadcast %21 : i1 to vector<128x128xi1>
    %23 = vector.broadcast %22 : vector<128x128xi1> to vector<128x128xi1>
    %24 = arith.xori %20, %23 : vector<128x128xi1>
    %25 = arith.andi %24, %18 : vector<128x128xi1>
    %26 = vector.broadcast %14 : i32 to vector<128x128xi32>
    %27 = arith.addi %16, %26 : vector<128x128xi32>
    %28 = arith.select %25, %27, %16 : vector<128x128xi1>, vector<128x128xi32>
    %c0_i32_10 = arith.constant 0 : i32
    %29 = vector.broadcast %c0_i32_10 : i32 to vector<128x128xi32>
    %30 = arith.cmpi eq, %28, %29 : vector<128x128xi32>
    %c1_i32_11 = arith.constant 1 : i32
    %31 = tpu.dynamic_rotate %11 by %c1_i32_11 dim 0 : vector<128x128xf32>, i32 -> vector<128x128xf32>
    %cst_12 = arith.constant 0.000000e+00 : f32
    %32 = vector.broadcast %cst_12 : f32 to vector<128x128xf32>
    %33 = arith.select %30, %32, %31 : vector<128x128xi1>, vector<128x128xf32>
    %c31_i32 = arith.constant 31 : i32
    %34 = vector.broadcast %c31_i32 : i32 to vector<128x128xi32>
    %35 = arith.cmpi eq, %28, %34 : vector<128x128xi32>
    %c127_i32 = arith.constant 127 : i32
    %36 = tpu.dynamic_rotate %11 by %c127_i32 dim 0 : vector<128x128xf32>, i32 -> vector<128x128xf32>
    %cst_13 = arith.constant 0.000000e+00 : f32
    %37 = vector.broadcast %cst_13 : f32 to vector<128x128xf32>
    %38 = arith.select %35, %37, %36 : vector<128x128xi1>, vector<128x128xf32>
    %cst_14 = arith.constant 0.000000e+00 : bf16
    %39 = vector.broadcast %cst_14 : bf16 to vector<32x384xbf16>
    %c0_15 = arith.constant 0 : index
    %c0_16 = arith.constant 0 : index
    %40 = vector.load %arg8[%c0_15, %c0_16] : memref<192x384xbf16, #tpu.memory_space<vmem>>, vector<32x384xbf16>
    tpu.vector_store %arg8[%c0_15, %c0_16], %39 {strides = array<i32>} : memref<192x384xbf16, #tpu.memory_space<vmem>>, vector<32x384xbf16>,
    %c160 = arith.constant 160 : index
    %c0_17 = arith.constant 0 : index
    %41 = vector.load %arg8[%c160, %c0_17] : memref<192x384xbf16, #tpu.memory_space<vmem>>, vector<32x384xbf16>
    tpu.vector_store %arg8[%c160, %c0_17], %39 {strides = array<i32>} : memref<192x384xbf16, #tpu.memory_space<vmem>>, vector<32x384xbf16>,
    %42 = arith.truncf %33 : vector<128x128xf32> to vector<128x128xbf16>
    %c32 = arith.constant 32 : index
    %c0_18 = arith.constant 0 : index
    %43 = vector.load %arg8[%c32, %c0_18] : memref<192x384xbf16, #tpu.memory_space<vmem>>, vector<128x128xbf16>
    tpu.vector_store %arg8[%c32, %c0_18], %42 {strides = array<i32>} : memref<192x384xbf16, #tpu.memory_space<vmem>>, vector<128x128xbf16>,
    %44 = arith.truncf %11 : vector<128x128xf32> to vector<128x128xbf16>
    %c32_19 = arith.constant 32 : index
    %c128 = arith.constant 128 : index
    %45 = vector.load %arg8[%c32_19, %c128] : memref<192x384xbf16, #tpu.memory_space<vmem>>, vector<128x128xbf16>
    tpu.vector_store %arg8[%c32_19, %c128], %44 {strides = array<i32>} : memref<192x384xbf16, #tpu.memory_space<vmem>>, vector<128x128xbf16>,
    %46 = arith.truncf %38 : vector<128x128xf32> to vector<128x128xbf16>
    %c32_20 = arith.constant 32 : index
    %c256 = arith.constant 256 : index
    %47 = vector.load %arg8[%c32_20, %c256] : memref<192x384xbf16, #tpu.memory_space<vmem>>, vector<128x128xbf16>
    tpu.vector_store %arg8[%c32_20, %c256], %46 {strides = array<i32>} : memref<192x384xbf16, #tpu.memory_space<vmem>>, vector<128x128xbf16>,
    %c0_21 = arith.constant 0 : index
    %c0_22 = arith.constant 0 : index
    %48 = vector.load %arg8[%c0_21, %c0_22] : memref<192x384xbf16, #tpu.memory_space<vmem>>, vector<128x384xbf16>
    %c0_23 = arith.constant 0 : index
    %c0_24 = arith.constant 0 : index
    %c0_25 = arith.constant 0 : index
    %49 = vector.load %arg4[%c0_23, %c0_24, %c0_25] : memref<3x384x128xbf16, #tpu.memory_space<vmem>>, vector<1x384x128xbf16>
    %50 = vector.shape_cast %49 : vector<1x384x128xbf16> to vector<384x128xbf16>
    %cst_26 = arith.constant dense<0.000000e+00> : vector<128x128xf32>
    %51 = tpu.matmul %48, %50, %cst_26 {dimension_numbers = #tpu.dot_dimension_numbers<[1], [0], [0], [1], [0, 0, 1, 1], [], []>} : vector<128x384xbf16>, vector<384x128xbf16>, vector<128x128xf32> -> vector<128x128xf32>
    %c32_27 = arith.constant 32 : index
    %c0_28 = arith.constant 0 : index
    %52 = vector.load %arg8[%c32_27, %c0_28] : memref<192x384xbf16, #tpu.memory_space<vmem>>, vector<128x384xbf16>
    %c1 = arith.constant 1 : index
    %c0_29 = arith.constant 0 : index
    %c0_30 = arith.constant 0 : index
    %53 = vector.load %arg4[%c1, %c0_29, %c0_30] : memref<3x384x128xbf16, #tpu.memory_space<vmem>>, vector<1x384x128xbf16>
    %54 = vector.shape_cast %53 : vector<1x384x128xbf16> to vector<384x128xbf16>
    %cst_31 = arith.constant dense<0.000000e+00> : vector<128x128xf32>
    %55 = tpu.matmul %52, %54, %cst_31 {dimension_numbers = #tpu.dot_dimension_numbers<[1], [0], [0], [1], [0, 0, 1, 1], [], []>} : vector<128x384xbf16>, vector<384x128xbf16>, vector<128x128xf32> -> vector<128x128xf32>
    %56 = arith.addf %51, %55 : vector<128x128xf32>
    %c64 = arith.constant 64 : index
    %c0_32 = arith.constant 0 : index
    %57 = vector.load %arg8[%c64, %c0_32] : memref<192x384xbf16, #tpu.memory_space<vmem>>, vector<128x384xbf16>
    %c2 = arith.constant 2 : index
    %c0_33 = arith.constant 0 : index
    %c0_34 = arith.constant 0 : index
    %58 = vector.load %arg4[%c2, %c0_33, %c0_34] : memref<3x384x128xbf16, #tpu.memory_space<vmem>>, vector<1x384x128xbf16>
    %59 = vector.shape_cast %58 : vector<1x384x128xbf16> to vector<384x128xbf16>
    %cst_35 = arith.constant dense<0.000000e+00> : vector<128x128xf32>
    %60 = tpu.matmul %57, %59, %cst_35 {dimension_numbers = #tpu.dot_dimension_numbers<[1], [0], [0], [1], [0, 0, 1, 1], [], []>} : vector<128x384xbf16>, vector<384x128xbf16>, vector<128x128xf32> -> vector<128x128xf32>
    %61 = arith.addf %56, %60 : vector<128x128xf32>
    %62 = vector.shape_cast %61 : vector<128x128xf32> to vector<4x32x128xf32>
    %63 = arith.truncf %62 : vector<4x32x128xf32> to vector<4x32x128xbf16>
    %c0_36 = arith.constant 0 : index
    %c0_37 = arith.constant 0 : index
    %c0_38 = arith.constant 0 : index
    %c0_39 = arith.constant 0 : index
    %64 = vector.load %arg5[%c0_36, %c0_37, %c0_38, %c0_39] : memref<1x4x32x128xbf16, #tpu.memory_space<vmem>>, vector<1x4x32x128xbf16>
    %65 = vector.shape_cast %64 : vector<1x4x32x128xbf16> to vector<4x32x128xbf16>
    %66 = vector.shape_cast %63 : vector<4x32x128xbf16> to vector<1x4x32x128xbf16>
    tpu.vector_store %arg5[%c0_36, %c0_37, %c0_38, %c0_39], %66 {strides = array<i32>} : memref<1x4x32x128xbf16, #tpu.memory_space<vmem>>, vector<1x4x32x128xbf16>,
    %cst_40 = arith.constant dense<0.000000e+00> : vector<128xf32>
    %67 = vector.multi_reduction <add>, %61, %cst_40 [0] : vector<128x128xf32> to vector<128xf32>
    %68 = vector.shape_cast %67 : vector<128xf32> to vector<1x128xf32>
    %c0_41 = arith.constant 0 : index
    %c0_42 = arith.constant 0 : index
    %c0_43 = arith.constant 0 : index
    %69 = vector.load %arg6[%c0_41, %c0_42, %c0_43] : memref<1x1x128xf32, #tpu.memory_space<vmem>>, vector<1x1x128xf32>
    %70 = vector.shape_cast %69 : vector<1x1x128xf32> to vector<1x128xf32>
    %71 = vector.shape_cast %68 : vector<1x128xf32> to vector<1x1x128xf32>
    tpu.vector_store %arg6[%c0_41, %c0_42, %c0_43], %71 {strides = array<i32>} : memref<1x1x128xf32, #tpu.memory_space<vmem>>, vector<1x1x128xf32>,
    %72 = arith.mulf %61, %61 : vector<128x128xf32>
    %cst_44 = arith.constant dense<0.000000e+00> : vector<128xf32>
    %73 = vector.multi_reduction <add>, %72, %cst_44 [0] : vector<128x128xf32> to vector<128xf32>
    %74 = vector.shape_cast %73 : vector<128xf32> to vector<1x128xf32>
    %c0_45 = arith.constant 0 : index
    %c0_46 = arith.constant 0 : index
    %c0_47 = arith.constant 0 : index
    %75 = vector.load %arg7[%c0_45, %c0_46, %c0_47] : memref<1x1x128xf32, #tpu.memory_space<vmem>>, vector<1x1x128xf32>
    %76 = vector.shape_cast %75 : vector<1x1x128xf32> to vector<1x128xf32>
    %77 = vector.shape_cast %74 : vector<1x128xf32> to vector<1x1x128xf32>
    tpu.vector_store %arg7[%c0_45, %c0_46, %c0_47], %77 {strides = array<i32>} : memref<1x1x128xf32, #tpu.memory_space<vmem>>, vector<1x1x128xf32>,
    return
  }
  func.func @transform_0(%arg0: i32) -> (i32, i32, i32, i32) {
    %c0_i32 = arith.constant 0 : i32
    %c0_i32_0 = arith.constant 0 : i32
    %c0_i32_1 = arith.constant 0 : i32
    %c0_i32_2 = arith.constant 0 : i32
    return %arg0, %c0_i32, %c0_i32_0, %c0_i32_1 : i32, i32, i32, i32
  }
  func.func @transform_1(%arg0: i32) -> (i32, i32) {
    %c0_i32 = arith.constant 0 : i32
    %c0_i32_0 = arith.constant 0 : i32
    %c0_i32_1 = arith.constant 0 : i32
    return %c0_i32, %c0_i32_0 : i32, i32
  }
  func.func @transform_2(%arg0: i32) -> (i32, i32) {
    %c0_i32 = arith.constant 0 : i32
    %c0_i32_0 = arith.constant 0 : i32
    %c0_i32_1 = arith.constant 0 : i32
    return %c0_i32, %c0_i32_0 : i32, i32
  }
  func.func @transform_3(%arg0: i32) -> (i32, i32, i32) {
    %c0_i32 = arith.constant 0 : i32
    %c0_i32_0 = arith.constant 0 : i32
    %c0_i32_1 = arith.constant 0 : i32
    %c0_i32_2 = arith.constant 0 : i32
    return %c0_i32, %c0_i32_0, %c0_i32_1 : i32, i32, i32
  }
  func.func @transform_4(%arg0: i32) -> (i32, i32, i32, i32) {
    %c0_i32 = arith.constant 0 : i32
    %c0_i32_0 = arith.constant 0 : i32
    %c0_i32_1 = arith.constant 0 : i32
    %c0_i32_2 = arith.constant 0 : i32
    return %arg0, %c0_i32, %c0_i32_0, %c0_i32_1 : i32, i32, i32, i32
  }
  func.func @transform_5(%arg0: i32) -> (i32, i32, i32) {
    %c0_i32 = arith.constant 0 : i32
    %c0_i32_0 = arith.constant 0 : i32
    %c0_i32_1 = arith.constant 0 : i32
    return %arg0, %c0_i32, %c0_i32_0 : i32, i32, i32
  }
  func.func @transform_6(%arg0: i32) -> (i32, i32, i32) {
    %c0_i32 = arith.constant 0 : i32
    %c0_i32_0 = arith.constant 0 : i32
    %c0_i32_1 = arith.constant 0 : i32
    return %arg0, %c0_i32, %c0_i32_0 : i32, i32, i32
  }
}

module attributes {stable_mosaic.version = 11 : i64} {
  func.func @_bnreluconv_kernel(%arg0: i32, %arg1: memref<1x4x32x128xbf16, #tpu.memory_space<vmem>>, %arg2: memref<1x128xf32, #tpu.memory_space<vmem>>, %arg3: memref<1x128xf32, #tpu.memory_space<vmem>>, %arg4: memref<3x384x128xbf16, #tpu.memory_space<vmem>>, %arg5: memref<1x4x32x128xbf16, #tpu.memory_space<vmem>>, %arg6: memref<1x4x32x128xbf16, #tpu.memory_space<vmem>>, %arg7: memref<1x1x128xf32, #tpu.memory_space<vmem>>, %arg8: memref<1x1x128xf32, #tpu.memory_space<vmem>>, %arg9: memref<192x384xbf16, #tpu.memory_space<vmem>>) attributes {dimension_semantics = [#tpu.dimension_semantics<parallel>], iteration_bounds = array<i64: 2>, scalar_prefetch = 0 : i64, scratch_operands = 1 : i64, tpu.core_type = #tpu.core_type<tc>, window_params = [{transform_indices = @transform_0, window_bounds = array<i64: 1, 4, 32, 128>}, {pipeline_mode = #tpu.pipeline_mode<synchronous>, transform_indices = @transform_1, window_bounds = array<i64: 1, 128>}, {pipeline_mode = #tpu.pipeline_mode<synchronous>, transform_indices = @transform_2, window_bounds = array<i64: 1, 128>}, {pipeline_mode = #tpu.pipeline_mode<synchronous>, transform_indices = @transform_3, window_bounds = array<i64: 3, 384, 128>}, {transform_indices = @transform_4, window_bounds = array<i64: 1, 4, 32, 128>}, {transform_indices = @transform_5, window_bounds = array<i64: 1, 4, 32, 128>}, {transform_indices = @transform_6, window_bounds = array<i64: 1, 1, 128>}, {transform_indices = @transform_7, window_bounds = array<i64: 1, 1, 128>}]} {
    %c0 = arith.constant 0 : index
    %c0_0 = arith.constant 0 : index
    %c0_1 = arith.constant 0 : index
    %c0_2 = arith.constant 0 : index
    %0 = vector.load %arg1[%c0, %c0_0, %c0_1, %c0_2] : memref<1x4x32x128xbf16, #tpu.memory_space<vmem>>, vector<1x4x32x128xbf16>
    %1 = vector.shape_cast %0 : vector<1x4x32x128xbf16> to vector<4x32x128xbf16>
    %2 = arith.extf %1 : vector<4x32x128xbf16> to vector<4x32x128xf32>
    %3 = vector.shape_cast %2 : vector<4x32x128xf32> to vector<128x128xf32>
    %c0_3 = arith.constant 0 : index
    %c0_4 = arith.constant 0 : index
    %4 = vector.load %arg2[%c0_3, %c0_4] : memref<1x128xf32, #tpu.memory_space<vmem>>, vector<1x128xf32>
    %5 = vector.broadcast %4 : vector<1x128xf32> to vector<128x128xf32>
    %6 = arith.mulf %3, %5 : vector<128x128xf32>
    %c0_5 = arith.constant 0 : index
    %c0_6 = arith.constant 0 : index
    %7 = vector.load %arg3[%c0_5, %c0_6] : memref<1x128xf32, #tpu.memory_space<vmem>>, vector<1x128xf32>
    %8 = vector.broadcast %7 : vector<1x128xf32> to vector<128x128xf32>
    %9 = arith.addf %6, %8 : vector<128x128xf32>
    %cst = arith.constant 0.000000e+00 : f32
    %10 = vector.broadcast %cst : f32 to vector<128x128xf32>
    %11 = arith.maximumf %9, %10 : vector<128x128xf32>
    %12 = tpu.iota {dimensions = array<i32: 0>} : vector<128x128xi32>
    %c32_i32 = arith.constant 32 : i32
    %c0_i32 = arith.constant 0 : i32
    %13 = arith.cmpi eq, %c32_i32, %c0_i32 : i32
    %c1_i32 = arith.constant 1 : i32
    %14 = arith.select %13, %c1_i32, %c32_i32 : i32
    %15 = vector.broadcast %14 : i32 to vector<128x128xi32>
    %16 = arith.remsi %12, %15 : vector<128x128xi32>
    %c0_i32_7 = arith.constant 0 : i32
    %17 = vector.broadcast %c0_i32_7 : i32 to vector<128x128xi32>
    %18 = arith.cmpi ne, %16, %17 : vector<128x128xi32>
    %c0_i32_8 = arith.constant 0 : i32
    %19 = vector.broadcast %c0_i32_8 : i32 to vector<128x128xi32>
    %20 = arith.cmpi slt, %16, %19 : vector<128x128xi32>
    %c0_i32_9 = arith.constant 0 : i32
    %21 = arith.cmpi slt, %14, %c0_i32_9 : i32
    %22 = vector.broadcast %21 : i1 to vector<128x128xi1>
    %23 = vector.broadcast %22 : vector<128x128xi1> to vector<128x128xi1>
    %24 = arith.xori %20, %23 : vector<128x128xi1>
    %25 = arith.andi %24, %18 : vector<128x128xi1>
    %26 = vector.broadcast %14 : i32 to vector<128x128xi32>
    %27 = arith.addi %16, %26 : vector<128x128xi32>
    %28 = arith.select %25, %27, %16 : vector<128x128xi1>, vector<128x128xi32>
    %c0_i32_10 = arith.constant 0 : i32
    %29 = vector.broadcast %c0_i32_10 : i32 to vector<128x128xi32>
    %30 = arith.cmpi eq, %28, %29 : vector<128x128xi32>
    %c1_i32_11 = arith.constant 1 : i32
    %31 = tpu.dynamic_rotate %11 by %c1_i32_11 dim 0 : vector<128x128xf32>, i32 -> vector<128x128xf32>
    %cst_12 = arith.constant 0.000000e+00 : f32
    %32 = vector.broadcast %cst_12 : f32 to vector<128x128xf32>
    %33 = arith.select %30, %32, %31 : vector<128x128xi1>, vector<128x128xf32>
    %c31_i32 = arith.constant 31 : i32
    %34 = vector.broadcast %c31_i32 : i32 to vector<128x128xi32>
    %35 = arith.cmpi eq, %28, %34 : vector<128x128xi32>
    %c127_i32 = arith.constant 127 : i32
    %36 = tpu.dynamic_rotate %11 by %c127_i32 dim 0 : vector<128x128xf32>, i32 -> vector<128x128xf32>
    %cst_13 = arith.constant 0.000000e+00 : f32
    %37 = vector.broadcast %cst_13 : f32 to vector<128x128xf32>
    %38 = arith.select %35, %37, %36 : vector<128x128xi1>, vector<128x128xf32>
    %cst_14 = arith.constant 0.000000e+00 : bf16
    %39 = vector.broadcast %cst_14 : bf16 to vector<32x384xbf16>
    %c0_15 = arith.constant 0 : index
    %c0_16 = arith.constant 0 : index
    %40 = vector.load %arg9[%c0_15, %c0_16] : memref<192x384xbf16, #tpu.memory_space<vmem>>, vector<32x384xbf16>
    tpu.vector_store %arg9[%c0_15, %c0_16], %39 {strides = array<i32>} : memref<192x384xbf16, #tpu.memory_space<vmem>>, vector<32x384xbf16>,
    %c160 = arith.constant 160 : index
    %c0_17 = arith.constant 0 : index
    %41 = vector.load %arg9[%c160, %c0_17] : memref<192x384xbf16, #tpu.memory_space<vmem>>, vector<32x384xbf16>
    tpu.vector_store %arg9[%c160, %c0_17], %39 {strides = array<i32>} : memref<192x384xbf16, #tpu.memory_space<vmem>>, vector<32x384xbf16>,
    %42 = arith.truncf %33 : vector<128x128xf32> to vector<128x128xbf16>
    %c32 = arith.constant 32 : index
    %c0_18 = arith.constant 0 : index
    %43 = vector.load %arg9[%c32, %c0_18] : memref<192x384xbf16, #tpu.memory_space<vmem>>, vector<128x128xbf16>
    tpu.vector_store %arg9[%c32, %c0_18], %42 {strides = array<i32>} : memref<192x384xbf16, #tpu.memory_space<vmem>>, vector<128x128xbf16>,
    %44 = arith.truncf %11 : vector<128x128xf32> to vector<128x128xbf16>
    %c32_19 = arith.constant 32 : index
    %c128 = arith.constant 128 : index
    %45 = vector.load %arg9[%c32_19, %c128] : memref<192x384xbf16, #tpu.memory_space<vmem>>, vector<128x128xbf16>
    tpu.vector_store %arg9[%c32_19, %c128], %44 {strides = array<i32>} : memref<192x384xbf16, #tpu.memory_space<vmem>>, vector<128x128xbf16>,
    %46 = arith.truncf %38 : vector<128x128xf32> to vector<128x128xbf16>
    %c32_20 = arith.constant 32 : index
    %c256 = arith.constant 256 : index
    %47 = vector.load %arg9[%c32_20, %c256] : memref<192x384xbf16, #tpu.memory_space<vmem>>, vector<128x128xbf16>
    tpu.vector_store %arg9[%c32_20, %c256], %46 {strides = array<i32>} : memref<192x384xbf16, #tpu.memory_space<vmem>>, vector<128x128xbf16>,
    %c0_21 = arith.constant 0 : index
    %c0_22 = arith.constant 0 : index
    %c0_23 = arith.constant 0 : index
    %c0_24 = arith.constant 0 : index
    %48 = vector.load %arg5[%c0_21, %c0_22, %c0_23, %c0_24] : memref<1x4x32x128xbf16, #tpu.memory_space<vmem>>, vector<1x4x32x128xbf16>
    %49 = vector.shape_cast %48 : vector<1x4x32x128xbf16> to vector<4x32x128xbf16>
    %50 = arith.extf %49 : vector<4x32x128xbf16> to vector<4x32x128xf32>
    %51 = vector.shape_cast %50 : vector<4x32x128xf32> to vector<128x128xf32>
    %c0_25 = arith.constant 0 : index
    %c0_26 = arith.constant 0 : index
    %52 = vector.load %arg9[%c0_25, %c0_26] : memref<192x384xbf16, #tpu.memory_space<vmem>>, vector<128x384xbf16>
    %c0_27 = arith.constant 0 : index
    %c0_28 = arith.constant 0 : index
    %c0_29 = arith.constant 0 : index
    %53 = vector.load %arg4[%c0_27, %c0_28, %c0_29] : memref<3x384x128xbf16, #tpu.memory_space<vmem>>, vector<1x384x128xbf16>
    %54 = vector.shape_cast %53 : vector<1x384x128xbf16> to vector<384x128xbf16>
    %cst_30 = arith.constant dense<0.000000e+00> : vector<128x128xf32>
    %55 = tpu.matmul %52, %54, %cst_30 {dimension_numbers = #tpu.dot_dimension_numbers<[1], [0], [0], [1], [0, 0, 1, 1], [], []>} : vector<128x384xbf16>, vector<384x128xbf16>, vector<128x128xf32> -> vector<128x128xf32>
    %56 = arith.addf %51, %55 : vector<128x128xf32>
    %c32_31 = arith.constant 32 : index
    %c0_32 = arith.constant 0 : index
    %57 = vector.load %arg9[%c32_31, %c0_32] : memref<192x384xbf16, #tpu.memory_space<vmem>>, vector<128x384xbf16>
    %c1 = arith.constant 1 : index
    %c0_33 = arith.constant 0 : index
    %c0_34 = arith.constant 0 : index
    %58 = vector.load %arg4[%c1, %c0_33, %c0_34] : memref<3x384x128xbf16, #tpu.memory_space<vmem>>, vector<1x384x128xbf16>
    %59 = vector.shape_cast %58 : vector<1x384x128xbf16> to vector<384x128xbf16>
    %cst_35 = arith.constant dense<0.000000e+00> : vector<128x128xf32>
    %60 = tpu.matmul %57, %59, %cst_35 {dimension_numbers = #tpu.dot_dimension_numbers<[1], [0], [0], [1], [0, 0, 1, 1], [], []>} : vector<128x384xbf16>, vector<384x128xbf16>, vector<128x128xf32> -> vector<128x128xf32>
    %61 = arith.addf %56, %60 : vector<128x128xf32>
    %c64 = arith.constant 64 : index
    %c0_36 = arith.constant 0 : index
    %62 = vector.load %arg9[%c64, %c0_36] : memref<192x384xbf16, #tpu.memory_space<vmem>>, vector<128x384xbf16>
    %c2 = arith.constant 2 : index
    %c0_37 = arith.constant 0 : index
    %c0_38 = arith.constant 0 : index
    %63 = vector.load %arg4[%c2, %c0_37, %c0_38] : memref<3x384x128xbf16, #tpu.memory_space<vmem>>, vector<1x384x128xbf16>
    %64 = vector.shape_cast %63 : vector<1x384x128xbf16> to vector<384x128xbf16>
    %cst_39 = arith.constant dense<0.000000e+00> : vector<128x128xf32>
    %65 = tpu.matmul %62, %64, %cst_39 {dimension_numbers = #tpu.dot_dimension_numbers<[1], [0], [0], [1], [0, 0, 1, 1], [], []>} : vector<128x384xbf16>, vector<384x128xbf16>, vector<128x128xf32> -> vector<128x128xf32>
    %66 = arith.addf %61, %65 : vector<128x128xf32>
    %67 = vector.shape_cast %66 : vector<128x128xf32> to vector<4x32x128xf32>
    %68 = arith.truncf %67 : vector<4x32x128xf32> to vector<4x32x128xbf16>
    %c0_40 = arith.constant 0 : index
    %c0_41 = arith.constant 0 : index
    %c0_42 = arith.constant 0 : index
    %c0_43 = arith.constant 0 : index
    %69 = vector.load %arg6[%c0_40, %c0_41, %c0_42, %c0_43] : memref<1x4x32x128xbf16, #tpu.memory_space<vmem>>, vector<1x4x32x128xbf16>
    %70 = vector.shape_cast %69 : vector<1x4x32x128xbf16> to vector<4x32x128xbf16>
    %71 = vector.shape_cast %68 : vector<4x32x128xbf16> to vector<1x4x32x128xbf16>
    tpu.vector_store %arg6[%c0_40, %c0_41, %c0_42, %c0_43], %71 {strides = array<i32>} : memref<1x4x32x128xbf16, #tpu.memory_space<vmem>>, vector<1x4x32x128xbf16>,
    %cst_44 = arith.constant dense<0.000000e+00> : vector<128xf32>
    %72 = vector.multi_reduction <add>, %66, %cst_44 [0] : vector<128x128xf32> to vector<128xf32>
    %73 = vector.shape_cast %72 : vector<128xf32> to vector<1x128xf32>
    %c0_45 = arith.constant 0 : index
    %c0_46 = arith.constant 0 : index
    %c0_47 = arith.constant 0 : index
    %74 = vector.load %arg7[%c0_45, %c0_46, %c0_47] : memref<1x1x128xf32, #tpu.memory_space<vmem>>, vector<1x1x128xf32>
    %75 = vector.shape_cast %74 : vector<1x1x128xf32> to vector<1x128xf32>
    %76 = vector.shape_cast %73 : vector<1x128xf32> to vector<1x1x128xf32>
    tpu.vector_store %arg7[%c0_45, %c0_46, %c0_47], %76 {strides = array<i32>} : memref<1x1x128xf32, #tpu.memory_space<vmem>>, vector<1x1x128xf32>,
    %77 = arith.mulf %66, %66 : vector<128x128xf32>
    %cst_48 = arith.constant dense<0.000000e+00> : vector<128xf32>
    %78 = vector.multi_reduction <add>, %77, %cst_48 [0] : vector<128x128xf32> to vector<128xf32>
    %79 = vector.shape_cast %78 : vector<128xf32> to vector<1x128xf32>
    %c0_49 = arith.constant 0 : index
    %c0_50 = arith.constant 0 : index
    %c0_51 = arith.constant 0 : index
    %80 = vector.load %arg8[%c0_49, %c0_50, %c0_51] : memref<1x1x128xf32, #tpu.memory_space<vmem>>, vector<1x1x128xf32>
    %81 = vector.shape_cast %80 : vector<1x1x128xf32> to vector<1x128xf32>
    %82 = vector.shape_cast %79 : vector<1x128xf32> to vector<1x1x128xf32>
    tpu.vector_store %arg8[%c0_49, %c0_50, %c0_51], %82 {strides = array<i32>} : memref<1x1x128xf32, #tpu.memory_space<vmem>>, vector<1x1x128xf32>,
    return
  }
  func.func @transform_0(%arg0: i32) -> (i32, i32, i32, i32) {
    %c0_i32 = arith.constant 0 : i32
    %c0_i32_0 = arith.constant 0 : i32
    %c0_i32_1 = arith.constant 0 : i32
    %c0_i32_2 = arith.constant 0 : i32
    return %arg0, %c0_i32, %c0_i32_0, %c0_i32_1 : i32, i32, i32, i32
  }
  func.func @transform_1(%arg0: i32) -> (i32, i32) {
    %c0_i32 = arith.constant 0 : i32
    %c0_i32_0 = arith.constant 0 : i32
    %c0_i32_1 = arith.constant 0 : i32
    return %c0_i32, %c0_i32_0 : i32, i32
  }
  func.func @transform_2(%arg0: i32) -> (i32, i32) {
    %c0_i32 = arith.constant 0 : i32
    %c0_i32_0 = arith.constant 0 : i32
    %c0_i32_1 = arith.constant 0 : i32
    return %c0_i32, %c0_i32_0 : i32, i32
  }
  func.func @transform_3(%arg0: i32) -> (i32, i32, i32) {
    %c0_i32 = arith.constant 0 : i32
    %c0_i32_0 = arith.constant 0 : i32
    %c0_i32_1 = arith.constant 0 : i32
    %c0_i32_2 = arith.constant 0 : i32
    return %c0_i32, %c0_i32_0, %c0_i32_1 : i32, i32, i32
  }
  func.func @transform_4(%arg0: i32) -> (i32, i32, i32, i32) {
    %c0_i32 = arith.constant 0 : i32
    %c0_i32_0 = arith.constant 0 : i32
    %c0_i32_1 = arith.constant 0 : i32
    %c0_i32_2 = arith.constant 0 : i32
    return %arg0, %c0_i32, %c0_i32_0, %c0_i32_1 : i32, i32, i32, i32
  }
  func.func @transform_5(%arg0: i32) -> (i32, i32, i32, i32) {
    %c0_i32 = arith.constant 0 : i32
    %c0_i32_0 = arith.constant 0 : i32
    %c0_i32_1 = arith.constant 0 : i32
    %c0_i32_2 = arith.constant 0 : i32
    return %arg0, %c0_i32, %c0_i32_0, %c0_i32_1 : i32, i32, i32, i32
  }
  func.func @transform_6(%arg0: i32) -> (i32, i32, i32) {
    %c0_i32 = arith.constant 0 : i32
    %c0_i32_0 = arith.constant 0 : i32
    %c0_i32_1 = arith.constant 0 : i32
    return %arg0, %c0_i32, %c0_i32_0 : i32, i32, i32
  }
  func.func @transform_7(%arg0: i32) -> (i32, i32, i32) {
    %c0_i32 = arith.constant 0 : i32
    %c0_i32_0 = arith.constant 0 : i32
    %c0_i32_1 = arith.constant 0 : i32
    return %arg0, %c0_i32, %c0_i32_0 : i32, i32, i32
  }
}

module attributes {stable_mosaic.version = 11 : i64} {
  func.func @_bnreluconv_kernel(%arg0: i32, %arg1: memref<1x4x32x128xbf16, #tpu.memory_space<vmem>>, %arg2: memref<1x128xf32, #tpu.memory_space<vmem>>, %arg3: memref<1x128xf32, #tpu.memory_space<vmem>>, %arg4: memref<3x384x128xbf16, #tpu.memory_space<vmem>>, %arg5: memref<1x4x32x128xf32, #tpu.memory_space<vmem>>, %arg6: memref<1x1x128xf32, #tpu.memory_space<vmem>>, %arg7: memref<1x1x128xf32, #tpu.memory_space<vmem>>, %arg8: memref<192x384xbf16, #tpu.memory_space<vmem>>) attributes {dimension_semantics = [#tpu.dimension_semantics<parallel>], iteration_bounds = array<i64: 2>, scalar_prefetch = 0 : i64, scratch_operands = 1 : i64, tpu.core_type = #tpu.core_type<tc>, window_params = [{transform_indices = @transform_0, window_bounds = array<i64: 1, 4, 32, 128>}, {pipeline_mode = #tpu.pipeline_mode<synchronous>, transform_indices = @transform_1, window_bounds = array<i64: 1, 128>}, {pipeline_mode = #tpu.pipeline_mode<synchronous>, transform_indices = @transform_2, window_bounds = array<i64: 1, 128>}, {pipeline_mode = #tpu.pipeline_mode<synchronous>, transform_indices = @transform_3, window_bounds = array<i64: 3, 384, 128>}, {transform_indices = @transform_4, window_bounds = array<i64: 1, 4, 32, 128>}, {transform_indices = @transform_5, window_bounds = array<i64: 1, 1, 128>}, {transform_indices = @transform_6, window_bounds = array<i64: 1, 1, 128>}]} {
    %c0 = arith.constant 0 : index
    %c0_0 = arith.constant 0 : index
    %c0_1 = arith.constant 0 : index
    %c0_2 = arith.constant 0 : index
    %0 = vector.load %arg1[%c0, %c0_0, %c0_1, %c0_2] : memref<1x4x32x128xbf16, #tpu.memory_space<vmem>>, vector<1x4x32x128xbf16>
    %1 = vector.shape_cast %0 : vector<1x4x32x128xbf16> to vector<4x32x128xbf16>
    %2 = arith.extf %1 : vector<4x32x128xbf16> to vector<4x32x128xf32>
    %3 = vector.shape_cast %2 : vector<4x32x128xf32> to vector<128x128xf32>
    %c0_3 = arith.constant 0 : index
    %c0_4 = arith.constant 0 : index
    %4 = vector.load %arg2[%c0_3, %c0_4] : memref<1x128xf32, #tpu.memory_space<vmem>>, vector<1x128xf32>
    %5 = vector.broadcast %4 : vector<1x128xf32> to vector<128x128xf32>
    %6 = arith.mulf %3, %5 : vector<128x128xf32>
    %c0_5 = arith.constant 0 : index
    %c0_6 = arith.constant 0 : index
    %7 = vector.load %arg3[%c0_5, %c0_6] : memref<1x128xf32, #tpu.memory_space<vmem>>, vector<1x128xf32>
    %8 = vector.broadcast %7 : vector<1x128xf32> to vector<128x128xf32>
    %9 = arith.addf %6, %8 : vector<128x128xf32>
    %cst = arith.constant 0.000000e+00 : f32
    %10 = vector.broadcast %cst : f32 to vector<128x128xf32>
    %11 = arith.maximumf %9, %10 : vector<128x128xf32>
    %12 = tpu.iota {dimensions = array<i32: 0>} : vector<128x128xi32>
    %c32_i32 = arith.constant 32 : i32
    %c0_i32 = arith.constant 0 : i32
    %13 = arith.cmpi eq, %c32_i32, %c0_i32 : i32
    %c1_i32 = arith.constant 1 : i32
    %14 = arith.select %13, %c1_i32, %c32_i32 : i32
    %15 = vector.broadcast %14 : i32 to vector<128x128xi32>
    %16 = arith.remsi %12, %15 : vector<128x128xi32>
    %c0_i32_7 = arith.constant 0 : i32
    %17 = vector.broadcast %c0_i32_7 : i32 to vector<128x128xi32>
    %18 = arith.cmpi ne, %16, %17 : vector<128x128xi32>
    %c0_i32_8 = arith.constant 0 : i32
    %19 = vector.broadcast %c0_i32_8 : i32 to vector<128x128xi32>
    %20 = arith.cmpi slt, %16, %19 : vector<128x128xi32>
    %c0_i32_9 = arith.constant 0 : i32
    %21 = arith.cmpi slt, %14, %c0_i32_9 : i32
    %22 = vector.broadcast %21 : i1 to vector<128x128xi1>
    %23 = vector.broadcast %22 : vector<128x128xi1> to vector<128x128xi1>
    %24 = arith.xori %20, %23 : vector<128x128xi1>
    %25 = arith.andi %24, %18 : vector<128x128xi1>
    %26 = vector.broadcast %14 : i32 to vector<128x128xi32>
    %27 = arith.addi %16, %26 : vector<128x128xi32>
    %28 = arith.select %25, %27, %16 : vector<128x128xi1>, vector<128x128xi32>
    %c0_i32_10 = arith.constant 0 : i32
    %29 = vector.broadcast %c0_i32_10 : i32 to vector<128x128xi32>
    %30 = arith.cmpi eq, %28, %29 : vector<128x128xi32>
    %c1_i32_11 = arith.constant 1 : i32
    %31 = tpu.dynamic_rotate %11 by %c1_i32_11 dim 0 : vector<128x128xf32>, i32 -> vector<128x128xf32>
    %cst_12 = arith.constant 0.000000e+00 : f32
    %32 = vector.broadcast %cst_12 : f32 to vector<128x128xf32>
    %33 = arith.select %30, %32, %31 : vector<128x128xi1>, vector<128x128xf32>
    %c31_i32 = arith.constant 31 : i32
    %34 = vector.broadcast %c31_i32 : i32 to vector<128x128xi32>
    %35 = arith.cmpi eq, %28, %34 : vector<128x128xi32>
    %c127_i32 = arith.constant 127 : i32
    %36 = tpu.dynamic_rotate %11 by %c127_i32 dim 0 : vector<128x128xf32>, i32 -> vector<128x128xf32>
    %cst_13 = arith.constant 0.000000e+00 : f32
    %37 = vector.broadcast %cst_13 : f32 to vector<128x128xf32>
    %38 = arith.select %35, %37, %36 : vector<128x128xi1>, vector<128x128xf32>
    %cst_14 = arith.constant 0.000000e+00 : bf16
    %39 = vector.broadcast %cst_14 : bf16 to vector<32x384xbf16>
    %c0_15 = arith.constant 0 : index
    %c0_16 = arith.constant 0 : index
    %40 = vector.load %arg8[%c0_15, %c0_16] : memref<192x384xbf16, #tpu.memory_space<vmem>>, vector<32x384xbf16>
    tpu.vector_store %arg8[%c0_15, %c0_16], %39 {strides = array<i32>} : memref<192x384xbf16, #tpu.memory_space<vmem>>, vector<32x384xbf16>,
    %c160 = arith.constant 160 : index
    %c0_17 = arith.constant 0 : index
    %41 = vector.load %arg8[%c160, %c0_17] : memref<192x384xbf16, #tpu.memory_space<vmem>>, vector<32x384xbf16>
    tpu.vector_store %arg8[%c160, %c0_17], %39 {strides = array<i32>} : memref<192x384xbf16, #tpu.memory_space<vmem>>, vector<32x384xbf16>,
    %42 = arith.truncf %33 : vector<128x128xf32> to vector<128x128xbf16>
    %c32 = arith.constant 32 : index
    %c0_18 = arith.constant 0 : index
    %43 = vector.load %arg8[%c32, %c0_18] : memref<192x384xbf16, #tpu.memory_space<vmem>>, vector<128x128xbf16>
    tpu.vector_store %arg8[%c32, %c0_18], %42 {strides = array<i32>} : memref<192x384xbf16, #tpu.memory_space<vmem>>, vector<128x128xbf16>,
    %44 = arith.truncf %11 : vector<128x128xf32> to vector<128x128xbf16>
    %c32_19 = arith.constant 32 : index
    %c128 = arith.constant 128 : index
    %45 = vector.load %arg8[%c32_19, %c128] : memref<192x384xbf16, #tpu.memory_space<vmem>>, vector<128x128xbf16>
    tpu.vector_store %arg8[%c32_19, %c128], %44 {strides = array<i32>} : memref<192x384xbf16, #tpu.memory_space<vmem>>, vector<128x128xbf16>,
    %46 = arith.truncf %38 : vector<128x128xf32> to vector<128x128xbf16>
    %c32_20 = arith.constant 32 : index
    %c256 = arith.constant 256 : index
    %47 = vector.load %arg8[%c32_20, %c256] : memref<192x384xbf16, #tpu.memory_space<vmem>>, vector<128x128xbf16>
    tpu.vector_store %arg8[%c32_20, %c256], %46 {strides = array<i32>} : memref<192x384xbf16, #tpu.memory_space<vmem>>, vector<128x128xbf16>,
    %c0_21 = arith.constant 0 : index
    %c0_22 = arith.constant 0 : index
    %48 = vector.load %arg8[%c0_21, %c0_22] : memref<192x384xbf16, #tpu.memory_space<vmem>>, vector<128x384xbf16>
    %c0_23 = arith.constant 0 : index
    %c0_24 = arith.constant 0 : index
    %c0_25 = arith.constant 0 : index
    %49 = vector.load %arg4[%c0_23, %c0_24, %c0_25] : memref<3x384x128xbf16, #tpu.memory_space<vmem>>, vector<1x384x128xbf16>
    %50 = vector.shape_cast %49 : vector<1x384x128xbf16> to vector<384x128xbf16>
    %cst_26 = arith.constant dense<0.000000e+00> : vector<128x128xf32>
    %51 = tpu.matmul %48, %50, %cst_26 {dimension_numbers = #tpu.dot_dimension_numbers<[1], [0], [0], [1], [0, 0, 1, 1], [], []>} : vector<128x384xbf16>, vector<384x128xbf16>, vector<128x128xf32> -> vector<128x128xf32>
    %c32_27 = arith.constant 32 : index
    %c0_28 = arith.constant 0 : index
    %52 = vector.load %arg8[%c32_27, %c0_28] : memref<192x384xbf16, #tpu.memory_space<vmem>>, vector<128x384xbf16>
    %c1 = arith.constant 1 : index
    %c0_29 = arith.constant 0 : index
    %c0_30 = arith.constant 0 : index
    %53 = vector.load %arg4[%c1, %c0_29, %c0_30] : memref<3x384x128xbf16, #tpu.memory_space<vmem>>, vector<1x384x128xbf16>
    %54 = vector.shape_cast %53 : vector<1x384x128xbf16> to vector<384x128xbf16>
    %cst_31 = arith.constant dense<0.000000e+00> : vector<128x128xf32>
    %55 = tpu.matmul %52, %54, %cst_31 {dimension_numbers = #tpu.dot_dimension_numbers<[1], [0], [0], [1], [0, 0, 1, 1], [], []>} : vector<128x384xbf16>, vector<384x128xbf16>, vector<128x128xf32> -> vector<128x128xf32>
    %56 = arith.addf %51, %55 : vector<128x128xf32>
    %c64 = arith.constant 64 : index
    %c0_32 = arith.constant 0 : index
    %57 = vector.load %arg8[%c64, %c0_32] : memref<192x384xbf16, #tpu.memory_space<vmem>>, vector<128x384xbf16>
    %c2 = arith.constant 2 : index
    %c0_33 = arith.constant 0 : index
    %c0_34 = arith.constant 0 : index
    %58 = vector.load %arg4[%c2, %c0_33, %c0_34] : memref<3x384x128xbf16, #tpu.memory_space<vmem>>, vector<1x384x128xbf16>
    %59 = vector.shape_cast %58 : vector<1x384x128xbf16> to vector<384x128xbf16>
    %cst_35 = arith.constant dense<0.000000e+00> : vector<128x128xf32>
    %60 = tpu.matmul %57, %59, %cst_35 {dimension_numbers = #tpu.dot_dimension_numbers<[1], [0], [0], [1], [0, 0, 1, 1], [], []>} : vector<128x384xbf16>, vector<384x128xbf16>, vector<128x128xf32> -> vector<128x128xf32>
    %61 = arith.addf %56, %60 : vector<128x128xf32>
    %62 = vector.shape_cast %61 : vector<128x128xf32> to vector<4x32x128xf32>
    %c0_36 = arith.constant 0 : index
    %c0_37 = arith.constant 0 : index
    %c0_38 = arith.constant 0 : index
    %c0_39 = arith.constant 0 : index
    %63 = vector.load %arg5[%c0_36, %c0_37, %c0_38, %c0_39] : memref<1x4x32x128xf32, #tpu.memory_space<vmem>>, vector<1x4x32x128xf32>
    %64 = vector.shape_cast %63 : vector<1x4x32x128xf32> to vector<4x32x128xf32>
    %65 = vector.shape_cast %62 : vector<4x32x128xf32> to vector<1x4x32x128xf32>
    tpu.vector_store %arg5[%c0_36, %c0_37, %c0_38, %c0_39], %65 {strides = array<i32>} : memref<1x4x32x128xf32, #tpu.memory_space<vmem>>, vector<1x4x32x128xf32>,
    %cst_40 = arith.constant dense<0.000000e+00> : vector<128xf32>
    %66 = vector.multi_reduction <add>, %61, %cst_40 [0] : vector<128x128xf32> to vector<128xf32>
    %67 = vector.shape_cast %66 : vector<128xf32> to vector<1x128xf32>
    %c0_41 = arith.constant 0 : index
    %c0_42 = arith.constant 0 : index
    %c0_43 = arith.constant 0 : index
    %68 = vector.load %arg6[%c0_41, %c0_42, %c0_43] : memref<1x1x128xf32, #tpu.memory_space<vmem>>, vector<1x1x128xf32>
    %69 = vector.shape_cast %68 : vector<1x1x128xf32> to vector<1x128xf32>
    %70 = vector.shape_cast %67 : vector<1x128xf32> to vector<1x1x128xf32>
    tpu.vector_store %arg6[%c0_41, %c0_42, %c0_43], %70 {strides = array<i32>} : memref<1x1x128xf32, #tpu.memory_space<vmem>>, vector<1x1x128xf32>,
    %71 = arith.mulf %61, %61 : vector<128x128xf32>
    %cst_44 = arith.constant dense<0.000000e+00> : vector<128xf32>
    %72 = vector.multi_reduction <add>, %71, %cst_44 [0] : vector<128x128xf32> to vector<128xf32>
    %73 = vector.shape_cast %72 : vector<128xf32> to vector<1x128xf32>
    %c0_45 = arith.constant 0 : index
    %c0_46 = arith.constant 0 : index
    %c0_47 = arith.constant 0 : index
    %74 = vector.load %arg7[%c0_45, %c0_46, %c0_47] : memref<1x1x128xf32, #tpu.memory_space<vmem>>, vector<1x1x128xf32>
    %75 = vector.shape_cast %74 : vector<1x1x128xf32> to vector<1x128xf32>
    %76 = vector.shape_cast %73 : vector<1x128xf32> to vector<1x1x128xf32>
    tpu.vector_store %arg7[%c0_45, %c0_46, %c0_47], %76 {strides = array<i32>} : memref<1x1x128xf32, #tpu.memory_space<vmem>>, vector<1x1x128xf32>,
    return
  }
  func.func @transform_0(%arg0: i32) -> (i32, i32, i32, i32) {
    %c0_i32 = arith.constant 0 : i32
    %c0_i32_0 = arith.constant 0 : i32
    %c0_i32_1 = arith.constant 0 : i32
    %c0_i32_2 = arith.constant 0 : i32
    return %arg0, %c0_i32, %c0_i32_0, %c0_i32_1 : i32, i32, i32, i32
  }
  func.func @transform_1(%arg0: i32) -> (i32, i32) {
    %c0_i32 = arith.constant 0 : i32
    %c0_i32_0 = arith.constant 0 : i32
    %c0_i32_1 = arith.constant 0 : i32
    return %c0_i32, %c0_i32_0 : i32, i32
  }
  func.func @transform_2(%arg0: i32) -> (i32, i32) {
    %c0_i32 = arith.constant 0 : i32
    %c0_i32_0 = arith.constant 0 : i32
    %c0_i32_1 = arith.constant 0 : i32
    return %c0_i32, %c0_i32_0 : i32, i32
  }
  func.func @transform_3(%arg0: i32) -> (i32, i32, i32) {
    %c0_i32 = arith.constant 0 : i32
    %c0_i32_0 = arith.constant 0 : i32
    %c0_i32_1 = arith.constant 0 : i32
    %c0_i32_2 = arith.constant 0 : i32
    return %c0_i32, %c0_i32_0, %c0_i32_1 : i32, i32, i32
  }
  func.func @transform_4(%arg0: i32) -> (i32, i32, i32, i32) {
    %c0_i32 = arith.constant 0 : i32
    %c0_i32_0 = arith.constant 0 : i32
    %c0_i32_1 = arith.constant 0 : i32
    %c0_i32_2 = arith.constant 0 : i32
    return %arg0, %c0_i32, %c0_i32_0, %c0_i32_1 : i32, i32, i32, i32
  }
  func.func @transform_5(%arg0: i32) -> (i32, i32, i32) {
    %c0_i32 = arith.constant 0 : i32
    %c0_i32_0 = arith.constant 0 : i32
    %c0_i32_1 = arith.constant 0 : i32
    return %arg0, %c0_i32, %c0_i32_0 : i32, i32, i32
  }
  func.func @transform_6(%arg0: i32) -> (i32, i32, i32) {
    %c0_i32 = arith.constant 0 : i32
    %c0_i32_0 = arith.constant 0 : i32
    %c0_i32_1 = arith.constant 0 : i32
    return %arg0, %c0_i32, %c0_i32_0 : i32, i32, i32
  }
}

</mosaic_0001>

<bundles_post_ra>
// kernel: upconvblock_forward.4
= control target key start
LH: loop header
LB: loop body
LE: loop exit
PB: predicated region body
PF: predicated region fallthrough
CT: control target
= control target key end

     0   :  { %s1371_s18 = smov 0   ;;  %s1625_s0 = inlined_call_operand.vmem [shape: f32[2,4,18,144], index: 0, kind: input, shape index: {}]   ;;  %s1626_s1 = inlined_call_operand.vmem [shape: bf16[144,128], index: 1, kind: input, shape index: {}]   ;;  %s1627_s2 = inlined_call_operand.vmem [shape: f32[2,4,16,256], index: 2, kind: input, shape index: {}]   ;;  %s1628_s3 = inlined_call_operand.vmem [shape: bf16[2,4,16,256], index: 3, kind: output, shape index: {0}]   ;;  %s1629_s4 = inlined_call_operand.vmem [shape: f32[2,1,128], index: 4, kind: output, shape index: {1}]   ;;  %s1630_s5 = inlined_call_operand.vmem [shape: f32[2,1,128], index: 5, kind: output, shape index: {2}]  }
   0x1 LB: > { %s1232_s19 = sadd.s32 4294967295, %s1338_s18   ;;  %p1236_p0 = scmp.ge.s32.totalorder %s1338_s18, 1  ;;  %s1338_s18 = sphi %s1371_s18, %s16_s18  }
   0x2   : > { %p202_p1 = scmp.lt.s32.totalorder %s1338_s18, 3 }
   0x4   : > { %p203_p2 = pnand %p1236_p0, %p202_p1 }
   0x5   : > { %v1323_v0 = vld [vmem:[%s1626_s1] sm:$0xff] (!%p203_p2)   ;;  %v1340_v1 = vmov (!%p203_p2), 0   ;;  %p241_p3 = scmp.lt.s32.totalorder (!%p203_p2), %s1232_s19, 1  ;;  %v1324_v2 = vld [vmem:[%s1626_s1 + $0x8] sm:$0xff] (!%p203_p2)   ;;  %v1325_v3 = vld [vmem:[%s1626_s1 + $0x10] sm:$0xff] (!%p203_p2)   ;;  %vm367_vm0 = vcmask (!%p203_p2), 1040384  }
   0x6   : > { %206 = sbr.rel (%p203_p2) target bundleno = 325 (0x145), region = 32  ;;  %834 = vmatprep.subr.bf16.mxu0 (!%p203_p2), %v1340_v1  ;;  %1295 = vmatprep.subr.bf16.mxu1 (!%p203_p2), %v1340_v1  ;;  %v1326_v4 = vld [vmem:[%s1626_s1 + $0x18] sm:$0xff] (!%p203_p2)   ;;  %vm472_vm1 = vcmask (!%p203_p2), 1046528   ;;  %vm809_vm2 = vcmask (!%p203_p2), 130048   ;;  %v1327_v28 = vld [vmem:[%s1626_s1 + $0x20] sm:$0xff] (!%p203_p2)   ;;  %v1328_v47 = vld [vmem:[%s1626_s1 + $0x28] sm:$0xff] (!%p203_p2)  }
   0x7   : > { %835 = vmatpush1.bf16.msra.mxu0 (!%p203_p2), %v1323_v0  ;;  %1304 = vmatpush1.bf16.msra.mxu1 (!%p203_p2), %v1323_v0 }
   0x8   : > { %836 = vmatprep.subr.bf16.mxu0 (!%p203_p2), %v1340_v1  ;;  %1296 = vmatprep.subr.bf16.mxu1 (!%p203_p2), %v1340_v1 }
   0xb   : > { %837 = vmatpush1.bf16.msra.mxu0 (!%p203_p2), %v1324_v2  ;;  %1305 = vmatpush1.bf16.msra.mxu1 (!%p203_p2), %v1324_v2 }
   0xc   : > { %838 = vmatprep.subr.bf16.mxu0 (!%p203_p2), %v1340_v1  ;;  %1297 = vmatprep.subr.bf16.mxu1 (!%p203_p2), %v1340_v1 }
   0xd   : > { %s1632_s19 = smov (!%p241_p3, %s1232_s19), 1 }
   0xe   : > { %s1313_s24 = smul.u32 192, %s1632_s19  ;;  %s1277_s17 = sshll.u32 %s1632_s19, 7 }
   0xf   : > { %839 = vmatpush1.bf16.msra.mxu0 %v1325_v3  ;;  %1306 = vmatpush1.bf16.msra.mxu1 %v1325_v3  ;;  %s1574_s22 = scalar_lea.vmem %s1627_s2, %s1277_s17  ;;  %s1278_s23 = sshll.u32 %s1632_s19, 6 }
  0x10   : > { %s1400_s29 = scalar_lea.vmem %s1625_s0, %s1313_s24  ;;  %840 = vmatprep.subr.bf16.mxu0 %v1340_v1  ;;  %1298 = vmatprep.subr.bf16.mxu1 %v1340_v1  ;;  %s1584_s26 = scalar_lea.vmem %s1628_s3, %s1278_s23 }
  0x11   : > { %v264_v5 = vld [vmem:[%s1400_s29 + $0x8] sm:$0xfe]  ;;  %v266_v6 = vld [vmem:[%s1400_s29 + $0x18] sm:$0xff]  ;;  %v268_v7 = vld [vmem:[%s1400_s29 + $0x28] sm:$0x1]  ;;  %s261_s7 = scalar_lea.vmem %s1630_s5, %s1632_s19 }
  0x12   : > { %v288_v8 = vld [vmem:[%s1400_s29 + $0x8] sm:$0xff]  ;;  %v312_v9 = vmul.f32 0.75, %v264_v5  ;;  %v314_v10 = vmul.f32 0.75, %v266_v6  ;;  %v316_v11 = vmul.f32 0.75, %v268_v7  ;;  %v338_v12 = vmul.f32 0.25, %v266_v6  ;;  %v265_v13 = vld [vmem:[%s1400_s29 + $0x10] sm:$0xff] }
  0x13   : > { %v336_v14 = vmul.f32 0.25, %v288_v8  ;;  %v296_v15 = vld [vmem:[%s1400_s29 + $0x8] sm:$0xfc]  ;;  %v298_v16 = vld [vmem:[%s1400_s29 + $0x28] sm:$0x3]  ;;  %v287_v17 = vld [vmem:[%s1400_s29] sm:$0xff]  ;;  %841 = vmatpush1.bf16.msra.mxu0 %v1326_v4  ;;  %1307 = vmatpush1.bf16.msra.mxu1 %v1326_v4 }
  0x14   : > { %v372_v18 = vrot.slane %v338_v12, 7  ;;  %v441_v19 = vmul.f32 0.25, %v296_v15  ;;  %v443_v20 = vmul.f32 0.25, %v298_v16  ;;  %v477_v21 = vrot.slane %v338_v12, 1  ;;  %v263_v22 = vld [vmem:[%s1400_s29] sm:$0xfe]  ;;  %842 = vmatprep.subr.bf16.mxu0 %v1340_v1  ;;  %1299 = vmatprep.subr.bf16.mxu1 %v1340_v1 }
  0x15   : > { %v369_v23 = vrot.slane %v336_v14, 7  ;;  %v267_v24 = vld [vmem:[%s1400_s29 + $0x20] sm:$0x1]  ;;  %v1417_v25 = vmul.f32 0.75, %v263_v22  ;;  %v1419_v26 = vmul.f32 0.75, %v265_v13  ;;  %v335_v27 = vmul.f32 0.25, %v287_v17 }
  0x16   : > { %v421_v29 = vadd.f32 %v372_v18, %v316_v11  ;;  %v476_v30 = vrot.slane %v441_v19, 1  ;;  %v481_v31 = vrot.slane %v443_v20, 1  ;;  %v1424_v32 = vmul.f32 0.75, %v267_v24  ;;  %v295_v37 = vld [vmem:[%s1400_s29] sm:$0xfc]  ;;  %v272_v2 = vld [vmem:[%s1400_s29 + $0x48] sm:$0xff] }
  0x17   : > { %v373_v33 = vsel %vm367_vm0, %v369_v23, %v372_v18  ;;  %v417_v34 = vadd.f32 %v369_v23, %v312_v9  ;;  %v1429_v35 = vmul.f32 0.25, %v265_v13  ;;  %v368_v36 = vrot.slane %v335_v27, 7  ;;  %v297_v42 = vld [vmem:[%s1400_s29 + $0x20] sm:$0x3]  ;;  %843 = vmatpush1.bf16.msra.mxu0 %v1327_v28  ;;  %1308 = vmatpush1.bf16.msra.mxu1 %v1327_v28  ;;  %v270_v60 = vld [vmem:[%s1400_s29 + $0x38] sm:$0xfe] }
  0x18   : > { %v419_v38 = vadd.f32 %v373_v33, %v314_v10  ;;  %v617_v39 = vrot.slane %v421_v29, 1  ;;  %v478_v40 = vsel %vm472_vm1, %v476_v30, %v477_v21  ;;  %v482_v41 = vsel %vm472_vm1, %v477_v21, %v481_v31  ;;  %844 = vmatprep.subr.bf16.mxu0 %v1340_v1  ;;  %1300 = vmatprep.subr.bf16.mxu1 %v1340_v1  ;;  %v274_v3 = vld [vmem:[%s1400_s29 + $0x58] sm:$0x1]  ;;  %v1329_v5 = vld [vmem:[%s1626_s1 + $0x30] sm:$0xff]   ;;  %v300_v14 = vld [vmem:[%s1400_s29 + $0x38] sm:$0xfc] }
  0x19   : > { %v612_v43 = vrot.slane %v417_v34, 1  ;;  %v538_v44 = vadd.f32 %v478_v40, %v312_v9  ;;  %v540_v45 = vadd.f32 %v482_v41, %v314_v10  ;;  %v542_v46 = vadd.f32 %v481_v31, %v316_v11  ;;  %v290_v4 = vld [vmem:[%s1400_s29 + $0x38] sm:$0xff]  ;;  %v269_v40 = vld [vmem:[%s1400_s29 + $0x30] sm:$0xfe] }
  0x1a   : > { %v613_v48 = vrot.slane %v419_v38, 1  ;;  %v370_v49 = vrot.slane %v1429_v35, 7  ;;  %v416_v50 = vadd.f32 %v368_v36, %v1417_v25  ;;  %v440_v51 = vmul.f32 0.25, %v295_v37  ;;  %v302_v19 = vld [vmem:[%s1400_s29 + $0x58] sm:$0x3] }
  0x1b   : > { %v652_v52 = vrot.slane %v538_v44, 1  ;;  %v653_v53 = vrot.slane %v540_v45, 1  ;;  %v657_v54 = vrot.slane %v542_v46, 1  ;;  %v442_v55 = vmul.f32 0.25, %v297_v42  ;;  %845 = vmatpush1.bf16.msra.mxu0 %v1328_v47  ;;  %1309 = vmatpush1.bf16.msra.mxu1 %v1328_v47  ;;  %v1330_v24 = vld [vmem:[%s1626_s1 + $0x38] sm:$0xff]  }
  0x1c   : > { %v614_v56 = vsel %vm472_vm1, %v612_v43, %v613_v48  ;;  %v618_v57 = vsel %vm472_vm1, %v613_v48, %v617_v39  ;;  %v371_v58 = vsel %vm367_vm0, %v368_v36, %v370_v49  ;;  %v420_v59 = vadd.f32 %v370_v49, %v1424_v32  ;;  %846 = vmatprep.subr.bf16.mxu0 %v1340_v1  ;;  %v273_v47 = vld [vmem:[%s1400_s29 + $0x50] sm:$0x1] }
  0x1d   : > { %v722_v61 = vpack.c.bf16 %v618_v57, %v614_v56  ;;  %v654_v62 = vsel %vm472_vm1, %v652_v52, %v653_v53  ;;  %v658_v63 = vsel %vm472_vm1, %v653_v53, %v657_v54  ;;  %v418_v0 = vadd.f32 %v371_v58, %v1419_v26  ;;  %1301 = vmatprep.subr.bf16.mxu1 %v1340_v1  ;;  %v271_v57 = vld [vmem:[%s1400_s29 + $0x40] sm:$0xff]  ;;  %v299_v58 = vld [vmem:[%s1400_s29 + $0x30] sm:$0xfc] }
  0x1e   : > { %v730_v6 = vpack.c.bf16 %v658_v63, %v654_v62  ;;  %v609_v7 = vrot.slane %v416_v50, 1  ;;  %v615_v8 = vrot.slane %v420_v59, 1  ;;  %v473_v9 = vrot.slane %v440_v51, 1  ;;  %v289_v51 = vld [vmem:[%s1400_s29 + $0x30] sm:$0xff]  ;;  %v276_v63 = vld [vmem:[%s1400_s29 + $0x68] sm:$0xfe] }
  0x1f   : > { %v610_v10 = vrot.slane %v418_v0, 1  ;;  %v474_v11 = vrot.slane %v1429_v35, 1  ;;  %v479_v12 = vrot.slane %v442_v55, 1  ;;  %v318_v13 = vmul.f32 0.75, %v270_v60  ;;  %1251 = vmatprep.mubr.msk.bf16.mxu0 %vm809_vm2, %v722_v61  ;;  %847 = vmatpush1.bf16.msra.mxu0 %v1329_v5  ;;  %v301_v62 = vld [vmem:[%s1400_s29 + $0x50] sm:$0x3] }
  0x20   : > { %1255 = vmatprep.mubr.msk.bf16.mxu1 %vm809_vm2, %v730_v6  ;;  %v320_v15 = vmul.f32 0.75, %v272_v2  ;;  %v322_v16 = vmul.f32 0.75, %v274_v3  ;;  %v340_v17 = vmul.f32 0.25, %v290_v4  ;;  %v342_v18 = vmul.f32 0.25, %v272_v2  ;;  %1310 = vmatpush1.bf16.msra.mxu1 %v1329_v5 }
  0x21   : > { %v1464_v20 = vsel %vm472_vm1, %v609_v7, %v610_v10  ;;  %v1467_v21 = vsel %vm472_vm1, %v610_v10, %v615_v8  ;;  %v475_v22 = vsel %vm472_vm1, %v473_v9, %v474_v11  ;;  %v480_v23 = vsel %vm472_vm1, %v474_v11, %v479_v12  ;;  %848 = vmatprep.subr.bf16.mxu0 %v1340_v1 }
  0x22   : > { %v721_v27 = vpack.c.bf16 %v1467_v21, %v1464_v20  ;;  %v537_v28 = vadd.f32 %v475_v22, %v1417_v25  ;;  %v539_v29 = vadd.f32 %v480_v23, %v1419_v26  ;;  %v375_v30 = vrot.slane %v340_v17, 7  ;;  %1302 = vmatprep.subr.bf16.mxu1 %v1340_v1  ;;  %v278_v22 = vld [vmem:[%s1400_s29 + $0x78] sm:$0xff] }
  0x23   : > { %v541_v31 = vadd.f32 %v479_v12, %v1424_v32  ;;  %v378_v33 = vrot.slane %v342_v18, 7  ;;  %v445_v34 = vmul.f32 0.25, %v300_v14  ;;  %v447_v35 = vmul.f32 0.25, %v302_v19  ;;  %849 = vmatpush1.bf16.msra.mxu0 %v1330_v24  ;;  %v1331_v32 = vld [vmem:[%s1626_s1 + $0x40] sm:$0xff]   ;;  %v280_v12 = vld [vmem:[%s1400_s29 + $0x88] sm:$0x1] }
  0x24   : > { %v649_v36 = vrot.slane %v537_v28, 1  ;;  %v650_v37 = vrot.slane %v539_v29, 1  ;;  %v423_v38 = vadd.f32 %v375_v30, %v318_v13  ;;  %v487_v39 = vrot.slane %v342_v18, 1  ;;  %1311 = vmatpush1.bf16.msra.mxu1 %v1330_v24  ;;  %850 = vmatprep.subr.bf16.mxu0 %v1340_v1 }
  0x25   : > { %v655_v41 = vrot.slane %v541_v31, 1  ;;  %v379_v25 = vsel %vm367_vm0, %v375_v30, %v378_v33  ;;  %v427_v26 = vadd.f32 %v378_v33, %v322_v16  ;;  %v486_v42 = vrot.slane %v445_v34, 1  ;;  %1303 = vmatprep.subr.bf16.mxu1 %v1340_v1  ;;  %v304_v30 = vld [vmem:[%s1400_s29 + $0x68] sm:$0xfc] }
  0x26   : > { %v651_v43 = vsel %vm472_vm1, %v649_v36, %v650_v37  ;;  %v425_v44 = vadd.f32 %v379_v25, %v320_v15  ;;  %v622_v45 = vrot.slane %v423_v38, 1  ;;  %v491_v46 = vrot.slane %v447_v35, 1  ;;  %v306_v36 = vld [vmem:[%s1400_s29 + $0x88] sm:$0x3] }
  0x27   : > { %v656_v48 = vsel %vm472_vm1, %v650_v37, %v655_v41  ;;  %v627_v49 = vrot.slane %v427_v26, 1  ;;  %v488_v50 = vsel %vm472_vm1, %v486_v42, %v487_v39  ;;  %v317_v52 = vmul.f32 0.75, %v269_v40  ;;  %851 = vmatpush1.bf16.msra.mxu0 %v1331_v32 }
  0x28   : > { %v729_v53 = vpack.c.bf16 %v656_v48, %v651_v43  ;;  %v623_v54 = vrot.slane %v425_v44, 1  ;;  %v492_v55 = vsel %vm472_vm1, %v487_v39, %v491_v46  ;;  %v544_v56 = vadd.f32 %v488_v50, %v318_v13  ;;  %1312 = vmatpush1.bf16.msra.mxu1 %v1331_v32  ;;  %v275_v50 = vld [vmem:[%s1400_s29 + $0x60] sm:$0xfe] }
  0x29   : > { %v546_v59 = vadd.f32 %v492_v55, %v320_v15  ;;  %v548_v60 = vadd.f32 %v491_v46, %v322_v16  ;;  %v319_v61 = vmul.f32 0.75, %v271_v57  ;;  %v321_v1 = vmul.f32 0.75, %v273_v47  ;;  %v279_v55 = vld [vmem:[%s1400_s29 + $0x80] sm:$0x1] }
  0x2a   : > { %v624_v0 = vsel %vm472_vm1, %v622_v45, %v623_v54  ;;  %v628_v2 = vsel %vm472_vm1, %v623_v54, %v627_v49  ;;  %v662_v3 = vrot.slane %v544_v56, 1  ;;  %v339_v4 = vmul.f32 0.25, %v289_v51  ;;  %867 = vmatmul.mubr.bf16.vlgmr.msra.gmra.mrb[0].mxu0 %v721_v27  ;;  %v292_v27 = vld [vmem:[%s1400_s29 + $0x68] sm:$0xff] }
  0x2b   : > { %v724_v5 = vpack.c.bf16 %v628_v2, %v624_v0  ;;  %v663_v6 = vrot.slane %v546_v59, 1  ;;  %v667_v7 = vrot.slane %v548_v60, 1  ;;  %v341_v8 = vmul.f32 0.25, %v271_v57  ;;  %899 = vmatmul.mubr.bf16.vlgmr.msra.gmra.mrb[0].mxu1 %v729_v53 }
  0x2c   : > { %v374_v9 = vrot.slane %v339_v4, 7  ;;  %v444_v10 = vmul.f32 0.25, %v299_v58  ;;  %v446_v11 = vmul.f32 0.25, %v301_v62  ;;  %v1501_v13 = vmul.f32 0.75, %v276_v63  ;;  %v277_v62 = vld [vmem:[%s1400_s29 + $0x70] sm:$0xff]  ;;  %v291_v63 = vld [vmem:[%s1400_s29 + $0x60] sm:$0xff] }
  0x2d   : > { %v664_v14 = vsel %vm472_vm1, %v662_v3, %v663_v6  ;;  %v668_v15 = vsel %vm472_vm1, %v663_v6, %v667_v7  ;;  %v376_v16 = vrot.slane %v341_v8, 7  ;;  %v484_v17 = vrot.slane %v341_v8, 1  ;;  %1252 = vmatprep.mubr.msk.bf16.mxu0 %vm809_vm2, %v724_v5  ;;  %v303_v6 = vld [vmem:[%s1400_s29 + $0x60] sm:$0xfc] }
  0x2e   : > { %v732_v18 = vpack.c.bf16 %v668_v15, %v664_v14  ;;  %v422_v19 = vadd.f32 %v374_v9, %v317_v52  ;;  %v483_v20 = vrot.slane %v444_v10, 1  ;;  %v489_v21 = vrot.slane %v446_v11, 1 }
  0x2f   : > { %v377_v23 = vsel %vm367_vm0, %v374_v9, %v376_v16  ;;  %v426_v24 = vadd.f32 %v376_v16, %v321_v1  ;;  %v326_v28 = vmul.f32 0.75, %v278_v22  ;;  %v328_v29 = vmul.f32 0.75, %v280_v12  ;;  %v305_v16 = vld [vmem:[%s1400_s29 + $0x80] sm:$0x3] }
  0x30   : > { %1256 = vmatprep.mubr.msk.bf16.mxu1 %vm809_vm2, %v732_v18  ;;  %v424_v31 = vadd.f32 %v377_v23, %v319_v61  ;;  %v619_v33 = vrot.slane %v422_v19, 1  ;;  %v485_v34 = vsel %vm472_vm1, %v483_v20, %v484_v17  ;;  %v490_v35 = vsel %vm472_vm1, %v484_v17, %v489_v21 }
  0x31   : > { %v625_v37 = vrot.slane %v426_v24, 1  ;;  %v543_v38 = vadd.f32 %v485_v34, %v317_v52  ;;  %v545_v39 = vadd.f32 %v490_v35, %v319_v61  ;;  %v547_v40 = vadd.f32 %v489_v21, %v321_v1  ;;  %v282_v21 = vld [vmem:[%s1400_s29 + $0x98] sm:$0xfe]  ;;  %v286_v35 = vld [vmem:[%s1400_s29 + $0xb8] sm:$0x1] }
  0x32   : > { %v620_v41 = vrot.slane %v424_v31, 1  ;;  %v344_v25 = vmul.f32 0.25, %v292_v27  ;;  %v346_v26 = vmul.f32 0.25, %v278_v22  ;;  %v449_v42 = vmul.f32 0.25, %v304_v30 }
  0x33   : > { %v659_v32 = vrot.slane %v543_v38, 1  ;;  %v660_v43 = vrot.slane %v545_v39, 1  ;;  %v665_v44 = vrot.slane %v547_v40, 1  ;;  %v451_v45 = vmul.f32 0.25, %v306_v36  ;;  %v294_v36 = vld [vmem:[%s1400_s29 + $0x98] sm:$0xff] }
  0x34   : > { %v621_v46 = vsel %vm472_vm1, %v619_v33, %v620_v41  ;;  %v626_v47 = vsel %vm472_vm1, %v620_v41, %v625_v37  ;;  %v381_v48 = vrot.slane %v344_v25, 7  ;;  %v384_v49 = vrot.slane %v346_v26, 7 }
  0x35   : > { %v723_v51 = vpack.c.bf16 %v626_v47, %v621_v46  ;;  %v661_v52 = vsel %vm472_vm1, %v659_v32, %v660_v43  ;;  %v666_v53 = vsel %vm472_vm1, %v660_v43, %v665_v44  ;;  %v496_v54 = vrot.slane %v449_v42, 1  ;;  %v284_v43 = vld [vmem:[%s1400_s29 + $0xa8] sm:$0xff]  ;;  %v308_v44 = vld [vmem:[%s1400_s29 + $0x98] sm:$0xfc] }
  0x36   : > { %v731_v56 = vpack.c.bf16 %v666_v53, %v661_v52  ;;  %v385_v57 = vsel %vm367_vm0, %v381_v48, %v384_v49  ;;  %v429_v58 = vadd.f32 %v381_v48, %v1501_v13  ;;  %v433_v59 = vadd.f32 %v384_v49, %v328_v29  ;;  %v310_v49 = vld [vmem:[%s1400_s29 + $0xb8] sm:$0x3] }
  0x37   : > { %875 = vmatmul.mubr.bf16.gmra.mrb[4].mxu0 %v723_v51  ;;  %v431_v60 = vadd.f32 %v385_v57, %v326_v28  ;;  %v497_v61 = vrot.slane %v346_v26, 1  ;;  %v501_v1 = vrot.slane %v451_v45, 1  ;;  %v323_v0 = vmul.f32 0.75, %v275_v50 }
  0x38   : > { %907 = vmatmul.mubr.bf16.gmra.mrb[4].mxu1 %v731_v56  ;;  %v632_v2 = vrot.slane %v429_v58, 1  ;;  %v637_v3 = vrot.slane %v433_v59, 1  ;;  %v325_v4 = vmul.f32 0.75, %v277_v62  ;;  %v327_v5 = vmul.f32 0.75, %v279_v55  ;;  %v281_v58 = vld [vmem:[%s1400_s29 + $0x90] sm:$0xfe] }
  0x39   : > { %v633_v7 = vrot.slane %v431_v60, 1  ;;  %v498_v8 = vsel %vm472_vm1, %v496_v54, %v497_v61  ;;  %v502_v9 = vsel %vm472_vm1, %v497_v61, %v501_v1  ;;  %v554_v10 = vadd.f32 %v501_v1, %v328_v29 }
  0x3a   : > { %v550_v11 = vadd.f32 %v498_v8, %v1501_v13  ;;  %v552_v12 = vadd.f32 %v502_v9, %v326_v28  ;;  %v343_v14 = vmul.f32 0.25, %v291_v63  ;;  %v345_v15 = vmul.f32 0.25, %v277_v62 }
  0x3b   : > { %v634_v17 = vsel %vm472_vm1, %v632_v2, %v633_v7  ;;  %v638_v18 = vsel %vm472_vm1, %v633_v7, %v637_v3  ;;  %v677_v19 = vrot.slane %v554_v10, 1  ;;  %v448_v20 = vmul.f32 0.25, %v303_v6 }
  0x3c   : > { %v726_v22 = vpack.c.bf16 %v638_v18, %v634_v17  ;;  %v672_v23 = vrot.slane %v550_v11, 1  ;;  %v673_v24 = vrot.slane %v552_v12, 1  ;;  %v380_v27 = vrot.slane %v343_v14, 7  ;;  %v285_v11 = vld [vmem:[%s1400_s29 + $0xb0] sm:$0x1]  ;;  %v283_v17 = vld [vmem:[%s1400_s29 + $0xa0] sm:$0xff] }
  0x3d   : > { %v382_v29 = vrot.slane %v345_v15, 7  ;;  %v450_v30 = vmul.f32 0.25, %v305_v16  ;;  %v493_v13 = vrot.slane %v448_v20, 1  ;;  %v494_v28 = vrot.slane %v345_v15, 1  ;;  %v293_v18 = vld [vmem:[%s1400_s29 + $0x90] sm:$0xff] }
  0x3e   : > { %1253 = vmatprep.mubr.msk.bf16.mxu0 %vm809_vm2, %v726_v22  ;;  %v674_v31 = vsel %vm472_vm1, %v672_v23, %v673_v24  ;;  %v678_v33 = vsel %vm472_vm1, %v673_v24, %v677_v19  ;;  %v428_v34 = vadd.f32 %v380_v27, %v323_v0  ;;  %v330_v37 = vmul.f32 0.75, %v282_v21  ;;  %v307_v23 = vld [vmem:[%s1400_s29 + $0x90] sm:$0xfc] }
  0x3f   : > { %v734_v38 = vpack.c.bf16 %v678_v33, %v674_v31  ;;  %v383_v39 = vsel %vm367_vm0, %v380_v27, %v382_v29  ;;  %v432_v40 = vadd.f32 %v382_v29, %v327_v5  ;;  %v495_v41 = vsel %vm472_vm1, %v493_v13, %v494_v28  ;;  %v309_v13 = vld [vmem:[%s1400_s29 + $0xb0] sm:$0x3]  ;;  %s258_s29 = scalar_lea.vmem %s1629_s4, %s1632_s19 }
  0x40   : > { %v430_v25 = vadd.f32 %v383_v39, %v325_v4  ;;  %v629_v26 = vrot.slane %v428_v34, 1  ;;  %v499_v42 = vrot.slane %v450_v30, 1  ;;  %v549_v32 = vadd.f32 %v495_v41, %v323_v0 }
  0x41   : > { %1257 = vmatprep.mubr.msk.bf16.mxu1 %vm809_vm2, %v734_v38  ;;  %v635_v45 = vrot.slane %v432_v40, 1  ;;  %v332_v46 = vmul.f32 0.75, %v284_v43  ;;  %v334_v47 = vmul.f32 0.75, %v286_v35  ;;  %v348_v48 = vmul.f32 0.25, %v294_v36 }
  0x42   : > { %v630_v50 = vrot.slane %v430_v25, 1  ;;  %v500_v51 = vsel %vm472_vm1, %v494_v28, %v499_v42  ;;  %v553_v52 = vadd.f32 %v499_v42, %v327_v5  ;;  %v669_v53 = vrot.slane %v549_v32, 1 }
  0x43   : > { %v551_v54 = vadd.f32 %v500_v51, %v325_v4  ;;  %v350_v55 = vmul.f32 0.25, %v284_v43  ;;  %v387_v56 = vrot.slane %v348_v48, 7  ;;  %v453_v57 = vmul.f32 0.25, %v308_v44 }
  0x44   : > { %v631_v59 = vsel %vm472_vm1, %v629_v26, %v630_v50  ;;  %v636_v60 = vsel %vm472_vm1, %v630_v50, %v635_v45  ;;  %v675_v61 = vrot.slane %v553_v52, 1  ;;  %v455_v1 = vmul.f32 0.25, %v310_v49 }
  0x45   : > { %v725_v62 = vpack.c.bf16 %v636_v60, %v631_v59  ;;  %v670_v63 = vrot.slane %v551_v54, 1  ;;  %v390_v0 = vrot.slane %v350_v55, 7  ;;  %v435_v2 = vadd.f32 %v387_v56, %v330_v37 }
  0x46   : > { %v506_v3 = vrot.slane %v453_v57, 1  ;;  %v507_v5 = vrot.slane %v350_v55, 1  ;;  %v511_v4 = vrot.slane %v455_v1, 1  ;;  %v329_v6 = vmul.f32 0.75, %v281_v58 }
  0x47   : > { %883 = vmatmul.mubr.bf16.gmra.mrb[8].mxu0 %v725_v62  ;;  %v671_v7 = vsel %vm472_vm1, %v669_v53, %v670_v63  ;;  %v676_v8 = vsel %vm472_vm1, %v670_v63, %v675_v61  ;;  %v391_v9 = vsel %vm367_vm0, %v387_v56, %v390_v0  ;;  %v439_v10 = vadd.f32 %v390_v0, %v334_v47 }
  0x48   : > { %v733_v12 = vpack.c.bf16 %v676_v8, %v671_v7  ;;  %v437_v14 = vadd.f32 %v391_v9, %v332_v46  ;;  %v642_v15 = vrot.slane %v435_v2, 1  ;;  %v508_v16 = vsel %vm472_vm1, %v506_v3, %v507_v5  ;;  %v931_v3 = vld [vmem:[%s1574_s22] sm:$0xff] }
  0x49   : > { %v647_v19 = vrot.slane %v439_v10, 1  ;;  %v512_v20 = vsel %vm472_vm1, %v507_v5, %v511_v4  ;;  %v556_v21 = vadd.f32 %v508_v16, %v330_v37  ;;  %v560_v22 = vadd.f32 %v511_v4, %v334_v47  ;;  %v932_v5 = vld [vmem:[%s1574_s22 + $0x8] sm:$0xff] }
  0x4a   : > { %915 = vmatmul.mubr.bf16.gmra.mrb[8].mxu1 %v733_v12  ;;  %v643_v24 = vrot.slane %v437_v14, 1  ;;  %v558_v27 = vadd.f32 %v512_v20, %v332_v46  ;;  %v331_v29 = vmul.f32 0.75, %v283_v17  ;;  %v333_v30 = vmul.f32 0.75, %v285_v11  ;;  %v933_v11 = vld [vmem:[%s1574_s22 + $0x10] sm:$0xff]  ;;  %v934_v12 = vld [vmem:[%s1574_s22 + $0x18] sm:$0xff] }
  0x4b   : > { %v682_v28 = vrot.slane %v556_v21, 1  ;;  %v687_v31 = vrot.slane %v560_v22, 1  ;;  %v347_v33 = vmul.f32 0.25, %v293_v18  ;;  %v349_v34 = vmul.f32 0.25, %v283_v17 }
  0x4c   : > { %v644_v35 = vsel %vm472_vm1, %v642_v15, %v643_v24  ;;  %v648_v36 = vsel %vm472_vm1, %v643_v24, %v647_v19  ;;  %v683_v38 = vrot.slane %v558_v27, 1  ;;  %v452_v39 = vmul.f32 0.25, %v307_v23 }
  0x4d   : > { %v728_v40 = vpack.c.bf16 %v648_v36, %v644_v35  ;;  %v386_v37 = vrot.slane %v347_v33, 7  ;;  %v388_v41 = vrot.slane %v349_v34, 7  ;;  %v454_v25 = vmul.f32 0.25, %v309_v13  ;;  %v935_v33 = vld [vmem:[%s1574_s22 + $0x20] sm:$0xff]  ;;  %v936_v35 = vld [vmem:[%s1574_s22 + $0x28] sm:$0xff] }
  0x4e   : > { %v684_v26 = vsel %vm472_vm1, %v682_v28, %v683_v38  ;;  %v688_v42 = vsel %vm472_vm1, %v683_v38, %v687_v31  ;;  %v503_v32 = vrot.slane %v452_v39, 1  ;;  %v504_v43 = vrot.slane %v349_v34, 1  ;;  %v937_v38 = vld [vmem:[%s1574_s22 + $0x30] sm:$0xff] }
  0x4f   : > { %1254 = vmatprep.mubr.msk.bf16.mxu0 %vm809_vm2, %v728_v40  ;;  %v736_v44 = vpack.c.bf16 %v688_v42, %v684_v26  ;;  %v389_v45 = vsel %vm367_vm0, %v386_v37, %v388_v41  ;;  %v434_v46 = vadd.f32 %v386_v37, %v329_v6  ;;  %v438_v47 = vadd.f32 %v388_v41, %v333_v30  ;;  %v938_v41 = vld [vmem:[%s1574_s22 + $0x38] sm:$0xff] }
  0x50   : > { %v436_v48 = vadd.f32 %v389_v45, %v331_v29  ;;  %v505_v49 = vsel %vm472_vm1, %v503_v32, %v504_v43  ;;  %v509_v50 = vrot.slane %v454_v25, 1 }
  0x51   : > { %1258 = vmatprep.mubr.msk.bf16.mxu1 %vm809_vm2, %v736_v44  ;;  %v639_v51 = vrot.slane %v434_v46, 1  ;;  %v645_v52 = vrot.slane %v438_v47, 1  ;;  %v555_v53 = vadd.f32 %v505_v49, %v329_v6 }
  0x52   : > { %v640_v54 = vrot.slane %v436_v48, 1  ;;  %v510_v55 = vsel %vm472_vm1, %v504_v43, %v509_v50  ;;  %v559_v56 = vadd.f32 %v509_v50, %v333_v30 }
  0x53   : > { %v557_v57 = vadd.f32 %v510_v55, %v331_v29  ;;  %v679_v58 = vrot.slane %v555_v53, 1 }
  0x54   : > { %v641_v59 = vsel %vm472_vm1, %v639_v51, %v640_v54  ;;  %v646_v60 = vsel %vm472_vm1, %v640_v54, %v645_v52  ;;  %v685_v61 = vrot.slane %v559_v56, 1 }
  0x55   : > { %v727_v1 = vpack.c.bf16 %v646_v60, %v641_v59  ;;  %v680_v62 = vrot.slane %v557_v57, 1 }
  0x57   : > { %891 = vmatmul.mubr.bf16.gmra.mrb[12].mxu0 %v727_v1  ;;  %v681_v63 = vsel %vm472_vm1, %v679_v58, %v680_v62  ;;  %v686_v0 = vsel %vm472_vm1, %v680_v62, %v685_v61  ;;  %v939_v62 = vld [vmem:[%s1574_s22 + $0x40] sm:$0xff] }
  0x58   : > { %v735_v2 = vpack.c.bf16 %v686_v0, %v681_v63  ;;  %v941_v0 = vld [vmem:[%s1574_s22 + $0x50] sm:$0xff] }
  0x5a   : > { %923 = vmatmul.mubr.bf16.gmra.mrb[12].mxu1 %v735_v2 }
  0xfd   : > { %v868_v4 = vpop.f32.mrb[0].mxu0 }
  0xfe   : > { %v900_v6 = vpop.f32.mrb[0].mxu1  ;;  %v947_v7 = vadd.f32 %v931_v3, %v868_v4  ;;  %v870_v9 = vpop.f32.mrb[1].mxu0  ;;  %v940_v3 = vld [vmem:[%s1574_s22 + $0x48] sm:$0xff] }
  0xff   : > { %v955_v8 = vadd.f32 %v932_v5, %v900_v6  ;;  %v902_v10 = vpop.f32.mrb[1].mxu1  ;;  %v871_v14 = vpop.f32.mrb[2].mxu0 }
 0x100   : > { %v903_v15 = vpop.f32.mrb[2].mxu1  ;;  %v1279_v16 = vpack.c.bf16 %v947_v7, %v947_v7  ;;  %v873_v18 = vpop.f32.mrb[3].mxu0  ;;  %v948_v20 = vadd.f32 %v933_v11, %v871_v14  ;;  %v1071_v22 = vmul.f32 %v947_v7, %v947_v7  ;;  %v942_v11 = vld [vmem:[%s1574_s22 + $0x58] sm:$0xff] }
 0x101   : > { %v1287_v17 = vpack.c.bf16 %v955_v8, %v955_v8  ;;  %v905_v19 = vpop.f32.mrb[3].mxu1  ;;  %v956_v21 = vadd.f32 %v934_v12, %v903_v15  ;;  %v1092_v30 = vmul.f32 %v955_v8, %v955_v8 }
 0x102   : > { %995 = vst [vmem:[%s1584_s26] sm:$0xf] %v1279_v16  ;;  %v1280_v23 = vpack.c.bf16 %v948_v20, %v948_v20  ;;  %v1043_v24 = vadd.f32 %v948_v20, %v947_v7  ;;  %v1072_v27 = vmul.f32 %v948_v20, %v948_v20 }
 0x103   : > { %1035 = vst [vmem:[%s1584_s26 + $0x4] sm:$0xf] %v1287_v17  ;;  %v1288_v29 = vpack.c.bf16 %v956_v21, %v956_v21  ;;  %v1056_v13 = vadd.f32 %v956_v21, %v955_v8  ;;  %v1093_v28 = vmul.f32 %v956_v21, %v956_v21 }
 0x104   : > { %996 = vst [vmem:[%s1584_s26 + $0x8] sm:$0xf] %v1280_v23  ;;  %v1079_v31 = vadd.f32 %v1072_v27, %v1071_v22 }
 0x105   : > { %1036 = vst [vmem:[%s1584_s26 + $0xc] sm:$0xf] %v1288_v29  ;;  %v1100_v34 = vadd.f32 %v1093_v28, %v1092_v30 }
 0x10a   : > { %v876_v36 = vpop.f32.mrb[4].mxu0 }
 0x10b   : > { %v949_v39 = vadd.f32 %v935_v33, %v876_v36  ;;  %v908_v40 = vpop.f32.mrb[4].mxu1  ;;  %v878_v37 = vpop.f32.mrb[5].mxu0  ;;  %v945_v36 = vld [vmem:[%s1574_s22 + $0x70] sm:$0xff] }
 0x10c   : > { %v957_v25 = vadd.f32 %v936_v35, %v908_v40  ;;  %v910_v26 = vpop.f32.mrb[5].mxu1  ;;  %v879_v42 = vpop.f32.mrb[6].mxu0 }
 0x10d   : > { %v1281_v32 = vpack.c.bf16 %v949_v39, %v949_v39  ;;  %v1044_v43 = vadd.f32 %v1043_v24, %v949_v39  ;;  %v1073_v44 = vmul.f32 %v949_v39, %v949_v39  ;;  %v950_v45 = vadd.f32 %v937_v38, %v879_v42  ;;  %v911_v46 = vpop.f32.mrb[6].mxu1  ;;  %v881_v47 = vpop.f32.mrb[7].mxu0  ;;  %v944_v39 = vld [vmem:[%s1574_s22 + $0x68] sm:$0xff] }
 0x10e   : > { %v1289_v48 = vpack.c.bf16 %v957_v25, %v957_v25  ;;  %v1057_v49 = vadd.f32 %v1056_v13, %v957_v25  ;;  %v1094_v50 = vmul.f32 %v957_v25, %v957_v25  ;;  %v958_v51 = vadd.f32 %v938_v41, %v911_v46  ;;  %v913_v52 = vpop.f32.mrb[7].mxu1 }
 0x10f   : > { %997 = vst [vmem:[%s1584_s26 + $0x10] sm:$0xf] %v1281_v32  ;;  %v1080_v53 = vadd.f32 %v1079_v31, %v1073_v44  ;;  %v1282_v54 = vpack.c.bf16 %v950_v45, %v950_v45  ;;  %v1045_v55 = vadd.f32 %v1044_v43, %v950_v45  ;;  %v1074_v56 = vmul.f32 %v950_v45, %v950_v45  ;;  %v946_v43 = vld [vmem:[%s1574_s22 + $0x78] sm:$0xff] }
 0x110   : > { %1037 = vst [vmem:[%s1584_s26 + $0x14] sm:$0xf] %v1289_v48  ;;  %v1101_v57 = vadd.f32 %v1100_v34, %v1094_v50  ;;  %v1290_v58 = vpack.c.bf16 %v958_v51, %v958_v51  ;;  %v1058_v59 = vadd.f32 %v1057_v49, %v958_v51  ;;  %v1095_v60 = vmul.f32 %v958_v51, %v958_v51  ;;  %v943_v34 = vld [vmem:[%s1574_s22 + $0x60] sm:$0xff] }
 0x111   : > { %998 = vst [vmem:[%s1584_s26 + $0x18] sm:$0xf] %v1282_v54  ;;  %v1081_v61 = vadd.f32 %v1080_v53, %v1074_v56 }
 0x112   : > { %1038 = vst [vmem:[%s1584_s26 + $0x1c] sm:$0xf] %v1290_v58  ;;  %v1102_v1 = vadd.f32 %v1101_v57, %v1095_v60 }
 0x11a   : > { %v884_v63 = vpop.f32.mrb[8].mxu0 }
 0x11b   : > { %v951_v2 = vadd.f32 %v939_v62, %v884_v63  ;;  %v886_v5 = vpop.f32.mrb[9].mxu0 }
 0x11c   : > { %v887_v4 = vpop.f32.mrb[10].mxu0 }
 0x11d   : > { %v1283_v6 = vpack.c.bf16 %v951_v2, %v951_v2  ;;  %v1046_v7 = vadd.f32 %v1045_v55, %v951_v2  ;;  %v1075_v8 = vmul.f32 %v951_v2, %v951_v2  ;;  %v916_v9 = vpop.f32.mrb[8].mxu1  ;;  %v952_v10 = vadd.f32 %v941_v0, %v887_v4  ;;  %v889_v12 = vpop.f32.mrb[11].mxu0 }
 0x11e   : > { %v959_v14 = vadd.f32 %v940_v3, %v916_v9  ;;  %v918_v15 = vpop.f32.mrb[9].mxu1 }
 0x11f   : > { %999 = vst [vmem:[%s1584_s26 + $0x20] sm:$0xf] %v1283_v6  ;;  %v1082_v16 = vadd.f32 %v1081_v61, %v1075_v8  ;;  %v1284_v17 = vpack.c.bf16 %v952_v10, %v952_v10  ;;  %v1047_v18 = vadd.f32 %v1046_v7, %v952_v10  ;;  %v1076_v19 = vmul.f32 %v952_v10, %v952_v10  ;;  %v919_v20 = vpop.f32.mrb[10].mxu1 }
 0x120   : > { %v1291_v21 = vpack.c.bf16 %v959_v14, %v959_v14  ;;  %v1059_v22 = vadd.f32 %v1058_v59, %v959_v14  ;;  %v1096_v23 = vmul.f32 %v959_v14, %v959_v14  ;;  %v960_v24 = vadd.f32 %v942_v11, %v919_v20  ;;  %v921_v27 = vpop.f32.mrb[11].mxu1 }
 0x121   : > { %1000 = vst [vmem:[%s1584_s26 + $0x28] sm:$0xf] %v1284_v17  ;;  %v1083_v29 = vadd.f32 %v1082_v16, %v1076_v19 }
 0x122   : > { %1039 = vst [vmem:[%s1584_s26 + $0x24] sm:$0xf] %v1291_v21  ;;  %v1103_v30 = vadd.f32 %v1102_v1, %v1096_v23  ;;  %v1292_v13 = vpack.c.bf16 %v960_v24, %v960_v24  ;;  %v1060_v28 = vadd.f32 %v1059_v22, %v960_v24  ;;  %v1097_v31 = vmul.f32 %v960_v24, %v960_v24 }
 0x124   : > { %1040 = vst [vmem:[%s1584_s26 + $0x2c] sm:$0xf] %v1292_v13  ;;  %v1104_v33 = vadd.f32 %v1103_v30, %v1097_v31 }
 0x12a   : > { %v892_v35 = vpop.f32.mrb[12].mxu0 }
 0x12b   : > { %v953_v38 = vadd.f32 %v943_v34, %v892_v35  ;;  %v894_v40 = vpop.f32.mrb[13].mxu0 }
 0x12c   : > { %v895_v37 = vpop.f32.mrb[14].mxu0 }
 0x12d   : > { %v1285_v41 = vpack.c.bf16 %v953_v38, %v953_v38  ;;  %v1048_v25 = vadd.f32 %v1047_v18, %v953_v38  ;;  %v1077_v26 = vmul.f32 %v953_v38, %v953_v38  ;;  %v924_v42 = vpop.f32.mrb[12].mxu1  ;;  %v954_v32 = vadd.f32 %v945_v36, %v895_v37  ;;  %v897_v44 = vpop.f32.mrb[15].mxu0 }
 0x12e   : > { %v961_v45 = vadd.f32 %v944_v39, %v924_v42  ;;  %v926_v46 = vpop.f32.mrb[13].mxu1 }
 0x12f   : > { %1001 = vst [vmem:[%s1584_s26 + $0x30] sm:$0xf] %v1285_v41  ;;  %v1084_v47 = vadd.f32 %v1083_v29, %v1077_v26  ;;  %v1286_v48 = vpack.c.bf16 %v954_v32, %v954_v32  ;;  %v1049_v49 = vadd.f32 %v1048_v25, %v954_v32  ;;  %v1078_v50 = vmul.f32 %v954_v32, %v954_v32  ;;  %v927_v51 = vpop.f32.mrb[14].mxu1 }
 0x130   : > { %v1293_v52 = vpack.c.bf16 %v961_v45, %v961_v45  ;;  %v1061_v53 = vadd.f32 %v1060_v28, %v961_v45  ;;  %v1098_v54 = vmul.f32 %v961_v45, %v961_v45  ;;  %v962_v55 = vadd.f32 %v946_v43, %v927_v51  ;;  %v929_v56 = vpop.f32.mrb[15].mxu1 }
 0x131   : > { %1002 = vst [vmem:[%s1584_s26 + $0x38] sm:$0xf] %v1286_v48  ;;  %v1050_v57 = vrot.slane %v1049_v49, 4  ;;  %v1085_v58 = vadd.f32 %v1084_v47, %v1078_v50 }
 0x132   : > { %1041 = vst [vmem:[%s1584_s26 + $0x34] sm:$0xf] %v1293_v52  ;;  %v1105_v59 = vadd.f32 %v1104_v33, %v1098_v54  ;;  %v1294_v60 = vpack.c.bf16 %v962_v55, %v962_v55  ;;  %v1062_v61 = vadd.f32 %v1061_v53, %v962_v55  ;;  %v1099_v1 = vmul.f32 %v962_v55, %v962_v55 }
 0x133   : > { %v1051_v62 = vadd.f32 %v1050_v57, %v1049_v49  ;;  %v1086_v63 = vrot.slane %v1085_v58, 4 }
 0x134   : > { %1042 = vst [vmem:[%s1584_s26 + $0x3c] sm:$0xf] %v1294_v60  ;;  %v1063_v0 = vrot.slane %v1062_v61, 4  ;;  %v1106_v2 = vadd.f32 %v1105_v59, %v1099_v1 }
 0x135   : > { %v1052_v3 = vrot.slane %v1051_v62, 2  ;;  %v1087_v5 = vadd.f32 %v1086_v63, %v1085_v58 }
 0x136   : > { %v1064_v4 = vadd.f32 %v1063_v0, %v1062_v61  ;;  %v1107_v6 = vrot.slane %v1106_v2, 4 }
 0x137   : > { %v1053_v7 = vadd.f32 %v1052_v3, %v1051_v62  ;;  %v1088_v8 = vrot.slane %v1087_v5, 2 }
 0x138   : > { %v1065_v9 = vrot.slane %v1064_v4, 2  ;;  %v1108_v10 = vadd.f32 %v1107_v6, %v1106_v2 }
 0x139   : > { %v1054_v11 = vrot.slane %v1053_v7, 1  ;;  %v1089_v12 = vadd.f32 %v1088_v8, %v1087_v5 }
 0x13a   : > { %v1066_v14 = vadd.f32 %v1065_v9, %v1064_v4  ;;  %v1109_v15 = vrot.slane %v1108_v10, 2 }
 0x13b   : > { %v1090_v16 = vrot.slane %v1089_v12, 1  ;;  %v1055_v17 = vadd.f32 %v1054_v11, %v1053_v7 }
 0x13c   : > { %v1067_v18 = vrot.slane %v1066_v14, 1  ;;  %v1110_v19 = vadd.f32 %v1109_v15, %v1108_v10 }
 0x13d   : > { %v1091_v20 = vadd.f32 %v1090_v16, %v1089_v12 }
 0x13e   : > { %v1068_v21 = vadd.f32 %v1067_v18, %v1066_v14  ;;  %v1111_v22 = vrot.slane %v1110_v19, 1 }
 0x140   : > { %v1069_v23 = vadd.f32 %v1068_v21, %v1055_v17  ;;  %v1112_v24 = vadd.f32 %v1111_v22, %v1110_v19 }
 0x142   : > { %1070 = vst [vmem:[%s258_s29] sm:$0x1] %v1069_v23  ;;  %v1113_v27 = vadd.f32 %v1112_v24, %v1091_v20 }
 0x144   : > { %1114 = vst [vmem:[%s261_s7] sm:$0x1] %v1113_v27 }
 0x145 PF: > { %s16_s18 = sadd.s32 1, %s1338_s18  }
 0x146   : > { %p13_p4 = scmp.ge.s32.totalorder %s16_s18, 4  }
 0x148   :  { %15 = sbr.rel (!%p13_p4) target bundleno = 1 (0x1), region = 89 }

// kernel: tile.33
= control target key start
LH: loop header
LB: loop body
LE: loop exit
PB: predicated region body
PF: predicated region fallthrough
CT: control target
= control target key end

     0   :  { %s40_s0 = inlined_call_operand.vmem [shape: f32[4], index: 0, kind: input, shape index: {}]   ;;  %s41_s1 = inlined_call_operand.vmem [shape: f32[32,4], index: 1, kind: output, shape index: {}]  }
   0x1   :  { %v4_v0 = vld [vmem:[%s40_s0] ss:$0 sm:$0xff] }
   0x2   :  { %5 = vst [vmem:[%s41_s1] sm:$0xff] %v4_v0  ;;  %12 = vst [vmem:[%s41_s1 + $0x8] sm:$0xff] %v4_v0 }
   0x3   :  { %13 = vst [vmem:[%s41_s1 + $0x10] sm:$0xff] %v4_v0  ;;  %14 = vst [vmem:[%s41_s1 + $0x18] sm:$0xff] %v4_v0 }

// kernel: tile.34
= control target key start
LH: loop header
LB: loop body
LE: loop exit
PB: predicated region body
PF: predicated region fallthrough
CT: control target
= control target key end

     0   :  { %s259_s10 = smov 124   ;;  %s260_s11 = smov 116   ;;  %vm3_vm0 = vcmask 31744   ;;  %vm9_vm1 = vcmask 1048544   ;;  %vm15_vm2 = vcmask 1015744   ;;  %vm21_vm3 = vcmask 982944   ;;  %s399_s0 = inlined_call_operand.vmem [shape: f32[32,4], index: 0, kind: input, shape index: {}]   ;;  %s400_s1 = inlined_call_operand.vmem [shape: f32[1,128], index: 1, kind: output, shape index: {}]  }
   0x1   :  { %v197_v0 = vld [vmem:[%s399_s0 + $0x1f] sm:$0x1]   ;;  %v199_v1 = vld [vmem:[%s399_s0 + $0x1d] sm:$0x1]   ;;  %v198_v2 = vld [vmem:[%s399_s0 + $0x1e] sm:$0x1]  }
   0x2   :  { %7 = vrot.lane.b32.xlu0 %v197_v0, %s259_s10  ;;  %19 = vrot.lane.b32.xlu1 %v199_v1, %s260_s11  ;;  %v200_v3 = vld [vmem:[%s399_s0 + $0x1c] sm:$0x1]   ;;  %s261_s16 = smov 120   ;;  %s262_s17 = smov 112   ;;  %v201_v4 = vld [vmem:[%s399_s0 + $0x1b] sm:$0x1]  }
   0x3   :  { %v202_v5 = vld [vmem:[%s399_s0 + $0x1a] sm:$0x1]   ;;  %s263_s22 = smov 108   ;;  %s264_s23 = smov 104   ;;  %v203_v6 = vld [vmem:[%s399_s0 + $0x19] sm:$0x1]  }
   0x4   :  { %v204_v7 = vld [vmem:[%s399_s0 + $0x18] sm:$0x1]   ;;  %s265_s28 = smov 100   ;;  %s266_s29 = smov 96   ;;  %v205_v8 = vld [vmem:[%s399_s0 + $0x17] sm:$0x1]  }
   0x5   :  { %v206_v9 = vld [vmem:[%s399_s0 + $0x16] sm:$0x1]   ;;  %v2_v10 = vld [vmem:[%s399_s0] sm:$0x1]   ;;  %s267_s7 = smov 92   ;;  %s268_s8 = smov 88  }
   0x6   :  { %13 = vrot.lane.b32.xlu0 %v198_v2, %s261_s16  ;;  %25 = vrot.lane.b32.xlu1 %v200_v3, %s262_s17  ;;  %4 = vst.msk [vmem:[#allocation0] sm:$0x1] %vm3_vm0, %v2_v10   ;;  %v207_v11 = vld [vmem:[%s399_s0 + $0x15] sm:$0x1]   ;;  %v208_v12 = vld [vmem:[%s399_s0 + $0x14] sm:$0x1]  }
   0x7   :  { %s269_s13 = smov 84   ;;  %s270_s14 = smov 80   ;;  %v209_v13 = vld [vmem:[%s399_s0 + $0x13] sm:$0x1]   ;;  %v210_v14 = vld [vmem:[%s399_s0 + $0x12] sm:$0x1]  }
   0x8   :  { %s271_s19 = smov 76   ;;  %s272_s20 = smov 72   ;;  %v211_v15 = vld [vmem:[%s399_s0 + $0x11] sm:$0x1]   ;;  %v212_v16 = vld [vmem:[%s399_s0 + $0x10] sm:$0x1]  }
   0x9   :  { %s273_s25 = smov 68   ;;  %s274_s26 = smov 64   ;;  %v213_v17 = vld [vmem:[%s399_s0 + $0xf] sm:$0x1]   ;;  %v214_v18 = vld [vmem:[%s399_s0 + $0xe] sm:$0x1]  }
   0xa   :  { %31 = vrot.lane.b32.xlu0 %v201_v4, %s263_s22  ;;  %37 = vrot.lane.b32.xlu1 %v202_v5, %s264_s23  ;;  %s275_s2 = smov 60   ;;  %s276_s3 = smov 56   ;;  %v215_v19 = vld [vmem:[%s399_s0 + $0xd] sm:$0x1]   ;;  %v216_v20 = vld [vmem:[%s399_s0 + $0xc] sm:$0x1]  }
   0xb   :  { %s278_s9 = smov 48   ;;  %v217_v21 = vld [vmem:[%s399_s0 + $0xb] sm:$0x1]   ;;  %v218_v22 = vld [vmem:[%s399_s0 + $0xa] sm:$0x1]   ;;  %s280_s15 = smov 40  }
   0xc   :  { %v219_v23 = vld [vmem:[%s399_s0 + $0x9] sm:$0x1]   ;;  %v220_v24 = vld [vmem:[%s399_s0 + $0x8] sm:$0x1]   ;;  %s282_s21 = smov 32   ;;  %s284_s27 = smov 24  }
   0xd   :  { %v221_v25 = vld [vmem:[%s399_s0 + $0x7] sm:$0x1]   ;;  %v222_v26 = vld [vmem:[%s399_s0 + $0x6] sm:$0x1]   ;;  %v223_v27 = vld [vmem:[%s399_s0 + $0x5] sm:$0x1]  }
   0xe   :  { %43 = vrot.lane.b32.xlu0 %v203_v6, %s265_s28  ;;  %49 = vrot.lane.b32.xlu1 %v204_v7, %s266_s29  ;;  %v224_v28 = vld [vmem:[%s399_s0 + $0x4] sm:$0x1]   ;;  %s286_s4 = smov 16   ;;  %v225_v29 = vld [vmem:[%s399_s0 + $0x3] sm:$0x1]   ;;  %s288_s10 = smov 8  }
   0xf   :  { %v226_v30 = vld [vmem:[%s399_s0 + $0x2] sm:$0x1]   ;;  %v227_v31 = vld [vmem:[%s399_s0 + $0x1] sm:$0x1]   ;;  %s289_s0 = smov 4   ;;  %vm27_vm4 = vcmask 950144  }
  0x10   :  { %vm33_vm5 = vcmask 917344   ;;  %vm39_vm6 = vcmask 884544   ;;  %vm45_vm7 = vcmask 851744   ;;  %vm51_vm8 = vcmask 818944  }
  0x11   :  { %vm57_vm9 = vcmask 786144   ;;  %vm63_vm10 = vcmask 753344   ;;  %vm69_vm11 = vcmask 720544   ;;  %vm75_vm12 = vcmask 687744  }
  0x12   :  { %55 = vrot.lane.b32.xlu0 %v205_v8, %s267_s7  ;;  %61 = vrot.lane.b32.xlu1 %v206_v9, %s268_s8  ;;  %s277_s8 = smov 52   ;;  %vm81_vm13 = vcmask 654944   ;;  %vm87_vm14 = vcmask 622144   ;;  %vm93_vm15 = vcmask 589344   ;;  %vm99_vm0 = vcmask 556544  }
  0x16   :  { %67 = vrot.lane.b32.xlu0 %v207_v11, %s269_s13  ;;  %73 = vrot.lane.b32.xlu1 %v208_v12, %s270_s14  ;;  %s279_s14 = smov 44  }
  0x1a   :  { %79 = vrot.lane.b32.xlu0 %v209_v13, %s271_s19  ;;  %85 = vrot.lane.b32.xlu1 %v210_v14, %s272_s20  ;;  %s281_s20 = smov 36  }
  0x1e   :  { %91 = vrot.lane.b32.xlu0 %v211_v15, %s273_s25  ;;  %97 = vrot.lane.b32.xlu1 %v212_v16, %s274_s26  ;;  %s283_s26 = smov 28  }
  0x22   :  { %103 = vrot.lane.b32.xlu0 %v213_v17, %s275_s2  ;;  %109 = vrot.lane.b32.xlu1 %v214_v18, %s276_s3  ;;  %s285_s3 = smov 20  }
  0x26   :  { %115 = vrot.lane.b32.xlu0 %v215_v19, %s277_s8  ;;  %121 = vrot.lane.b32.xlu1 %v216_v20, %s278_s9  ;;  %s287_s9 = smov 12  }
  0x2a   :  { %127 = vrot.lane.b32.xlu0 %v217_v21, %s279_s14  ;;  %133 = vrot.lane.b32.xlu1 %v218_v22, %s280_s15 }
  0x2e   :  { %139 = vrot.lane.b32.xlu0 %v219_v23, %s281_s20  ;;  %145 = vrot.lane.b32.xlu1 %v220_v24, %s282_s21 }
  0x32   :  { %151 = vrot.lane.b32.xlu0 %v221_v25, %s283_s26  ;;  %157 = vrot.lane.b32.xlu1 %v222_v26, %s284_s27 }
  0x36   :  { %163 = vrot.lane.b32.xlu0 %v223_v27, %s285_s3  ;;  %169 = vrot.lane.b32.xlu1 %v224_v28, %s286_s4 }
  0x3a   :  { %175 = vrot.lane.b32.xlu0 %v225_v29, %s287_s9  ;;  %181 = vrot.lane.b32.xlu1 %v226_v30, %s288_s10 }
  0x3e   :  { %187 = vrot.lane.b32.xlu0 %v227_v31, %s289_s0 }
  0x74   :  { %v8_v32 = vpop.permute.xlu0 %7   ;;  %v20_v33 = vpop.permute.xlu1 %19  }
  0x75   :  { %10 = vst.msk [vmem:[#allocation0] sm:$0x1] %vm9_vm1, %v8_v32   ;;  %vm105_vm1 = vcmask 523744  }
  0x78   :  { %v14_v34 = vpop.permute.xlu0 %13   ;;  %v26_v35 = vpop.permute.xlu1 %25  }
  0x79   :  { %16 = vst.msk [vmem:[#allocation0] sm:$0x1] %vm15_vm2, %v14_v34   ;;  %vm111_vm2 = vcmask 490944  }
  0x7a   :  { %22 = vst.msk [vmem:[#allocation0] sm:$0x1] %vm21_vm3, %v20_v33   ;;  %vm117_vm3 = vcmask 458144  }
  0x7b   :  { %28 = vst.msk [vmem:[#allocation0] sm:$0x1] %vm27_vm4, %v26_v35   ;;  %vm123_vm4 = vcmask 425344  }
  0x7c   :  { %v32_v36 = vpop.permute.xlu0 %31   ;;  %v38_v37 = vpop.permute.xlu1 %37  }
  0x7d   :  { %34 = vst.msk [vmem:[#allocation0] sm:$0x1] %vm33_vm5, %v32_v36   ;;  %vm129_vm5 = vcmask 392544  }
  0x7e   :  { %40 = vst.msk [vmem:[#allocation0] sm:$0x1] %vm39_vm6, %v38_v37   ;;  %vm135_vm6 = vcmask 359744  }
  0x80   :  { %v44_v38 = vpop.permute.xlu0 %43   ;;  %v50_v39 = vpop.permute.xlu1 %49  }
  0x81   :  { %46 = vst.msk [vmem:[#allocation0] sm:$0x1] %vm45_vm7, %v44_v38   ;;  %vm141_vm7 = vcmask 326944  }
  0x82   :  { %52 = vst.msk [vmem:[#allocation0] sm:$0x1] %vm51_vm8, %v50_v39   ;;  %vm147_vm8 = vcmask 294144  }
  0x84   :  { %v56_v40 = vpop.permute.xlu0 %55   ;;  %v62_v41 = vpop.permute.xlu1 %61  }
  0x85   :  { %58 = vst.msk [vmem:[#allocation0] sm:$0x1] %vm57_vm9, %v56_v40   ;;  %vm153_vm9 = vcmask 261344  }
  0x86   :  { %64 = vst.msk [vmem:[#allocation0] sm:$0x1] %vm63_vm10, %v62_v41   ;;  %vm159_vm10 = vcmask 228544  }
  0x88   :  { %v68_v42 = vpop.permute.xlu0 %67   ;;  %v74_v43 = vpop.permute.xlu1 %73  }
  0x89   :  { %70 = vst.msk [vmem:[#allocation0] sm:$0x1] %vm69_vm11, %v68_v42   ;;  %vm165_vm11 = vcmask 195744  }
  0x8a   :  { %76 = vst.msk [vmem:[#allocation0] sm:$0x1] %vm75_vm12, %v74_v43   ;;  %vm171_vm12 = vcmask 162944  }
  0x8c   :  { %v80_v44 = vpop.permute.xlu0 %79   ;;  %v86_v45 = vpop.permute.xlu1 %85  }
  0x8d   :  { %82 = vst.msk [vmem:[#allocation0] sm:$0x1] %vm81_vm13, %v80_v44   ;;  %vm177_vm13 = vcmask 130144  }
  0x8e   :  { %88 = vst.msk [vmem:[#allocation0] sm:$0x1] %vm87_vm14, %v86_v45   ;;  %vm183_vm14 = vcmask 97344  }
  0x90   :  { %v92_v46 = vpop.permute.xlu0 %91   ;;  %v98_v47 = vpop.permute.xlu1 %97  }
  0x91   :  { %94 = vst.msk [vmem:[#allocation0] sm:$0x1] %vm93_vm15, %v92_v46   ;;  %vm189_vm15 = vcmask 64544  }
  0x92   :  { %100 = vst.msk [vmem:[#allocation0] sm:$0x1] %vm99_vm0, %v98_v47  }
  0x94   :  { %v104_v48 = vpop.permute.xlu0 %103   ;;  %v110_v49 = vpop.permute.xlu1 %109  }
  0x95   :  { %106 = vst.msk [vmem:[#allocation0] sm:$0x1] %vm105_vm1, %v104_v48  }
  0x96   :  { %112 = vst.msk [vmem:[#allocation0] sm:$0x1] %vm111_vm2, %v110_v49  }
  0x98   :  { %v116_v50 = vpop.permute.xlu0 %115   ;;  %v122_v51 = vpop.permute.xlu1 %121  }
  0x99   :  { %118 = vst.msk [vmem:[#allocation0] sm:$0x1] %vm117_vm3, %v116_v50  }
  0x9a   :  { %124 = vst.msk [vmem:[#allocation0] sm:$0x1] %vm123_vm4, %v122_v51  }
  0x9c   :  { %v128_v52 = vpop.permute.xlu0 %127   ;;  %v134_v53 = vpop.permute.xlu1 %133  }
  0x9d   :  { %130 = vst.msk [vmem:[#allocation0] sm:$0x1] %vm129_vm5, %v128_v52  }
  0x9e   :  { %136 = vst.msk [vmem:[#allocation0] sm:$0x1] %vm135_vm6, %v134_v53  }
  0xa0   :  { %v140_v54 = vpop.permute.xlu0 %139   ;;  %v146_v55 = vpop.permute.xlu1 %145  }
  0xa1   :  { %142 = vst.msk [vmem:[#allocation0] sm:$0x1] %vm141_vm7, %v140_v54  }
  0xa2   :  { %148 = vst.msk [vmem:[#allocation0] sm:$0x1] %vm147_vm8, %v146_v55  }
  0xa4   :  { %v152_v56 = vpop.permute.xlu0 %151   ;;  %v158_v57 = vpop.permute.xlu1 %157  }
  0xa5   :  { %154 = vst.msk [vmem:[#allocation0] sm:$0x1] %vm153_vm9, %v152_v56  }
  0xa6   :  { %160 = vst.msk [vmem:[#allocation0] sm:$0x1] %vm159_vm10, %v158_v57  }
  0xa8   :  { %v164_v58 = vpop.permute.xlu0 %163   ;;  %v170_v59 = vpop.permute.xlu1 %169  }
  0xa9   :  { %166 = vst.msk [vmem:[#allocation0] sm:$0x1] %vm165_vm11, %v164_v58  }
  0xaa   :  { %172 = vst.msk [vmem:[#allocation0] sm:$0x1] %vm171_vm12, %v170_v59  }
  0xac   :  { %v176_v60 = vpop.permute.xlu0 %175   ;;  %v182_v61 = vpop.permute.xlu1 %181  }
  0xad   :  { %178 = vst.msk [vmem:[#allocation0] sm:$0x1] %vm177_vm13, %v176_v60  }
  0xae   :  { %184 = vst.msk [vmem:[#allocation0] sm:$0x1] %vm183_vm14, %v182_v61  }
  0xb0   :  { %v188_v62 = vpop.permute.xlu0 %187  }
  0xb1   :  { %190 = vst.msk [vmem:[#allocation0] sm:$0x1] %vm189_vm15, %v188_v62  }
  0xb8   :  { %v194_v63 = vld [vmem:[#allocation0] sm:$0x1] }
  0xb9   :  { %196 = vst [vmem:[%s400_s1] sm:$0x1] %v194_v63 }

// kernel: upconvblock_forward.5
= control target key start
LH: loop header
LB: loop body
LE: loop exit
PB: predicated region body
PF: predicated region fallthrough
CT: control target
= control target key end

     0   :  { %s3186_s21 = smov 0   ;;  %s3997_s0 = inlined_call_operand.vmem [shape: bf16[2,4,32,128], index: 0, kind: input, shape index: {}]   ;;  %s3998_s1 = inlined_call_operand.vmem [shape: f32[1,128], index: 1, kind: input, shape index: {}]   ;;  %s3999_s2 = inlined_call_operand.vmem [shape: f32[1,128], index: 2, kind: input, shape index: {}]   ;;  %s4000_s3 = inlined_call_operand.vmem [shape: bf16[3,384,128], index: 3, kind: input, shape index: {}]   ;;  %s4001_s4 = inlined_call_operand.vmem [shape: bf16[2,4,32,128], index: 4, kind: output, shape index: {0}]   ;;  %s4002_s5 = inlined_call_operand.vmem [shape: f32[2,1,128], index: 5, kind: output, shape index: {1}]   ;;  %s4003_s6 = inlined_call_operand.vmem [shape: f32[2,1,128], index: 6, kind: output, shape index: {2}]  }
   0x1 LB: > { %s2238_s22 = sadd.s32 4294967295, %s3147_s21   ;;  %p2242_p0 = scmp.ge.s32.totalorder %s3147_s21, 1  ;;  %s3147_s21 = sphi %s3186_s21, %s17_s21  }
   0x2   : > { %p217_p1 = scmp.lt.s32.totalorder %s3147_s21, 3 }
   0x4   : > { %p218_p2 = pnand %p2242_p0, %p217_p1 }
   0x5   : > { %v3069_v0 = vld [vmem:[%s4000_s3 + $0x100] sm:$0xff] (!%p218_p2)   ;;  %v364_v1 = vlaneseq (!%p218_p2)  ;;  %v3072_v4 = vld [vmem:[%s4000_s3 + $0x108] sm:$0xff] (!%p218_p2)   ;;  %v3075_v8 = vld [vmem:[%s4000_s3 + $0x110] sm:$0xff] (!%p218_p2)   ;;  %p253_p3 = scmp.lt.s32.totalorder (!%p218_p2), %s2238_s22, 1  ;;  %vm3149_vm4 = vmmov (!%p218_p2), 1  }
   0x6   : > { %221 = sbr.rel (%p218_p2) target bundleno = 429 (0x1ad), region = 36  ;;  %v3070_v2 = vld [vmem:[%s4000_s3 + $0x140] sm:$0xff] (!%p218_p2)   ;;  %2619 = vmatprep.subr.bf16.mxu0 (!%p218_p2), %v3069_v0  ;;  %v3073_v5 = vld [vmem:[%s4000_s3 + $0x148] sm:$0xff] (!%p218_p2)   ;;  %v3076_v10 = vld [vmem:[%s4000_s3 + $0x150] sm:$0xff] (!%p218_p2)  }
   0x7   : > { %v3071_v3 = vld [vmem:[%s4000_s3 + $0xc0] sm:$0xff] (!%p218_p2)   ;;  %2859 = vmatprep.subr.bf16.mxu1 (!%p218_p2), %v3070_v2  ;;  %v3209_v6 = vshrl.u32 (!%p218_p2), %v364_v1, 7  ;;  %v3074_v7 = vld [vmem:[%s4000_s3 + $0xc8] sm:$0xff] (!%p218_p2)   ;;  %v3077_v11 = vld [vmem:[%s4000_s3 + $0xd0] sm:$0xff] (!%p218_p2)  }
   0x8   : > { %2620 = vmatpush3.bf16.msra.mxu0 (!%p218_p2), %v3071_v3  ;;  %2860 = vmatpush3.bf16.msra.mxu1 (!%p218_p2), %v3070_v2  ;;  %v3078_v12 = vld [vmem:[%s4000_s3 + $0x118] sm:$0xff] (!%p218_p2)   ;;  %v3081_v17 = vld [vmem:[%s4000_s3 + $0x120] sm:$0xff] (!%p218_p2)   ;;  %v3084_v22 = vld [vmem:[%s4000_s3 + $0x128] sm:$0xff] (!%p218_p2)  }
   0x9   : > { %2621 = vmatprep.subr.bf16.mxu0 (!%p218_p2), %v3072_v4  ;;  %2861 = vmatprep.subr.bf16.mxu1 (!%p218_p2), %v3073_v5  ;;  %v385_v9 = vand.u32 (!%p218_p2), 31, %v3209_v6  ;;  %v3079_v13 = vld [vmem:[%s4000_s3 + $0x158] sm:$0xff] (!%p218_p2)   ;;  %v3233_v14 = vadd.s32 (!%p218_p2), 24, %v3209_v6  ;;  %v3239_v16 = vadd.s32 (!%p218_p2), 56, %v3209_v6  ;;  %v3082_v19 = vld [vmem:[%s4000_s3 + $0x160] sm:$0xff] (!%p218_p2)   ;;  %v3085_v23 = vld [vmem:[%s4000_s3 + $0x168] sm:$0xff] (!%p218_p2)  }
   0xa   : > { %v3080_v15 = vld [vmem:[%s4000_s3 + $0xd8] sm:$0xff] (!%p218_p2)   ;;  %v3083_v21 = vld [vmem:[%s4000_s3 + $0xe0] sm:$0xff] (!%p218_p2)   ;;  %v3264_v24 = vadd.s32 (!%p218_p2), 32, %v3209_v6  ;;  %v3086_v25 = vld [vmem:[%s4000_s3 + $0xe8] sm:$0xff] (!%p218_p2)   ;;  %v3270_v26 = vadd.s32 (!%p218_p2), 88, %v3209_v6  ;;  %vm605_vm0 = vcmp.lt.s32.totalorder (!%p218_p2), %v3209_v6, 1 }
   0xb   : > { %v406_v18 = vand.u32 (!%p218_p2), 31, %v3233_v14  ;;  %v434_v20 = vand.u32 (!%p218_p2), 31, %v3239_v16  ;;  %v3087_v27 = vld [vmem:[%s4000_s3 + $0x130] sm:$0xff] (!%p218_p2)   ;;  %v3090_v32 = vld [vmem:[%s4000_s3 + $0x138] sm:$0xff] (!%p218_p2)   ;;  %v3297_v34 = vld [vmem:[%s3998_s1] ss:$0 sm:$0xff] (!%p218_p2) }
   0xc   : > { %2622 = vmatpush3.bf16.msra.mxu0 (!%p218_p2), %v3074_v7  ;;  %2862 = vmatpush3.bf16.msra.mxu1 (!%p218_p2), %v3073_v5  ;;  %v413_v28 = vand.u32 (!%p218_p2), 31, %v3264_v24  ;;  %v3088_v29 = vld [vmem:[%s4000_s3 + $0x170] sm:$0xff] (!%p218_p2)   ;;  %v462_v30 = vand.u32 (!%p218_p2), 31, %v3270_v26  ;;  %v3091_v35 = vld [vmem:[%s4000_s3 + $0x178] sm:$0xff] (!%p218_p2)   ;;  %vm670_vm1 = vcmp.lt.s32.totalorder (!%p218_p2), %v3209_v6, 7  ;;  %vm3306_vm2 = vcmp.ne.s32.totalorder (!%p218_p2), %v385_v9, 0 }
   0xd   : > { %2623 = vmatprep.subr.bf16.mxu0 %v3075_v8  ;;  %2863 = vmatprep.subr.bf16.mxu1 %v3076_v10  ;;  %s4033_s22 = smov (!%p253_p3, %s2238_s22), 1  ;;  %v3089_v31 = vld [vmem:[%s4000_s3 + $0xf0] sm:$0xff]   ;;  %v3311_v41 = vadd.s32 120, %v3209_v6  ;;  %v3316_v42 = vld [vmem:[%s3999_s2] ss:$0 sm:$0xff]  ;;  %v3092_v48 = vld [vmem:[%s4000_s3 + $0xf8] sm:$0xff]  }
   0xe   : > { %s2435_s11 = sshll.u32 %s4033_s22, 6  ;;  %vm3327_vm3 = vcmp.ne.s32.totalorder %v406_v18, 31  ;;  %v3093_v57 = vld [vmem:[%s4000_s3 + $0x40] sm:$0xff]   ;;  %vm3365_vm5 = vmpackc.low %vm3149_vm4, %vm3306_vm2  ;;  %vm3403_vm7 = vcmp.ne.s32.totalorder %v434_v20, 31  ;;  %v3097_v20 = vld [vmem:[%s4000_s3 + $0x48] sm:$0xff]   ;;  %vm3463_vm8 = vcmp.ne.s32.totalorder %v413_v28, 0  ;;  %s265_s7 = scalar_lea.vmem %s4002_s5, %s4033_s22 }
   0xf   : > { %s3284_s20 = scalar_lea.vmem %s3997_s0, %s2435_s11  ;;  %v3094_v61 = vld [vmem:[%s4000_s3 + $0x1c0] sm:$0xff]   ;;  %v490_v62 = vand.u32 31, %v3311_v41  ;;  %vm3375_vm6 = vmpackc.low %vm3327_vm3, %vm3149_vm4  ;;  %v3102_v56 = vld [vmem:[%s4000_s3 + $0x188] sm:$0xff]   ;;  %vm3506_vm9 = vcmp.ne.s32.totalorder %v462_v30, 31  ;;  %s3967_s29 = scalar_lea.vmem %s4001_s4, %s2435_s11 }
  0x10   : > { %2624 = vmatpush3.bf16.msra.mxu0 %v3077_v11  ;;  %2864 = vmatpush3.bf16.msra.mxu1 %v3076_v10  ;;  %v2454_v33 = vld [vmem:[%s3284_s20] sm:$0xff]   ;;  %v2525_v38 = vld [vmem:[%s3284_s20 + $0x8] sm:$0xff]   ;;  %v2531_v39 = vld [vmem:[%s3284_s20 + $0x38] sm:$0xff]   ;;  %s268_s10 = scalar_lea.vmem %s4003_s6, %s4033_s22 }
  0x11   : > { %2625 = vmatprep.subr.bf16.mxu0 %v3078_v12  ;;  %2865 = vmatprep.subr.bf16.mxu1 %v3079_v13  ;;  %v2455_v36 = vunpack.c.l.bf16 %v2454_v33  ;;  %v2456_v37 = vunpack.c.h.bf16 %v2454_v33  ;;  %v2459_v43 = vunpack.c.l.bf16 %v2525_v38  ;;  %v2460_v44 = vunpack.c.h.bf16 %v2525_v38  ;;  %v2526_v46 = vld [vmem:[%s3284_s20 + $0x10] sm:$0xff]   ;;  %v2527_v11 = vld [vmem:[%s3284_s20 + $0x18] sm:$0xff]   ;;  %v3095_v16 = vld [vmem:[%s4000_s3] sm:$0xff]  }
  0x12   : > { %v2484_v45 = vunpack.c.h.bf16 %v2531_v39  ;;  %v2483_v47 = vunpack.c.l.bf16 %v2531_v39  ;;  %v2463_v51 = vunpack.c.l.bf16 %v2526_v46  ;;  %v2464_v52 = vunpack.c.h.bf16 %v2526_v46  ;;  %v2528_v39 = vld [vmem:[%s3284_s20 + $0x20] sm:$0xff]   ;;  %vm3519_vm10 = vmpackc.low %vm3403_vm7, %vm3149_vm4  ;;  %v3103_v26 = vld [vmem:[%s4000_s3 + $0x58] sm:$0xff]  }
  0x13   : > { %v309_v49 = vmul.f32 %v2455_v36, %v3297_v34  ;;  %v310_v50 = vmul.f32 %v2456_v37, %v3297_v34  ;;  %v311_v53 = vmul.f32 %v2459_v43, %v3297_v34  ;;  %v312_v55 = vmul.f32 %v2460_v44, %v3297_v34  ;;  %vm3574_vm11 = vmpackc.low %vm3149_vm4, %vm3463_vm8  ;;  %v3130_v18 = vld [vmem:[%s4000_s3 + $0x208] sm:$0xff]  }
  0x14   : > { %2626 = vmatpush3.bf16.msra.mxu0 %v3080_v15  ;;  %2866 = vmatpush3.bf16.msra.mxu1 %v3079_v13  ;;  %v324_v54 = vmul.f32 %v2484_v45, %v3297_v34  ;;  %v313_v60 = vmul.f32 %v2463_v51, %v3297_v34  ;;  %v314_v2 = vmul.f32 %v2464_v52, %v3297_v34  ;;  %v2467_v33 = vunpack.c.l.bf16 %v2527_v11  ;;  %vm3626_vm12 = vmpackc.low %vm3506_vm9, %vm3149_vm4 }
  0x15   : > { %2627 = vmatprep.subr.bf16.mxu0 %v3081_v17  ;;  %2867 = vmatprep.subr.bf16.mxu1 %v3082_v19  ;;  %v332_v58 = vadd.f32 %v3316_v42, %v309_v49  ;;  %v333_v59 = vadd.f32 %v3316_v42, %v310_v50  ;;  %v334_v63 = vadd.f32 %v3316_v42, %v311_v53  ;;  %v2468_v46 = vunpack.c.h.bf16 %v2527_v11 }
  0x16   : > { %v347_v0 = vadd.f32 %v3316_v42, %v324_v54  ;;  %v335_v1 = vadd.f32 %v3316_v42, %v312_v55  ;;  %v336_v5 = vadd.f32 %v3316_v42, %v313_v60  ;;  %v3349_v7 = vmul.f32 %v2483_v47, %v3297_v34  ;;  %v3100_v47 = vld [vmem:[%s4000_s3 + $0x1c8] sm:$0xff]  }
  0x17   : > { %v3345_v3 = vmax.f32 %v332_v58, 0.0  ;;  %v349_v4 = vmax.f32 %v333_v59, 0.0  ;;  %v350_v8 = vmax.f32 %v334_v63, 0.0  ;;  %v337_v12 = vadd.f32 %v3316_v42, %v314_v2  ;;  %v2529_v63 = vld [vmem:[%s3284_s20 + $0x28] sm:$0xff]  }
  0x18   : > { %2628 = vmatpush3.bf16.msra.mxu0 %v3083_v21  ;;  %2868 = vmatpush3.bf16.msra.mxu1 %v3082_v19  ;;  %v3351_v9 = vmax.f32 %v347_v0, 0.0  ;;  %v3353_v10 = vmax.f32 %v335_v1, 0.0  ;;  %v315_v49 = vmul.f32 %v2467_v33, %v3297_v34  ;;  %v2471_v54 = vunpack.c.l.bf16 %v2528_v39 }
  0x19   : > { %2629 = vmatprep.subr.bf16.mxu0 %v3084_v22  ;;  %2869 = vmatprep.subr.bf16.mxu1 %v3085_v23  ;;  %v589_v13 = vrot.slane %v3345_v3, 7  ;;  %v590_v14 = vrot.slane %v349_v4, 7  ;;  %v3359_v15 = vpack.c.bf16 %v349_v4, %v3345_v3  ;;  %v654_v17 = vrot.slane %v3345_v3, 1  ;;  %v3115_v3 = vld [vmem:[%s4000_s3 + $0x78] sm:$0xff]  }
  0x1a   : > { %v655_v19 = vrot.slane %v349_v4, 1  ;;  %v656_v21 = vrot.slane %v350_v8, 1  ;;  %v604_v22 = vrot.slane %v3351_v9, 7  ;;  %v3425_v50 = vmax.f32 %v337_v12, 0.0  ;;  %v3099_v4 = vld [vmem:[%s4000_s3 + $0x50] sm:$0xff]  }
  0x1b   : > { %1066 = vmatprep.mubr.bf16.mxu0 %v3359_v15  ;;  %v591_v51 = vrot.slane %v350_v8, 7  ;;  %v592_v53 = vrot.slane %v3353_v10, 7  ;;  %v316_v55 = vmul.f32 %v2468_v46, %v3297_v34  ;;  %v338_v58 = vadd.f32 %v3316_v42, %v315_v49  ;;  %v3108_v46 = vld [vmem:[%s4000_s3 + $0x190] sm:$0xff]  }
  0x1c   : > { %2630 = vmatpush3.bf16.msra.mxu0 %v3086_v25  ;;  %2870 = vmatpush3.bf16.msra.mxu1 %v3085_v23  ;;  %v3370_v23 = vmax.f32 %v336_v5, 0.0  ;;  %v685_v36 = vsel %vm670_vm1, %v654_v17, %v655_v19  ;;  %v621_v37 = vsel %vm605_vm0, %v604_v22, %v589_v13  ;;  %v659_v59 = vrot.slane %v3425_v50, 1 }
  0x1d   : > { %2631 = vmatprep.subr.bf16.mxu0 %v3087_v27  ;;  %2871 = vmatprep.subr.bf16.mxu1 %v3088_v29  ;;  %v620_v27 = vsel %vm605_vm0, %v589_v13, %v590_v14  ;;  %v619_v60 = vsel %vm605_vm0, %v590_v14, %v591_v51  ;;  %v618_v0 = vsel %vm605_vm0, %v591_v51, %v592_v53  ;;  %v2472_v5 = vunpack.c.h.bf16 %v2528_v39  ;;  %v2530_v14 = vld [vmem:[%s3284_s20 + $0x30] sm:$0xff]  }
  0x1e   : > { %v658_v38 = vrot.slane %v3370_v23, 1  ;;  %v3409_v44 = vpack.c.bf16 %v620_v27, %v621_v37  ;;  %v317_v1 = vmul.f32 %v2471_v54, %v3297_v34  ;;  %v339_v2 = vadd.f32 %v3316_v42, %v316_v55  ;;  %v3106_v27 = vld [vmem:[%s4000_s3 + $0x1d0] sm:$0xff]  }
  0x1f   : > { %v3471_v12 = vpack.c.bf16 %v618_v0, %v619_v60  ;;  %v2475_v13 = vunpack.c.l.bf16 %v2529_v63  ;;  %v2476_v24 = vunpack.c.h.bf16 %v2529_v63  ;;  %v318_v28 = vmul.f32 %v2472_v5, %v3297_v34  ;;  %v3104_v60 = vld [vmem:[%s4000_s3 + $0x18] sm:$0xff]  }
  0x20   : > { %2632 = vmatpush3.bf16.msra.mxu0 %v3089_v31  ;;  %2872 = vmatpush3.bf16.msra.mxu1 %v3088_v29  ;;  %v657_v29 = vrot.slane %v3353_v10, 1  ;;  %v3096_v31 = vld [vmem:[%s4000_s3 + $0x180] sm:$0xff]   ;;  %v681_v11 = vsel %vm670_vm1, %v658_v38, %v659_v59  ;;  %v593_v33 = vrot.slane %v3370_v23, 7  ;;  %vm3639_vm13 = vcmp.ne.s32.totalorder %v490_v62, 31  ;;  %v3120_v62 = vld [vmem:[%s4000_s3 + $0x1a8] sm:$0xff]  }
  0x21   : > { %2633 = vmatprep.subr.bf16.mxu0 %v3090_v32  ;;  %2873 = vmatprep.subr.bf16.mxu1 %v3091_v35  ;;  %v3387_v32 = vpack.c.bf16 %v3353_v10, %v350_v8  ;;  %v3467_v10 = vmax.f32 %v338_v58, 0.0  ;;  %v341_v39 = vadd.f32 %v3316_v42, %v318_v28  ;;  %v3112_v58 = vld [vmem:[%s4000_s3 + $0x1d8] sm:$0xff]   ;;  %v346_v28 = vadd.f32 %v3316_v42, %v3349_v7  ;;  %v3107_v7 = vld [vmem:[%s4000_s3 + $0x20] sm:$0xff]   ;;  %vm3683_vm14 = vmpackc.low %vm3639_vm13, %vm3149_vm4 }
  0x22   : > { %v683_v45 = vsel %vm670_vm1, %v656_v21, %v657_v29 }
  0x23   : > { %v3526_v30 = vmax.f32 %v341_v39, 0.0  ;;  %v3117_v39 = vld [vmem:[%s4000_s3 + $0x1e0] sm:$0xff]  }
  0x24   : > { %2634 = vmatpush3.bf16.msra.mxu0 %v3092_v48  ;;  %2874 = vmatpush3.bf16.msra.mxu1 %v3091_v35  ;;  %v684_v35 = vsel %vm670_vm1, %v655_v19, %v656_v21  ;;  %v682_v48 = vsel %vm670_vm1, %v657_v29, %v658_v38  ;;  %v340_v19 = vadd.f32 %v3316_v42, %v317_v1  ;;  %v3475_v21 = vmax.f32 %v339_v2, 0.0  ;;  %v3101_v38 = vld [vmem:[%s4000_s3 + $0x10] sm:$0xff]  }
  0x25   : > { %2699 = vmatprep.subr.bf16.mxu1 %v3093_v57  ;;  %2779 = vmatprep.subr.bf16.mxu0 %v3094_v61  ;;  %v3407_v43 = vpack.c.bf16 %v684_v35, %v685_v36  ;;  %v3431_v52 = vpack.c.bf16 %v682_v48, %v683_v45  ;;  %v3098_v57 = vld [vmem:[%s4000_s3 + $0x8] sm:$0xff]   ;;  %v3448_v61 = vpack.c.bf16 %v3425_v50, %v3370_v23  ;;  %v660_v29 = vrot.slane %v3467_v10, 1 }
  0x26   : > { %v594_v35 = vrot.slane %v3425_v50, 7  ;;  %v3485_v36 = vmax.f32 %v340_v19, 0.0  ;;  %v661_v37 = vrot.slane %v3475_v21, 1  ;;  %v2479_v45 = vunpack.c.l.bf16 %v2530_v14 }
  0x27   : > { %2875 = vmatprep.mubr.bf16.mxu1 %v3407_v43  ;;  %2542 = vmatmul.mubr.msk.bf16.vlgmr.msra.gmra.mrb[0].mxu0 %vm3365_vm5, %v3409_v44  ;;  %v680_v23 = vsel %vm670_vm1, %v659_v59, %v660_v29  ;;  %v663_v63 = vrot.slane %v3526_v30, 1  ;;  %v3547_v0 = vpack.c.bf16 %v3475_v21, %v3467_v10  ;;  %v2480_v1 = vunpack.c.h.bf16 %v2530_v14  ;;  %v3105_v14 = vld [vmem:[%s4000_s3 + $0x60] sm:$0xff]  }
  0x28   : > { %2780 = vmatpush3.bf16.msra.mxu0 %v3096_v31  ;;  %1074 = vmatprep.mubr.bf16.mxu0 %v3387_v32  ;;  %v319_v31 = vmul.f32 %v2475_v13, %v3297_v34  ;;  %v616_v48 = vsel %vm605_vm0, %v593_v33, %v594_v35  ;;  %v3510_v49 = vpack.c.bf16 %v680_v23, %v681_v11  ;;  %v662_v51 = vrot.slane %v3485_v36, 1  ;;  %v3114_v13 = vld [vmem:[%s4000_s3 + $0x198] sm:$0xff]  }
  0x29   : > { %2876 = vmatmul.mubr.msk.bf16.vlgmr.msra.gmra.mrb[0].mxu1 %vm3375_vm6, %v3431_v52  ;;  %2781 = vmatprep.subr.bf16.mxu0 %v3100_v47  ;;  %v679_v54 = vsel %vm670_vm1, %v660_v29, %v661_v37  ;;  %v321_v40 = vmul.f32 %v2479_v45, %v3297_v34  ;;  %v597_v41 = vrot.slane %v3485_v36, 7 }
  0x2a   : > { %2700 = vmatpush3.bf16.msra.mxu1 %v3095_v16  ;;  %v342_v47 = vadd.f32 %v3316_v42, %v319_v31  ;;  %v617_v16 = vsel %vm605_vm0, %v592_v53, %v593_v33  ;;  %2879 = vmatprep.mubr.bf16.mxu1 %v3510_v49  ;;  %v678_v59 = vsel %vm670_vm1, %v661_v37, %v662_v51 }
  0x2b   : > { %2701 = vmatprep.subr.bf16.mxu1 %v3097_v20  ;;  %v3549_v2 = vpack.c.bf16 %v678_v59, %v679_v54  ;;  %v344_v11 = vadd.f32 %v3316_v42, %v321_v40  ;;  %v677_v19 = vsel %vm670_vm1, %v662_v51, %v663_v63  ;;  %v669_v40 = vrot.slane %v3351_v9, 1  ;;  %v3111_v59 = vld [vmem:[%s4000_s3 + $0x70] sm:$0xff]  }
  0x2c   : > { %2782 = vmatpush3.bf16.msra.mxu0 %v3102_v56  ;;  %v3529_v55 = vmax.f32 %v342_v47, 0.0  ;;  %v3531_v56 = vpack.c.bf16 %v616_v48, %v617_v16  ;;  %v3119_v16 = vld [vmem:[%s4000_s3 + $0x1e8] sm:$0xff]  }
  0x2d   : > { %2783 = vmatprep.subr.bf16.mxu0 %v3106_v27  ;;  %v595_v27 = vrot.slane %v3467_v10, 7  ;;  %v3580_v33 = vmax.f32 %v344_v11, 0.0  ;;  %v596_v10 = vrot.slane %v3475_v21, 7  ;;  %v3118_v21 = vld [vmem:[%s4000_s3 + $0x1a0] sm:$0xff]   ;;  %v3113_v11 = vld [vmem:[%s4000_s3 + $0x30] sm:$0xff]  }
  0x2e   : > { %2702 = vmatpush3.bf16.msra.mxu1 %v3098_v57  ;;  %v320_v57 = vmul.f32 %v2476_v24, %v3297_v34  ;;  %v322_v24 = vmul.f32 %v2480_v1, %v3297_v34 }
  0x2f   : > { %1075 = vmatmul.mubr.bf16.gmra.mrb[4].mxu0 %v3471_v12  ;;  %2703 = vmatprep.subr.bf16.mxu1 %v3099_v4  ;;  %v664_v4 = vrot.slane %v3529_v55, 1  ;;  %v615_v48 = vsel %vm605_vm0, %v594_v35, %v595_v27  ;;  %v601_v20 = vrot.slane %v3580_v33, 7 }
  0x30   : > { %1082 = vmatprep.mubr.bf16.mxu0 %v3448_v61  ;;  %2784 = vmatpush3.bf16.msra.mxu0 %v3108_v46  ;;  %v343_v5 = vadd.f32 %v3316_v42, %v320_v57  ;;  %v345_v8 = vadd.f32 %v3316_v42, %v322_v24  ;;  %v666_v46 = vrot.slane %v3580_v33, 1  ;;  %v3109_v42 = vld [vmem:[%s4000_s3 + $0x68] sm:$0xff]  }
  0x31   : > { %2785 = vmatprep.subr.bf16.mxu0 %v3112_v58  ;;  %2880 = vmatmul.mubr.msk.bf16.gmra.mrb[4].mxu1 %vm3519_vm10, %v3549_v2  ;;  %v676_v29 = vsel %vm670_vm1, %v663_v63, %v664_v4  ;;  %v3110_v58 = vld [vmem:[%s4000_s3 + $0x28] sm:$0xff]  }
  0x32   : > { %2704 = vmatpush3.bf16.msra.mxu1 %v3101_v38  ;;  %v3578_v34 = vmax.f32 %v343_v5, 0.0  ;;  %v3586_v37 = vpack.c.bf16 %v676_v29, %v677_v19  ;;  %v3589_v38 = vmax.f32 %v346_v28, 0.0  ;;  %v3606_v23 = vmax.f32 %v345_v8, 0.0 }
  0x33   : > { %2705 = vmatprep.subr.bf16.mxu1 %v3103_v26  ;;  %v614_v26 = vsel %vm605_vm0, %v595_v27, %v596_v10  ;;  %v686_v28 = vsel %vm670_vm1, %v669_v40, %v654_v17  ;;  %v3122_v27 = vld [vmem:[%s4000_s3 + $0x1f0] sm:$0xff]   ;;  %v377_v17 = vadd.s32 96, %v3209_v6  ;;  %v613_v8 = vsel %vm605_vm0, %v596_v10, %v597_v41 }
  0x34   : > { %2786 = vmatpush3.bf16.msra.mxu0 %v3114_v13  ;;  %v665_v45 = vrot.slane %v3578_v34, 1  ;;  %2883 = vmatprep.mubr.bf16.mxu1 %v3586_v37  ;;  %v668_v47 = vrot.slane %v3589_v38, 1  ;;  %v667_v57 = vrot.slane %v3606_v23, 1  ;;  %v3667_v13 = vpack.c.bf16 %v3526_v30, %v3485_v36 }
  0x35   : > { %2787 = vmatprep.subr.bf16.mxu0 %v3117_v39  ;;  %v469_v39 = vand.u32 31, %v377_v17 }
  0x36   : > { %2706 = vmatpush3.bf16.msra.mxu1 %v3104_v60  ;;  %v674_v51 = vsel %vm670_vm1, %v665_v45, %v666_v46  ;;  %v675_v54 = vsel %vm670_vm1, %v664_v4, %v665_v45  ;;  %v373_v60 = vadd.s32 64, %v3209_v6  ;;  %v672_v63 = vsel %vm670_vm1, %v667_v57, %v668_v47  ;;  %v3125_v45 = vld [vmem:[%s4000_s3 + $0x1f8] sm:$0xff]   ;;  %v3134_v6 = vld [vmem:[%s4000_s3 + $0xb0] sm:$0xff]  }
  0x37   : > { %2546 = vmatmul.mubr.msk.bf16.gmra.mrb[8].mxu0 %vm3574_vm11, %v3531_v56  ;;  %2707 = vmatprep.subr.bf16.mxu1 %v3105_v14  ;;  %v3630_v35 = vpack.c.bf16 %v674_v51, %v675_v54  ;;  %v673_v1 = vsel %vm670_vm1, %v666_v46, %v667_v57  ;;  %v3651_v4 = vpack.c.bf16 %v614_v26, %v615_v48  ;;  %v598_v14 = vrot.slane %v3526_v30, 7  ;;  %v3123_v30 = vld [vmem:[%s4000_s3 + $0x1b0] sm:$0xff]   ;;  %v3116_v46 = vld [vmem:[%s4000_s3 + $0x38] sm:$0xff]   ;;  %v3734_v26 = vld [vmem:[%s4000_s3 + $0x200] sm:$0xff]  }
  0x38   : > { %1090 = vmatprep.mubr.bf16.mxu0 %v3547_v0  ;;  %2788 = vmatpush3.bf16.msra.mxu0 %v3118_v21  ;;  %v3660_v5 = vpack.c.bf16 %v672_v63, %v673_v1  ;;  %v441_v19 = vand.u32 31, %v373_v60  ;;  %v671_v24 = vsel %vm670_vm1, %v668_v47, %v669_v40  ;;  %v3121_v21 = vld [vmem:[%s4000_s3 + $0x80] sm:$0xff]   ;;  %v599_v47 = vrot.slane %v3529_v55, 7  ;;  %v3126_v51 = vld [vmem:[%s4000_s3 + $0x1b8] sm:$0xff]   ;;  %v3124_v57 = vld [vmem:[%s4000_s3 + $0x88] sm:$0xff]  }
  0x39   : > { %2789 = vmatprep.subr.bf16.mxu0 %v3119_v16  ;;  %2884 = vmatmul.mubr.msk.bf16.gmra.mrb[8].mxu1 %vm3626_vm12, %v3630_v35  ;;  %v3695_v29 = vpack.c.bf16 %v686_v28, %v671_v24  ;;  %v3724_v48 = vpack.c.bf16 %v3578_v34, %v3529_v55  ;;  %v600_v16 = vrot.slane %v3578_v34, 7  ;;  %v3150_v54 = vmov 0   ;;  %v3127_v60 = vld [vmem:[%s4000_s3 + $0x90] sm:$0xff]  }
  0x3a   : > { %2708 = vmatpush3.bf16.msra.mxu1 %v3107_v7  ;;  %2887 = vmatprep.mubr.bf16.mxu1 %v3660_v5  ;;  %vm3053_vm15 = vcmp.ne.s32.totalorder %v441_v19, 0  ;;  %v612_v7 = vsel %vm605_vm0, %v597_v41, %v598_v14  ;;  %v611_v34 = vsel %vm605_vm0, %v598_v14, %v599_v47  ;;  %vm3054_vm2 = vcmp.ne.s32.totalorder %v469_v39, 0  ;;  %v3131_v19 = vld [vmem:[%s4000_s3 + $0xa0] sm:$0xff]  }
  0x3b   : > { %2709 = vmatprep.subr.bf16.mxu1 %v3109_v42  ;;  %vm3712_vm1 = vmpackc.low %vm3149_vm4, %vm3053_vm15  ;;  %v3716_v42 = vpack.c.bf16 %v612_v7, %v613_v8  ;;  %v610_v55 = vsel %vm605_vm0, %v599_v47, %v600_v16 }
  0x3c   : > { %2790 = vmatpush3.bf16.msra.mxu0 %v3120_v62  ;;  %v3748_v40 = vpack.c.bf16 %v610_v55, %v611_v34  ;;  %vm3774_vm3 = vmpackc.low %vm3149_vm4, %vm3054_vm2  ;;  %v3780_v62 = vpack.c.bf16 %v3351_v9, %v3589_v38  ;;  %v3136_v9 = vld [vmem:[%s4000_s3 + $0xb8] sm:$0xff]  }
  0x3d   : > { %2791 = vmatprep.subr.bf16.mxu0 %v3122_v27 }
  0x3e   : > { %2710 = vmatpush3.bf16.msra.mxu1 %v3110_v58  ;;  %v3753_v58 = vpack.c.bf16 %v3606_v23, %v3580_v33  ;;  %v609_v33 = vsel %vm605_vm0, %v600_v16, %v601_v20 }
  0x3f   : > { %1091 = vmatmul.mubr.bf16.gmra.mrb[12].mxu0 %v3651_v4  ;;  %2711 = vmatprep.subr.bf16.mxu1 %v3111_v59  ;;  %v602_v59 = vrot.slane %v3606_v23, 7  ;;  %v3129_v23 = vld [vmem:[%s4000_s3 + $0x98] sm:$0xff]  }
  0x40   : > { %1098 = vmatprep.mubr.bf16.mxu0 %v3667_v13  ;;  %2792 = vmatpush3.bf16.msra.mxu0 %v3123_v30 }
  0x41   : > { %2888 = vmatmul.mubr.msk.bf16.gmra.mrb[12].mxu1 %vm3683_vm14, %v3695_v29  ;;  %2793 = vmatprep.subr.bf16.mxu0 %v3125_v45  ;;  %v608_v63 = vsel %vm605_vm0, %v601_v20, %v602_v59 }
  0x42   : > { %2712 = vmatpush3.bf16.msra.mxu1 %v3113_v11  ;;  %1404 = vmatprep.mubr.bf16.mxu1 %v3150_v54  ;;  %v3770_v1 = vpack.c.bf16 %v608_v63, %v609_v33  ;;  %v603_v11 = vrot.slane %v3589_v38, 7  ;;  %v3133_v38 = vld [vmem:[%s4000_s3 + $0xa8] sm:$0xff]  }
  0x43   : > { %2713 = vmatprep.subr.bf16.mxu1 %v3115_v3 }
  0x44   : > { %2794 = vmatpush3.bf16.msra.mxu0 %v3126_v51  ;;  %v606_v14 = vsel %vm605_vm0, %v603_v11, %v604_v22  ;;  %v3132_v22 = vld [vmem:[%s4000_s3 + $0x210] sm:$0xff]  }
  0x45   : > { %2923 = vmatprep.subr.bf16.mxu0 %v3734_v26 }
  0x46   : > { %2714 = vmatpush3.bf16.msra.mxu1 %v3116_v46 }
  0x47   : > { %2550 = vmatmul.mubr.msk.bf16.gmra.mrb[16].mxu0 %vm3712_vm1, %v3716_v42  ;;  %2891 = vmatprep.subr.bf16.mxu1 %v3121_v21 }
  0x48   : > { %1106 = vmatprep.mubr.bf16.mxu0 %v3724_v48 }
  0x49   : > { %1405 = vmatmul.mubr.bf16.vlgmr.msra.gmra.mrb[16].mxu1 %v3150_v54 }
  0x4a   : > { %1412 = vmatprep.mubr.bf16.mxu1 %v3150_v54  ;;  %2892 = vmatpush3.bf16.msra.mxu1 %v3121_v21 }
  0x4b   : > { %2893 = vmatprep.subr.bf16.mxu1 %v3124_v57 }
  0x4e   : > { %2894 = vmatpush3.bf16.msra.mxu1 %v3124_v57 }
  0x4f   : > { %1107 = vmatmul.mubr.bf16.gmra.mrb[20].mxu0 %v3748_v40  ;;  %2895 = vmatprep.subr.bf16.mxu1 %v3127_v60 }
  0x50   : > { %1114 = vmatprep.mubr.bf16.mxu0 %v3753_v58 }
  0x51   : > { %1413 = vmatmul.mubr.bf16.gmra.mrb[20].mxu1 %v3150_v54 }
  0x52   : > { %1420 = vmatprep.mubr.bf16.mxu1 %v3359_v15  ;;  %2896 = vmatpush3.bf16.msra.mxu1 %v3127_v60  ;;  %v607_v15 = vsel %vm605_vm0, %v602_v59, %v603_v11 }
  0x53   : > { %2897 = vmatprep.subr.bf16.mxu1 %v3129_v23  ;;  %v722_v24 = vpack.c.bf16 %v606_v14, %v607_v15 }
  0x56   : > { %2898 = vmatpush3.bf16.msra.mxu1 %v3129_v23 }
  0x57   : > { %2554 = vmatmul.mubr.msk.bf16.gmra.mrb[24].mxu0 %vm3774_vm3, %v3770_v1  ;;  %2899 = vmatprep.subr.bf16.mxu1 %v3131_v19 }
  0x58   : > { %1122 = vmatprep.mubr.bf16.mxu0 %v3780_v62 }
  0x59   : > { %2574 = vmatmul.mubr.msk.bf16.gmra.mrb[24].mxu1 %vm3365_vm5, %v3409_v44  ;;  %v3137_v44 = vld [vmem:[%s4000_s3 + $0x220] sm:$0xff]  }
  0x5a   : > { %1428 = vmatprep.mubr.bf16.mxu1 %v3387_v32  ;;  %2900 = vmatpush3.bf16.msra.mxu1 %v3131_v19  ;;  %v3135_v32 = vld [vmem:[%s4000_s3 + $0x218] sm:$0xff]  }
  0x5b   : > { %2901 = vmatprep.subr.bf16.mxu1 %v3133_v38 }
  0x5e   : > { %2902 = vmatpush3.bf16.msra.mxu1 %v3133_v38 }
  0x5f   : > { %1123 = vmatmul.mubr.bf16.gmra.mrb[28].mxu0 %v722_v24  ;;  %2903 = vmatprep.subr.bf16.mxu1 %v3134_v6 }
  0x60   : > { %1815 = vmatprep.mubr.bf16.mxu0 %v3448_v61 }
  0x61   : > { %1429 = vmatmul.mubr.bf16.gmra.mrb[28].mxu1 %v3471_v12  ;;  %v3139_v12 = vld [vmem:[%s4000_s3 + $0x230] sm:$0xff]  }
  0x62   : > { %1436 = vmatprep.mubr.bf16.mxu1 %v3448_v61  ;;  %2904 = vmatpush3.bf16.msra.mxu1 %v3134_v6  ;;  %v3138_v61 = vld [vmem:[%s4000_s3 + $0x228] sm:$0xff]  }
  0x63   : > { %2905 = vmatprep.subr.bf16.mxu1 %v3136_v9 }
  0x66   : > { %2906 = vmatpush3.bf16.msra.mxu1 %v3136_v9 }
  0x67   : > { %2598 = vmatmul.mubr.msk.bf16.vlgmr.msra.gmra.mrb[32].mxu0 %vm3574_vm11, %v3531_v56  ;;  %2955 = vmatprep.subr.bf16.mxu1 %v3734_v26 }
  0x68   : > { %2924 = vmatpush3.bf16.msra.mxu0 %v3734_v26  ;;  %1823 = vmatprep.mubr.bf16.mxu0 %v3547_v0 }
  0x69   : > { %2925 = vmatprep.subr.bf16.mxu0 %v3130_v18  ;;  %2578 = vmatmul.mubr.msk.bf16.gmra.mrb[32].mxu1 %vm3574_vm11, %v3531_v56  ;;  %v3140_v56 = vld [vmem:[%s4000_s3 + $0x238] sm:$0xff]  }
  0x6a   : > { %1444 = vmatprep.mubr.bf16.mxu1 %v3547_v0 }
  0x6c   : > { %2926 = vmatpush3.bf16.msra.mxu0 %v3130_v18 }
  0x6d   : > { %2927 = vmatprep.subr.bf16.mxu0 %v3132_v22 }
  0x6f   : > { %1824 = vmatmul.mubr.bf16.gmra.mrb[36].mxu0 %v3651_v4 }
  0x70   : > { %1831 = vmatprep.mubr.bf16.mxu0 %v3667_v13  ;;  %2928 = vmatpush3.bf16.msra.mxu0 %v3132_v22 }
  0x71   : > { %2929 = vmatprep.subr.bf16.mxu0 %v3135_v32  ;;  %1445 = vmatmul.mubr.bf16.gmra.mrb[36].mxu1 %v3651_v4 }
  0x72   : > { %1452 = vmatprep.mubr.bf16.mxu1 %v3667_v13 }
  0x74   : > { %2930 = vmatpush3.bf16.msra.mxu0 %v3135_v32 }
  0x75   : > { %2931 = vmatprep.subr.bf16.mxu0 %v3137_v44 }
  0x77   : > { %2602 = vmatmul.mubr.msk.bf16.gmra.mrb[40].mxu0 %vm3712_vm1, %v3716_v42 }
  0x78   : > { %1839 = vmatprep.mubr.bf16.mxu0 %v3724_v48  ;;  %2932 = vmatpush3.bf16.msra.mxu0 %v3137_v44 }
  0x79   : > { %2933 = vmatprep.subr.bf16.mxu0 %v3138_v61  ;;  %2582 = vmatmul.mubr.msk.bf16.gmra.mrb[40].mxu1 %vm3712_vm1, %v3716_v42 }
  0x7a   : > { %1460 = vmatprep.mubr.bf16.mxu1 %v3724_v48 }
  0x7c   : > { %2934 = vmatpush3.bf16.msra.mxu0 %v3138_v61 }
  0x7d   : > { %2935 = vmatprep.subr.bf16.mxu0 %v3139_v12 }
  0x7f   : > { %1840 = vmatmul.mubr.bf16.gmra.mrb[44].mxu0 %v3748_v40 }
  0x80   : > { %1847 = vmatprep.mubr.bf16.mxu0 %v3753_v58  ;;  %2936 = vmatpush3.bf16.msra.mxu0 %v3139_v12 }
  0x81   : > { %2937 = vmatprep.subr.bf16.mxu0 %v3140_v56  ;;  %1461 = vmatmul.mubr.bf16.gmra.mrb[44].mxu1 %v3748_v40 }
  0x82   : > { %2907 = vmatprep.mubr.bf16.mxu1 %v3150_v54 }
  0x84   : > { %2938 = vmatpush3.bf16.msra.mxu0 %v3140_v56 }
  0x87   : > { %2606 = vmatmul.mubr.msk.bf16.gmra.mrb[48].mxu0 %vm3774_vm3, %v3770_v1 }
  0x88   : > { %1855 = vmatprep.mubr.bf16.mxu0 %v3780_v62 }
  0x89   : > { %2908 = vmatmul.mubr.bf16.vlgmr.msra.gmra.mrb[0].mxu1 %v3150_v54 }
  0x8a   : > { %2963 = vmatpush3.bf16.msra.mxu1 %v3734_v26  ;;  %2911 = vmatprep.mubr.bf16.mxu1 %v3407_v43 }
  0x8b   : > { %2956 = vmatprep.subr.bf16.mxu1 %v3130_v18 }
  0x8e   : > { %2964 = vmatpush3.bf16.msra.mxu1 %v3130_v18 }
  0x8f   : > { %1856 = vmatmul.mubr.bf16.gmra.mrb[52].mxu0 %v722_v24  ;;  %2957 = vmatprep.subr.bf16.mxu1 %v3132_v22 }
  0x90   : > { %1863 = vmatprep.mubr.bf16.mxu0 %v3150_v54 }
  0x91   : > { %2912 = vmatmul.mubr.msk.bf16.gmra.mrb[4].mxu1 %vm3375_vm6, %v3431_v52 }
  0x92   : > { %2965 = vmatpush3.bf16.msra.mxu1 %v3132_v22  ;;  %2915 = vmatprep.mubr.bf16.mxu1 %v3510_v49 }
  0x93   : > { %2958 = vmatprep.subr.bf16.mxu1 %v3135_v32 }
  0x96   : > { %2966 = vmatpush3.bf16.msra.mxu1 %v3135_v32 }
  0x97   : > { %1864 = vmatmul.mubr.bf16.gmra.mrb[56].mxu0 %v3150_v54  ;;  %2959 = vmatprep.subr.bf16.mxu1 %v3137_v44 }
  0x98   : > { %1871 = vmatprep.mubr.bf16.mxu0 %v3150_v54 }
  0x99   : > { %2916 = vmatmul.mubr.msk.bf16.gmra.mrb[8].mxu1 %vm3519_vm10, %v3549_v2 }
  0x9a   : > { %2967 = vmatpush3.bf16.msra.mxu1 %v3137_v44  ;;  %2919 = vmatprep.mubr.bf16.mxu1 %v3586_v37 }
  0x9b   : > { %2960 = vmatprep.subr.bf16.mxu1 %v3138_v61 }
  0x9e   : > { %2968 = vmatpush3.bf16.msra.mxu1 %v3138_v61 }
  0x9f   : > { %1872 = vmatmul.mubr.bf16.gmra.mrb[60].mxu0 %v3150_v54  ;;  %2961 = vmatprep.subr.bf16.mxu1 %v3139_v12 }
  0xa0   : > { %2939 = vmatprep.mubr.bf16.mxu0 %v3510_v49 }
  0xa1   : > { %2920 = vmatmul.mubr.msk.bf16.gmra.mrb[12].mxu1 %vm3626_vm12, %v3630_v35 }
  0xa2   : > { %2969 = vmatpush3.bf16.msra.mxu1 %v3139_v12  ;;  %2947 = vmatprep.mubr.bf16.mxu1 %v3660_v5 }
  0xa3   : > { %2962 = vmatprep.subr.bf16.mxu1 %v3140_v56 }
  0xa6   : > { %2970 = vmatpush3.bf16.msra.mxu1 %v3140_v56 }
  0xa7   : > { %2940 = vmatmul.mubr.msk.bf16.vlgmr.msra.gmra.mrb[64].mxu0 %vm3519_vm10, %v3549_v2 }
  0xa8   : > { %2943 = vmatprep.mubr.bf16.mxu0 %v3586_v37 }
  0xa9   : > { %2948 = vmatmul.mubr.msk.bf16.vlgmr.msra.gmra.mrb[8].mxu1 %vm3683_vm14, %v3695_v29 }
  0xaa   : > { %2951 = vmatprep.mubr.bf16.mxu1 %v3150_v54 }
  0xaf   : > { %2944 = vmatmul.mubr.msk.bf16.gmra.mrb[68].mxu0 %vm3626_vm12, %v3630_v35 }
  0xb1   : > { %2952 = vmatmul.mubr.bf16.gmra.mrb[12].mxu1 %v3150_v54 }
  0xfa   : > { %v2635_v25 = vpop.f32.mrb[0].mxu0 }
  0xfb   : > { %v2636_v43 = vpop.f32.mrb[1].mxu0 }
  0xfc   : > { %v2637_v52 = vadd.f32 %v2636_v43, %v2635_v25  ;;  %v2638_v49 = vpop.f32.mrb[2].mxu0 }
  0xfd   : > { %v2639_v53 = vpop.f32.mrb[3].mxu0 }
  0xfe   : > { %v2640_v0 = vadd.f32 %v2639_v53, %v2638_v49 }
 0x102   : > { %v2641_v2 = vpop.f32.mrb[4].mxu0 }
 0x103   : > { %v2642_v31 = vpop.f32.mrb[5].mxu0 }
 0x104   : > { %v2643_v37 = vadd.f32 %v2642_v31, %v2641_v2  ;;  %v2644_v4 = vpop.f32.mrb[6].mxu0 }
 0x105   : > { %v2645_v5 = vpop.f32.mrb[7].mxu0 }
 0x106   : > { %v2646_v13 = vadd.f32 %v2645_v5, %v2644_v4 }
 0x10a   : > { %v2647_v28 = vpop.f32.mrb[8].mxu0 }
 0x10b   : > { %v2648_v27 = vpop.f32.mrb[9].mxu0 }
 0x10c   : > { %v2649_v36 = vadd.f32 %v2648_v27, %v2647_v28  ;;  %v2650_v3 = vpop.f32.mrb[10].mxu0 }
 0x10d   : > { %v2651_v50 = vpop.f32.mrb[11].mxu0 }
 0x10e   : > { %v2652_v35 = vadd.f32 %v2651_v50, %v2650_v3 }
 0x112   : > { %v2653_v17 = vpop.f32.mrb[12].mxu0 }
 0x113   : > { %v2654_v30 = vpop.f32.mrb[13].mxu0 }
 0x114   : > { %v2655_v29 = vadd.f32 %v2654_v30, %v2653_v17  ;;  %v2656_v7 = vpop.f32.mrb[14].mxu0 }
 0x115   : > { %v2657_v8 = vpop.f32.mrb[15].mxu0 }
 0x116   : > { %v2658_v39 = vadd.f32 %v2657_v8, %v2656_v7 }
 0x11a   : > { %v2659_v45 = vpop.f32.mrb[16].mxu0 }
 0x11b   : > { %v2660_v46 = vpop.f32.mrb[17].mxu0 }
 0x11c   : > { %v3896_v21 = vadd.f32 %v2660_v46, %v2659_v45  ;;  %v2662_v10 = vpop.f32.mrb[18].mxu0  ;;  %v2715_v48 = vpop.f32.mrb[16].mxu1 }
 0x11d   : > { %v2663_v42 = vpop.f32.mrb[19].mxu0  ;;  %v2716_v16 = vpop.f32.mrb[17].mxu1 }
 0x11e   : > { %v3898_v47 = vadd.f32 %v2663_v42, %v2662_v10  ;;  %v2717_v51 = vadd.f32 %v2716_v16, %v2715_v48  ;;  %v2718_v54 = vpop.f32.mrb[18].mxu1 }
 0x11f   : > { %v2719_v26 = vpop.f32.mrb[19].mxu1 }
 0x120   : > { %v2720_v34 = vadd.f32 %v2719_v26, %v2718_v54  ;;  %v3900_v40 = vadd.f32 %v2717_v51, %v2637_v52 }
 0x122   : > { %v2665_v55 = vpop.f32.mrb[20].mxu0  ;;  %v3904_v60 = vadd.f32 %v2720_v34, %v2640_v0 }
 0x123   : > { %v2666_v57 = vpop.f32.mrb[21].mxu0 }
 0x124   : > { %v3902_v58 = vadd.f32 %v2666_v57, %v2665_v55  ;;  %v2668_v20 = vpop.f32.mrb[22].mxu0  ;;  %v2721_v33 = vpop.f32.mrb[20].mxu1 }
 0x125   : > { %v2669_v59 = vpop.f32.mrb[23].mxu0  ;;  %v2722_v23 = vpop.f32.mrb[21].mxu1 }
 0x126   : > { %v3906_v63 = vadd.f32 %v2669_v59, %v2668_v20  ;;  %v2723_v1 = vadd.f32 %v2722_v23, %v2721_v33  ;;  %v2724_v41 = vpop.f32.mrb[22].mxu1 }
 0x127   : > { %v2725_v62 = vpop.f32.mrb[23].mxu1 }
 0x128   : > { %v2726_v19 = vadd.f32 %v2725_v62, %v2724_v41  ;;  %v3908_v15 = vadd.f32 %v2723_v1, %v2643_v37 }
 0x12a   : > { %v2671_v11 = vpop.f32.mrb[24].mxu0  ;;  %v3912_v9 = vadd.f32 %v2726_v19, %v2646_v13 }
 0x12b   : > { %v2672_v14 = vpop.f32.mrb[25].mxu0 }
 0x12c   : > { %v3910_v38 = vadd.f32 %v2672_v14, %v2671_v11  ;;  %v2674_v24 = vpop.f32.mrb[26].mxu0  ;;  %v2727_v22 = vpop.f32.mrb[24].mxu1 }
 0x12d   : > { %v2675_v6 = vpop.f32.mrb[27].mxu0  ;;  %v2728_v32 = vpop.f32.mrb[25].mxu1 }
 0x12e   : > { %v3914_v18 = vadd.f32 %v2675_v6, %v2674_v24  ;;  %v2729_v44 = vadd.f32 %v2728_v32, %v2727_v22  ;;  %v2730_v61 = vpop.f32.mrb[26].mxu1 }
 0x12f   : > { %v2731_v12 = vpop.f32.mrb[27].mxu1 }
 0x130   : > { %v2732_v25 = vadd.f32 %v2731_v12, %v2730_v61  ;;  %v3916_v52 = vadd.f32 %v2729_v44, %v2649_v36 }
 0x132   : > { %v2677_v56 = vpop.f32.mrb[28].mxu0  ;;  %v3920_v2 = vadd.f32 %v2732_v25, %v2652_v35 }
 0x133   : > { %v2678_v43 = vpop.f32.mrb[29].mxu0 }
 0x134   : > { %v3918_v49 = vadd.f32 %v2678_v43, %v2677_v56  ;;  %v2680_v53 = vpop.f32.mrb[30].mxu0  ;;  %v2733_v37 = vpop.f32.mrb[28].mxu1 }
 0x135   : > { %v2681_v0 = vpop.f32.mrb[31].mxu0  ;;  %v2734_v4 = vpop.f32.mrb[29].mxu1 }
 0x136   : > { %v3922_v31 = vadd.f32 %v2681_v0, %v2680_v53  ;;  %v2735_v5 = vadd.f32 %v2734_v4, %v2733_v37  ;;  %v2736_v13 = vpop.f32.mrb[30].mxu1 }
 0x137   : > { %v2737_v28 = vpop.f32.mrb[31].mxu1 }
 0x138   : > { %v2738_v3 = vadd.f32 %v2737_v28, %v2736_v13  ;;  %v3924_v17 = vadd.f32 %v2735_v5, %v2655_v29 }
 0x13a   : > { %v2795_v27 = vpop.f32.mrb[32].mxu0  ;;  %v3928_v8 = vadd.f32 %v2738_v3, %v2658_v39 }
 0x13b   : > { %v2796_v50 = vpop.f32.mrb[33].mxu0 }
 0x13c   : > { %v3926_v36 = vadd.f32 %v2796_v50, %v2795_v27  ;;  %v2798_v30 = vpop.f32.mrb[34].mxu0  ;;  %v2739_v45 = vpop.f32.mrb[32].mxu1 }
 0x13d   : > { %v2799_v7 = vpop.f32.mrb[35].mxu0  ;;  %v2740_v46 = vpop.f32.mrb[33].mxu1 }
 0x13e   : > { %v3930_v35 = vadd.f32 %v2799_v7, %v2798_v30  ;;  %v2741_v10 = vadd.f32 %v2740_v46, %v2739_v45  ;;  %v2742_v42 = vpop.f32.mrb[34].mxu1 }
 0x13f   : > { %v2743_v48 = vpop.f32.mrb[35].mxu1 }
 0x140   : > { %v3006_v51 = vadd.f32 %v2741_v10, %v3896_v21  ;;  %v2744_v54 = vadd.f32 %v2743_v48, %v2742_v42 }
 0x142   : > { %v2801_v16 = vpop.f32.mrb[36].mxu0  ;;  %v3012_v34 = vadd.f32 %v2744_v54, %v3898_v47 }
 0x143   : > { %v2802_v26 = vpop.f32.mrb[37].mxu0 }
 0x144   : > { %v2803_v29 = vadd.f32 %v2802_v26, %v2801_v16  ;;  %v2804_v55 = vpop.f32.mrb[38].mxu0  ;;  %v2745_v39 = vpop.f32.mrb[36].mxu1 }
 0x145   : > { %v2805_v57 = vpop.f32.mrb[39].mxu0  ;;  %v2746_v59 = vpop.f32.mrb[37].mxu1 }
 0x146   : > { %v2806_v20 = vadd.f32 %v2805_v57, %v2804_v55  ;;  %v2747_v33 = vadd.f32 %v2746_v59, %v2745_v39  ;;  %v2748_v23 = vpop.f32.mrb[38].mxu1 }
 0x147   : > { %v2749_v1 = vpop.f32.mrb[39].mxu1 }
 0x148   : > { %v3003_v62 = vadd.f32 %v2747_v33, %v3902_v58  ;;  %v2750_v11 = vadd.f32 %v2749_v1, %v2748_v23 }
 0x14a   : > { %v2807_v41 = vpop.f32.mrb[40].mxu0  ;;  %v3009_v24 = vadd.f32 %v2750_v11, %v3906_v63 }
 0x14b   : > { %v2808_v19 = vpop.f32.mrb[41].mxu0 }
 0x14c   : > { %v3935_v14 = vadd.f32 %v2808_v19, %v2807_v41  ;;  %v2810_v21 = vpop.f32.mrb[42].mxu0  ;;  %v2751_v47 = vpop.f32.mrb[40].mxu1 }
 0x14d   : > { %v2811_v6 = vpop.f32.mrb[43].mxu0  ;;  %v2752_v32 = vpop.f32.mrb[41].mxu1 }
 0x14e   : > { %v3938_v22 = vadd.f32 %v2811_v6, %v2810_v21  ;;  %v2753_v44 = vadd.f32 %v2752_v32, %v2751_v47  ;;  %v2754_v61 = vpop.f32.mrb[42].mxu1 }
 0x14f   : > { %v2755_v12 = vpop.f32.mrb[43].mxu1 }
 0x150   : > { %v3018_v25 = vadd.f32 %v2753_v44, %v3910_v38  ;;  %v2756_v43 = vadd.f32 %v2755_v12, %v2754_v61 }
 0x152   : > { %v2813_v56 = vpop.f32.mrb[44].mxu0  ;;  %v3024_v37 = vadd.f32 %v2756_v43, %v3914_v18 }
 0x153   : > { %v2814_v58 = vpop.f32.mrb[45].mxu0 }
 0x154   : > { %v2815_v53 = vadd.f32 %v2814_v58, %v2813_v56  ;;  %v2816_v0 = vpop.f32.mrb[46].mxu0  ;;  %v2757_v63 = vpop.f32.mrb[44].mxu1 }
 0x155   : > { %v2817_v4 = vpop.f32.mrb[47].mxu0  ;;  %v2758_v13 = vpop.f32.mrb[45].mxu1 }
 0x156   : > { %v2818_v5 = vadd.f32 %v2817_v4, %v2816_v0  ;;  %v2759_v28 = vadd.f32 %v2758_v13, %v2757_v63  ;;  %v2760_v27 = vpop.f32.mrb[46].mxu1 }
 0x157   : > { %v2761_v3 = vpop.f32.mrb[47].mxu1 }
 0x158   : > { %v3015_v30 = vadd.f32 %v2759_v28, %v3918_v49  ;;  %v2762_v7 = vadd.f32 %v2761_v3, %v2760_v27 }
 0x15a   : > { %v2819_v50 = vpop.f32.mrb[48].mxu0  ;;  %v3021_v10 = vadd.f32 %v2762_v7, %v3922_v31 }
 0x15b   : > { %v2820_v45 = vpop.f32.mrb[49].mxu0 }
 0x15c   : > { %v2821_v46 = vadd.f32 %v2820_v45, %v2819_v50  ;;  %v2822_v38 = vpop.f32.mrb[50].mxu0  ;;  %v2909_v18 = vpop.f32.mrb[0].mxu1 }
 0x15d   : > { %v2823_v42 = vpop.f32.mrb[51].mxu0  ;;  %v2972_v54 = vadd.f32 %v3908_v15, %v2909_v18  ;;  %v1503_v26 = vpop.f32.mrb[1].mxu1 }
 0x15e   : > { %v2824_v48 = vadd.f32 %v2823_v42, %v2822_v38  ;;  %v3944_v16 = vadd.f32 %v3006_v51, %v2821_v46  ;;  %v2976_v57 = vadd.f32 %v3900_v40, %v1503_v26  ;;  %v2910_v39 = vpop.f32.mrb[2].mxu1 }
 0x15f   : > { %v2980_v49 = vadd.f32 %v3912_v9, %v2910_v39  ;;  %v1506_v59 = vpop.f32.mrb[3].mxu1  ;;  %v2973_v23 = vadd.f32 %v2972_v54, %v2803_v29 }
 0x160   : > { %v3947_v55 = vadd.f32 %v3012_v34, %v2824_v48  ;;  %v2984_v31 = vadd.f32 %v3904_v60, %v1506_v59  ;;  %v2977_v51 = vadd.f32 %v2976_v57, %v3926_v36 }
 0x161   : > { %v2981_v19 = vadd.f32 %v2980_v49, %v2806_v20 }
 0x162   : > { %v2825_v33 = vpop.f32.mrb[52].mxu0  ;;  %v2985_v34 = vadd.f32 %v2984_v31, %v3930_v35 }
 0x163   : > { %v2826_v1 = vpop.f32.mrb[53].mxu0 }
 0x164   : > { %v2827_v41 = vadd.f32 %v2826_v1, %v2825_v33  ;;  %v2828_v11 = vpop.f32.mrb[54].mxu0  ;;  %v2913_v40 = vpop.f32.mrb[4].mxu1 }
 0x165   : > { %v2829_v15 = vpop.f32.mrb[55].mxu0  ;;  %v2988_v47 = vadd.f32 %v3924_v17, %v2913_v40  ;;  %v1519_v9 = vpop.f32.mrb[5].mxu1 }
 0x166   : > { %v2830_v21 = vadd.f32 %v2829_v15, %v2828_v11  ;;  %v3004_v6 = vadd.f32 %v3003_v62, %v2827_v41  ;;  %v2992_v29 = vadd.f32 %v3916_v52, %v1519_v9  ;;  %v2914_v44 = vpop.f32.mrb[6].mxu1 }
 0x167   : > { %v2996_v60 = vadd.f32 %v3928_v8, %v2914_v44  ;;  %v1522_v61 = vpop.f32.mrb[7].mxu1  ;;  %v2989_v12 = vadd.f32 %v2988_v47, %v2815_v53 }
 0x168   : > { %v3010_v32 = vadd.f32 %v3009_v24, %v2830_v21  ;;  %v3000_v20 = vadd.f32 %v3920_v2, %v1522_v61  ;;  %v2993_v35 = vadd.f32 %v2992_v29, %v3935_v14 }
 0x169   : > { %v2997_v58 = vadd.f32 %v2996_v60, %v2818_v5 }
 0x16a   : > { %v2831_v36 = vpop.f32.mrb[56].mxu0  ;;  %v3001_v17 = vadd.f32 %v3000_v20, %v3938_v22 }
 0x16b   : > { %v2832_v56 = vpop.f32.mrb[57].mxu0 }
 0x16c   : > { %v2833_v43 = vadd.f32 %v2832_v56, %v2831_v36  ;;  %v2834_v62 = vpop.f32.mrb[58].mxu0 }
 0x16d   : > { %v2835_v0 = vpop.f32.mrb[59].mxu0 }
 0x16e   : > { %v2836_v24 = vadd.f32 %v2835_v0, %v2834_v62  ;;  %v3019_v4 = vadd.f32 %v3018_v25, %v2833_v43 }
 0x170   : > { %v3960_v52 = vadd.f32 %v3024_v37, %v2836_v24 }
 0x172   : > { %v2837_v8 = vpop.f32.mrb[60].mxu0 }
 0x173   : > { %v2838_v63 = vpop.f32.mrb[61].mxu0 }
 0x174   : > { %v2839_v13 = vadd.f32 %v2838_v63, %v2837_v8  ;;  %v2840_v53 = vpop.f32.mrb[62].mxu0 }
 0x175   : > { %v2841_v28 = vpop.f32.mrb[63].mxu0 }
 0x176   : > { %v2842_v2 = vadd.f32 %v2841_v28, %v2840_v53  ;;  %v3016_v27 = vadd.f32 %v3015_v30, %v2839_v13 }
 0x178   : > { %v3022_v3 = vadd.f32 %v3021_v10, %v2842_v2 }
 0x17a   : > { %v2941_v14 = vpop.f32.mrb[64].mxu0 }
 0x17b   : > { %v2974_v50 = vadd.f32 %v2973_v23, %v2941_v14  ;;  %v1914_v7 = vpop.f32.mrb[65].mxu0 }
 0x17c   : > { %v2978_v5 = vadd.f32 %v2977_v51, %v1914_v7  ;;  %v2942_v45 = vpop.f32.mrb[66].mxu0  ;;  %v2949_v37 = vpop.f32.mrb[8].mxu1 }
 0x17d   : > { %v2982_v46 = vadd.f32 %v2981_v19, %v2942_v45  ;;  %v1917_v22 = vpop.f32.mrb[67].mxu0  ;;  %v3969_v10 = vadd.f32 %v3004_v6, %v2949_v37  ;;  %v1946_v42 = vpop.f32.mrb[9].mxu1  ;;  %v2097_v39 = vmul.f32 %v2974_v50, %v2974_v50 }
 0x17e   : > { %v2986_v25 = vadd.f32 %v2985_v34, %v1917_v22  ;;  %v2095_v38 = vmul.f32 %v2978_v5, %v2978_v5  ;;  %v3008_v26 = vadd.f32 %v3944_v16, %v1946_v42  ;;  %v2950_v57 = vpop.f32.mrb[10].mxu1 }
 0x17f   : > { %v2493_v30 = vpack.c.bf16 %v2982_v46, %v2974_v50  ;;  %v3011_v49 = vadd.f32 %v3010_v32, %v2950_v57  ;;  %v1949_v23 = vpop.f32.mrb[11].mxu1  ;;  %v2098_v11 = vmul.f32 %v2982_v46, %v2982_v46  ;;  %v2105_v45 = vmul.f32 %v3969_v10, %v3969_v10 }
 0x180   : > { %v2488_v48 = vpack.c.bf16 %v2986_v25, %v2978_v5  ;;  %v2073_v18 = vadd.f32 %v2986_v25, %v2978_v5  ;;  %v2096_v54 = vmul.f32 %v2986_v25, %v2986_v25  ;;  %v3014_v1 = vadd.f32 %v3947_v55, %v1949_v23 }
 0x181   : > { %2532 = vst [vmem:[%s3967_s29 + $0x8] sm:$0xff] %v2493_v30   ;;  %v2513_v19 = vpack.c.bf16 %v3011_v49, %v3969_v10 }
 0x182   : > { %2489 = vst [vmem:[%s3967_s29] sm:$0xff] %v2488_v48   ;;  %v2074_v59 = vadd.f32 %v2974_v50, %v2073_v18  ;;  %v2111_v33 = vadd.f32 %v2096_v54, %v2095_v38  ;;  %v2945_v31 = vpop.f32.mrb[68].mxu0  ;;  %v2508_v21 = vpack.c.bf16 %v3014_v1, %v3008_v26  ;;  %v2104_v7 = vmul.f32 %v3014_v1, %v3014_v1 }
 0x183   : > { %v2990_v51 = vadd.f32 %v2989_v12, %v2945_v31  ;;  %v1930_v41 = vpop.f32.mrb[69].mxu0  ;;  %2536 = vst [vmem:[%s3967_s29 + $0x28] sm:$0xff] %v2513_v19  }
 0x184   : > { %v2112_v15 = vadd.f32 %v2111_v33, %v2097_v39  ;;  %v2994_v16 = vadd.f32 %v2993_v35, %v1930_v41  ;;  %v2946_v34 = vpop.f32.mrb[70].mxu0  ;;  %v2075_v6 = vadd.f32 %v2982_v46, %v2074_v59  ;;  %2535 = vst [vmem:[%s3967_s29 + $0x20] sm:$0xff] %v2508_v21   ;;  %v2953_v55 = vpop.f32.mrb[12].mxu1 }
 0x185   : > { %v1933_v40 = vpop.f32.mrb[71].mxu0  ;;  %v2998_v32 = vadd.f32 %v2997_v58, %v2946_v34  ;;  %v3017_v60 = vadd.f32 %v3016_v27, %v2953_v55  ;;  %v1962_v36 = vpop.f32.mrb[13].mxu1  ;;  %v2101_v58 = vmul.f32 %v2990_v51, %v2990_v51  ;;  %v2103_v27 = vmul.f32 %v3008_v26, %v3008_v26 }
 0x186   : > { %v2099_v47 = vmul.f32 %v2994_v16, %v2994_v16  ;;  %v2113_v9 = vadd.f32 %v2112_v15, %v2098_v11  ;;  %v3002_v29 = vadd.f32 %v3001_v17, %v1933_v40  ;;  %v2076_v44 = vadd.f32 %v2994_v16, %v2075_v6  ;;  %v2954_v56 = vpop.f32.mrb[14].mxu1 }
 0x187   : > { %v2503_v12 = vpack.c.bf16 %v2998_v32, %v2990_v51  ;;  %v3020_v20 = vadd.f32 %v3019_v4, %v1962_v36  ;;  %v3023_v0 = vadd.f32 %v3022_v3, %v2954_v56  ;;  %v1965_v24 = vpop.f32.mrb[15].mxu1  ;;  %v2102_v53 = vmul.f32 %v2998_v32, %v2998_v32 }
 0x188   : > { %v2114_v61 = vadd.f32 %v2113_v9, %v2099_v47  ;;  %v2498_v35 = vpack.c.bf16 %v3002_v29, %v2994_v16  ;;  %v2077_v43 = vadd.f32 %v3002_v29, %v2076_v44  ;;  %v2100_v62 = vmul.f32 %v3002_v29, %v3002_v29 }
 0x189   : > { %2534 = vst [vmem:[%s3967_s29 + $0x18] sm:$0xff] %v2503_v12   ;;  %v3026_v63 = vadd.f32 %v3960_v52, %v1965_v24  ;;  %v2523_v13 = vpack.c.bf16 %v3023_v0, %v3017_v60  ;;  %v2106_v52 = vmul.f32 %v3011_v49, %v3011_v49  ;;  %v2107_v38 = vmul.f32 %v3020_v20, %v3020_v20 }
 0x18a   : > { %2533 = vst [vmem:[%s3967_s29 + $0x10] sm:$0xff] %v2498_v35   ;;  %v2078_v17 = vadd.f32 %v2990_v51, %v2077_v43  ;;  %v2115_v8 = vadd.f32 %v2114_v61, %v2100_v62  ;;  %v2110_v59 = vmul.f32 %v3023_v0, %v3023_v0 }
 0x18b   : > { %v2518_v4 = vpack.c.bf16 %v3026_v63, %v3020_v20  ;;  %2538 = vst [vmem:[%s3967_s29 + $0x38] sm:$0xff] %v2523_v13   ;;  %v2108_v18 = vmul.f32 %v3026_v63, %v3026_v63 }
 0x18c   : > { %v2079_v28 = vadd.f32 %v2998_v32, %v2078_v17  ;;  %v2116_v2 = vadd.f32 %v2115_v8, %v2101_v58 }
 0x18d   : > { %2537 = vst [vmem:[%s3967_s29 + $0x30] sm:$0xff] %v2518_v4  }
 0x18e   : > { %v2080_v14 = vadd.f32 %v3008_v26, %v2079_v28  ;;  %v2117_v50 = vadd.f32 %v2116_v2, %v2102_v53  ;;  %v2109_v26 = vmul.f32 %v3017_v60, %v3017_v60 }
 0x190   : > { %v2118_v3 = vadd.f32 %v2117_v50, %v2103_v27  ;;  %v2081_v5 = vadd.f32 %v3014_v1, %v2080_v14 }
 0x192   : > { %v2082_v46 = vadd.f32 %v3969_v10, %v2081_v5  ;;  %v2119_v22 = vadd.f32 %v2118_v3, %v2104_v7 }
 0x194   : > { %v2083_v25 = vadd.f32 %v3011_v49, %v2082_v46  ;;  %v2120_v37 = vadd.f32 %v2119_v22, %v2105_v45 }
 0x196   : > { %v2084_v30 = vadd.f32 %v3020_v20, %v2083_v25  ;;  %v2121_v42 = vadd.f32 %v2120_v37, %v2106_v52 }
 0x198   : > { %v2085_v48 = vadd.f32 %v3026_v63, %v2084_v30  ;;  %v2122_v54 = vadd.f32 %v2121_v42, %v2107_v38 }
 0x19a   : > { %v2086_v57 = vadd.f32 %v3017_v60, %v2085_v48  ;;  %v2123_v39 = vadd.f32 %v2122_v54, %v2108_v18 }
 0x19c   : > { %v2087_v33 = vadd.f32 %v3023_v0, %v2086_v57  ;;  %v2124_v23 = vadd.f32 %v2123_v39, %v2109_v26 }
 0x19e   : > { %v2088_v31 = vrot.slane %v2087_v33, 4  ;;  %v2125_v10 = vadd.f32 %v2124_v23, %v2110_v59 }
 0x1a0   : > { %v2089_v1 = vadd.f32 %v2088_v31, %v2087_v33  ;;  %v2126_v51 = vrot.slane %v2125_v10, 4 }
 0x1a2   : > { %v2090_v49 = vrot.slane %v2089_v1, 2  ;;  %v2127_v41 = vadd.f32 %v2126_v51, %v2125_v10 }
 0x1a4   : > { %v2091_v11 = vadd.f32 %v2090_v49, %v2089_v1  ;;  %v2128_v19 = vrot.slane %v2127_v41, 2 }
 0x1a6   : > { %v2092_v15 = vrot.slane %v2091_v11, 1  ;;  %v2129_v16 = vadd.f32 %v2128_v19, %v2127_v41 }
 0x1a8   : > { %v2093_v34 = vadd.f32 %v2092_v15, %v2091_v11  ;;  %v2130_v21 = vrot.slane %v2129_v16, 1 }
 0x1aa   : > { %2094 = vst [vmem:[%s265_s7] sm:$0x1] %v2093_v34  ;;  %v2131_v6 = vadd.f32 %v2130_v21, %v2129_v16 }
 0x1ac   : > { %2132 = vst [vmem:[%s268_s10] sm:$0x1] %v2131_v6 }
 0x1ad PF: > { %s17_s21 = sadd.s32 1, %s3147_s21  }
 0x1ae   : > { %p14_p4 = scmp.ge.s32.totalorder %s17_s21, 4  }
 0x1b0   :  { %16 = sbr.rel (!%p14_p4) target bundleno = 1 (0x1), region = 92 }

// kernel: upconvblock_forward.6
= control target key start
LH: loop header
LB: loop body
LE: loop exit
PB: predicated region body
PF: predicated region fallthrough
CT: control target
= control target key end

     0   :  { %s3390_s24 = smov 0   ;;  %s4258_s0 = inlined_call_operand.vmem [shape: bf16[2,4,32,128], index: 0, kind: input, shape index: {}]   ;;  %s4259_s1 = inlined_call_operand.vmem [shape: f32[1,128], index: 1, kind: input, shape index: {}]   ;;  %s4260_s2 = inlined_call_operand.vmem [shape: f32[1,128], index: 2, kind: input, shape index: {}]   ;;  %s4261_s3 = inlined_call_operand.vmem [shape: bf16[3,384,128], index: 3, kind: input, shape index: {}]   ;;  %s4262_s4 = inlined_call_operand.vmem [shape: bf16[2,4,32,128], index: 4, kind: input, shape index: {}]   ;;  %s4263_s5 = inlined_call_operand.vmem [shape: bf16[2,4,32,128], index: 5, kind: output, shape index: {0}]   ;;  %s4264_s6 = inlined_call_operand.vmem [shape: f32[2,1,128], index: 6, kind: output, shape index: {1}]   ;;  %s4265_s7 = inlined_call_operand.vmem [shape: f32[2,1,128], index: 7, kind: output, shape index: {2}]  }
   0x1 LB: > { %s2379_s25 = sadd.s32 4294967295, %s3346_s24   ;;  %p2383_p0 = scmp.ge.s32.totalorder %s3346_s24, 1  ;;  %s3346_s24 = sphi %s3390_s24, %s18_s24  }
   0x2   : > { %p252_p1 = scmp.lt.s32.totalorder %s3346_s24, 3 }
   0x4   : > { %p253_p2 = pnand %p2383_p0, %p252_p1 }
   0x5   : > { %v3268_v0 = vld [vmem:[%s4261_s3 + $0x40] sm:$0xff] (!%p253_p2)   ;;  %v411_v1 = vlaneseq (!%p253_p2)  ;;  %v3348_v3 = vmov (!%p253_p2), 0   ;;  %v3271_v6 = vld [vmem:[%s4261_s3 + $0x48] sm:$0xff] (!%p253_p2)   ;;  %v3274_v9 = vld [vmem:[%s4261_s3 + $0x50] sm:$0xff] (!%p253_p2)   ;;  %p295_p3 = scmp.lt.s32.totalorder (!%p253_p2), %s2379_s25, 1  ;;  %vm3349_vm5 = vmmov (!%p253_p2), 1  }
   0x6   : > { %256 = sbr.rel (%p253_p2) target bundleno = 429 (0x1ad), region = 40  ;;  %v3269_v2 = vld [vmem:[%s4261_s3 + $0x80] sm:$0xff] (!%p253_p2)   ;;  %1090 = vmatprep.mubr.bf16.mxu0 (!%p253_p2), %v3348_v3  ;;  %3058 = vmatprep.mubr.bf16.mxu1 (!%p253_p2), %v3348_v3  ;;  %v3272_v7 = vld [vmem:[%s4261_s3 + $0x88] sm:$0xff] (!%p253_p2)   ;;  %v3275_v11 = vld [vmem:[%s4261_s3 + $0x90] sm:$0xff] (!%p253_p2)  }
   0x7   : > { %2802 = vmatprep.subr.bf16.mxu0 (!%p253_p2), %v3268_v0  ;;  %v3270_v4 = vld [vmem:[%s4261_s3] sm:$0xff] (!%p253_p2)   ;;  %v3409_v5 = vshrl.u32 (!%p253_p2), %v411_v1, 7  ;;  %3042 = vmatprep.subr.bf16.mxu1 (!%p253_p2), %v3269_v2  ;;  %v3273_v8 = vld [vmem:[%s4261_s3 + $0x8] sm:$0xff] (!%p253_p2)   ;;  %v3276_v12 = vld [vmem:[%s4261_s3 + $0x10] sm:$0xff] (!%p253_p2)  }
   0x8   : > { %2803 = vmatpush3.bf16.msra.mxu0 (!%p253_p2), %v3270_v4  ;;  %3043 = vmatpush3.bf16.msra.mxu1 (!%p253_p2), %v3269_v2  ;;  %v3277_v14 = vld [vmem:[%s4261_s3 + $0x58] sm:$0xff] (!%p253_p2)   ;;  %v3280_v18 = vld [vmem:[%s4261_s3 + $0x60] sm:$0xff] (!%p253_p2)   ;;  %v3283_v22 = vld [vmem:[%s4261_s3 + $0x68] sm:$0xff] (!%p253_p2)  }
   0x9   : > { %2804 = vmatprep.subr.bf16.mxu0 (!%p253_p2), %v3271_v6  ;;  %3044 = vmatprep.subr.bf16.mxu1 (!%p253_p2), %v3272_v7  ;;  %v3424_v10 = vadd.s32 (!%p253_p2), 24, %v3409_v5  ;;  %v432_v15 = vand.u32 (!%p253_p2), 31, %v3409_v5  ;;  %v3278_v16 = vld [vmem:[%s4261_s3 + $0x98] sm:$0xff] (!%p253_p2)   ;;  %v3281_v19 = vld [vmem:[%s4261_s3 + $0xa0] sm:$0xff] (!%p253_p2)   ;;  %v3455_v21 = vadd.s32 (!%p253_p2), 56, %v3409_v5  ;;  %v3461_v23 = vadd.s32 (!%p253_p2), 88, %v3409_v5 }
   0xa   : > { %v3279_v17 = vld [vmem:[%s4261_s3 + $0x18] sm:$0xff] (!%p253_p2)   ;;  %v3282_v20 = vld [vmem:[%s4261_s3 + $0x20] sm:$0xff] (!%p253_p2)   ;;  %v3284_v24 = vld [vmem:[%s4261_s3 + $0xa8] sm:$0xff] (!%p253_p2)   ;;  %v3488_v31 = vadd.s32 (!%p253_p2), 32, %v3409_v5  ;;  %v3494_v33 = vadd.s32 (!%p253_p2), 64, %v3409_v5  ;;  %vm717_vm0 = vcmp.lt.s32.totalorder (!%p253_p2), %v3409_v5, 7 }
   0xb   : > { %v453_v13 = vand.u32 (!%p253_p2), 31, %v3424_v10  ;;  %v481_v25 = vand.u32 (!%p253_p2), 31, %v3455_v21  ;;  %v3285_v26 = vld [vmem:[%s4261_s3 + $0x28] sm:$0xff] (!%p253_p2)   ;;  %v509_v27 = vand.u32 (!%p253_p2), 31, %v3461_v23  ;;  %v3286_v28 = vld [vmem:[%s4261_s3 + $0x70] sm:$0xff] (!%p253_p2)   ;;  %v3289_v32 = vld [vmem:[%s4261_s3 + $0x78] sm:$0xff] (!%p253_p2)  }
   0xc   : > { %2805 = vmatpush3.bf16.msra.mxu0 (!%p253_p2), %v3273_v8  ;;  %3045 = vmatpush3.bf16.msra.mxu1 (!%p253_p2), %v3272_v7  ;;  %v3287_v29 = vld [vmem:[%s4261_s3 + $0xb0] sm:$0xff] (!%p253_p2)   ;;  %v3290_v34 = vld [vmem:[%s4261_s3 + $0xb8] sm:$0xff] (!%p253_p2)   ;;  %v460_v35 = vand.u32 (!%p253_p2), 31, %v3488_v31  ;;  %v488_v37 = vand.u32 (!%p253_p2), 31, %v3494_v33  ;;  %v3292_v38 = vld [vmem:[%s4261_s3 + $0x100] sm:$0xff] (!%p253_p2)   ;;  %v3525_v43 = vadd.s32 (!%p253_p2), 96, %v3409_v5 }
   0xd   : > { %2806 = vmatprep.subr.bf16.mxu0 %v3274_v9  ;;  %3046 = vmatprep.subr.bf16.mxu1 %v3275_v11  ;;  %s4293_s25 = smov (!%p295_p3, %s2379_s25), 1  ;;  %v3288_v30 = vld [vmem:[%s4261_s3 + $0x30] sm:$0xff]   ;;  %v3291_v36 = vld [vmem:[%s4261_s3 + $0x38] sm:$0xff]   ;;  %v3293_v39 = vld [vmem:[%s4261_s3 + $0x1c0] sm:$0xff]   ;;  %vm3562_vm1 = vcmp.ne.s32.totalorder %v453_v13, 31  ;;  %vm652_vm2 = vcmp.lt.s32.totalorder %v3409_v5, 1 }
   0xe   : > { %s3482_s22 = sshll.u32 %s4293_s25, 6  ;;  %v3521_v42 = vld [vmem:[%s4259_s1] ss:$0 sm:$0xff]  ;;  %v516_v54 = vand.u32 31, %v3525_v43  ;;  %v3296_v55 = vld [vmem:[%s4261_s3 + $0x108] sm:$0xff]   ;;  %v3298_v13 = vld [vmem:[%s4261_s3 + $0x110] sm:$0xff]   ;;  %s312_s21 = scalar_lea.vmem %s4264_s6, %s4293_s25 }
   0xf   : > { %s3507_s12 = scalar_lea.vmem %s4258_s0, %s3482_s22  ;;  %v3294_v44 = vld [vmem:[%s4261_s3 + $0xc0] sm:$0xff]   ;;  %v3299_v61 = vld [vmem:[%s4261_s3 + $0x1c8] sm:$0xff]   ;;  %vm3595_vm3 = vcmp.ne.s32.totalorder %v432_v15, 0  ;;  %vm3615_vm4 = vcmp.ne.s32.totalorder %v481_v25, 31  ;;  %vm3641_vm6 = vmpackc.low %vm3562_vm1, %vm3349_vm5  ;;  %vm3801_vm11 = vcmp.ne.s32.totalorder %v509_v27, 31  ;;  %v3818_v27 = vadd.s32 120, %v3409_v5  ;;  %s4120_s16 = scalar_lea.vmem %s4262_s4, %s3482_s22 }
  0x10   : > { %2807 = vmatpush3.bf16.msra.mxu0 %v3276_v12  ;;  %3047 = vmatpush3.bf16.msra.mxu1 %v3275_v11  ;;  %v2598_v40 = vld [vmem:[%s3507_s12] sm:$0xff]   ;;  %v2701_v41 = vld [vmem:[%s3507_s12 + $0x8] sm:$0xff]   ;;  %v2702_v50 = vld [vmem:[%s3507_s12 + $0x10] sm:$0xff]   ;;  %vm3672_vm7 = vcmp.ne.s32.totalorder %v516_v54, 0  ;;  %vm3251_vm13 = vcmp.ne.s32.totalorder %v460_v35, 0  ;;  %s4228_s19 = scalar_lea.vmem %s4263_s5, %s3482_s22  ;;  %s315_s27 = scalar_lea.vmem %s4265_s7, %s4293_s25 }
  0x11   : > { %2808 = vmatprep.subr.bf16.mxu0 %v3277_v14  ;;  %3048 = vmatprep.subr.bf16.mxu1 %v3278_v16  ;;  %v2599_v45 = vunpack.c.l.bf16 %v2598_v40  ;;  %v2600_v46 = vunpack.c.h.bf16 %v2598_v40  ;;  %v2603_v47 = vunpack.c.l.bf16 %v2701_v41  ;;  %v2604_v48 = vunpack.c.h.bf16 %v2701_v41  ;;  %v3533_v49 = vld [vmem:[%s4260_s2] ss:$0 sm:$0xff]  ;;  %v3297_v63 = vld [vmem:[%s4261_s3 + $0xc8] sm:$0xff]   ;;  %vm3710_vm8 = vmpackc.low %vm3349_vm5, %vm3595_vm3 }
  0x12   : > { %v3295_v51 = vld [vmem:[%s4261_s3 + $0x180] sm:$0xff]   ;;  %v2607_v52 = vunpack.c.l.bf16 %v2702_v50  ;;  %v2608_v53 = vunpack.c.h.bf16 %v2702_v50  ;;  %v3301_v8 = vld [vmem:[%s4261_s3 + $0x188] sm:$0xff]   ;;  %vm3725_vm9 = vmpackc.low %vm3615_vm4, %vm3349_vm5 }
  0x13   : > { %v356_v56 = vmul.f32 %v2599_v45, %v3521_v42  ;;  %v357_v57 = vmul.f32 %v2600_v46, %v3521_v42  ;;  %v358_v58 = vmul.f32 %v2603_v47, %v3521_v42  ;;  %v359_v59 = vmul.f32 %v2604_v48, %v3521_v42  ;;  %v2704_v15 = vld [vmem:[%s3507_s12 + $0x20] sm:$0xff]   ;;  %vm3784_vm10 = vmpackc.low %vm3349_vm5, %vm3672_vm7  ;;  %v3318_v23 = vld [vmem:[%s4261_s3 + $0x1e8] sm:$0xff]  }
  0x14   : > { %2809 = vmatpush3.bf16.msra.mxu0 %v3279_v17  ;;  %3049 = vmatpush3.bf16.msra.mxu1 %v3278_v16  ;;  %v360_v60 = vmul.f32 %v2607_v52, %v3521_v42  ;;  %v361_v62 = vmul.f32 %v2608_v53, %v3521_v42  ;;  %v3300_v17 = vld [vmem:[%s4261_s3 + $0xd0] sm:$0xff]   ;;  %vm3849_vm12 = vmpackc.low %vm3801_vm11, %vm3349_vm5 }
  0x15   : > { %2810 = vmatprep.subr.bf16.mxu0 %v3280_v18  ;;  %3050 = vmatprep.subr.bf16.mxu1 %v3281_v19  ;;  %v379_v0 = vadd.f32 %v3533_v49, %v356_v56  ;;  %v380_v1 = vadd.f32 %v3533_v49, %v357_v57  ;;  %v381_v2 = vadd.f32 %v3533_v49, %v358_v58  ;;  %v2703_v18 = vld [vmem:[%s3507_s12 + $0x18] sm:$0xff]   ;;  %vm3894_vm14 = vmpackc.low %vm3349_vm5, %vm3251_vm13  ;;  %v3333_v5 = vld [vmem:[%s4261_s3 + $0x170] sm:$0xff]  }
  0x16   : > { %v382_v6 = vadd.f32 %v3533_v49, %v359_v59  ;;  %v383_v7 = vadd.f32 %v3533_v49, %v360_v60  ;;  %v384_v9 = vadd.f32 %v3533_v49, %v361_v62  ;;  %v3303_v56 = vld [vmem:[%s4261_s3 + $0xd8] sm:$0xff]   ;;  %v2615_v59 = vunpack.c.l.bf16 %v2704_v15 }
  0x17   : > { %v3574_v10 = vmax.f32 %v379_v0, 0.0  ;;  %v3576_v11 = vmax.f32 %v380_v1, 0.0  ;;  %v3578_v12 = vmax.f32 %v381_v2, 0.0  ;;  %v2616_v0 = vunpack.c.h.bf16 %v2704_v15  ;;  %v3317_v1 = vld [vmem:[%s4261_s3 + $0x1a0] sm:$0xff]  }
  0x18   : > { %2811 = vmatpush3.bf16.msra.mxu0 %v3282_v20  ;;  %3051 = vmatpush3.bf16.msra.mxu1 %v3281_v19  ;;  %v3583_v14 = vmax.f32 %v382_v6, 0.0  ;;  %v3585_v16 = vmax.f32 %v383_v7, 0.0  ;;  %v3591_v19 = vmax.f32 %v384_v9, 0.0  ;;  %v364_v4 = vmul.f32 %v2615_v59, %v3521_v42  ;;  %v3306_v7 = vld [vmem:[%s4261_s3 + $0xe0] sm:$0xff]  }
  0x19   : > { %2812 = vmatprep.subr.bf16.mxu0 %v3283_v22  ;;  %3052 = vmatprep.subr.bf16.mxu1 %v3284_v24  ;;  %v701_v22 = vrot.slane %v3574_v10, 1  ;;  %v636_v53 = vrot.slane %v3574_v10, 7  ;;  %v637_v58 = vrot.slane %v3576_v11, 7  ;;  %v638_v43 = vrot.slane %v3578_v12, 7 }
  0x1a   : > { %v706_v25 = vrot.slane %v3591_v19, 1 }
  0x1b   : > { %v667_v9 = vsel %vm652_vm2, %v636_v53, %v637_v58 }
  0x1c   : > { %2813 = vmatpush3.bf16.msra.mxu0 %v3285_v26  ;;  %3053 = vmatpush3.bf16.msra.mxu1 %v3284_v24  ;;  %v702_v24 = vrot.slane %v3576_v11, 1  ;;  %v703_v26 = vrot.slane %v3578_v12, 1 }
  0x1d   : > { %2814 = vmatprep.subr.bf16.mxu0 %v3286_v28  ;;  %3054 = vmatprep.subr.bf16.mxu1 %v3287_v29  ;;  %v3302_v28 = vld [vmem:[%s4261_s3 + $0x118] sm:$0xff]  }
  0x1e   : > { %v731_v40 = vsel %vm717_vm0, %v702_v24, %v703_v26  ;;  %v732_v21 = vsel %vm717_vm0, %v701_v22, %v702_v24 }
  0x1f   : > { %v3632_v45 = vpack.c.bf16 %v731_v40, %v732_v21 }
  0x20   : > { %2815 = vmatpush3.bf16.msra.mxu0 %v3288_v30  ;;  %3055 = vmatpush3.bf16.msra.mxu1 %v3287_v29  ;;  %v3607_v29 = vpack.c.bf16 %v3576_v11, %v3574_v10  ;;  %v3610_v30 = vld [vmem:[%s3507_s12 + $0x38] sm:$0xff]  }
  0x21   : > { %2816 = vmatprep.subr.bf16.mxu0 %v3289_v32  ;;  %3056 = vmatprep.subr.bf16.mxu1 %v3290_v34  ;;  %v2628_v41 = vunpack.c.h.bf16 %v3610_v30  ;;  %v3313_v32 = vld [vmem:[%s4261_s3 + $0x198] sm:$0xff]  }
  0x23   : > { %v371_v52 = vmul.f32 %v2628_v41, %v3521_v42  ;;  %v639_v41 = vrot.slane %v3583_v14, 7 }
  0x24   : > { %2817 = vmatpush3.bf16.msra.mxu0 %v3291_v36  ;;  %3057 = vmatpush3.bf16.msra.mxu1 %v3290_v34  ;;  %v704_v34 = vrot.slane %v3583_v14, 1  ;;  %v705_v36 = vrot.slane %v3585_v16, 1 }
  0x25   : > { %2882 = vmatprep.subr.bf16.mxu1 %v3292_v38  ;;  %2962 = vmatprep.subr.bf16.mxu0 %v3293_v39  ;;  %v2611_v38 = vunpack.c.l.bf16 %v2703_v18  ;;  %v2612_v39 = vunpack.c.h.bf16 %v2703_v18  ;;  %v394_v62 = vadd.f32 %v3533_v49, %v371_v52  ;;  %v365_v18 = vmul.f32 %v2616_v0, %v3521_v42  ;;  %v3310_v0 = vld [vmem:[%s4261_s3 + $0x130] sm:$0xff]  }
  0x26   : > { %v729_v46 = vsel %vm717_vm0, %v704_v34, %v705_v36  ;;  %v730_v47 = vsel %vm717_vm0, %v703_v26, %v704_v34  ;;  %v387_v26 = vadd.f32 %v3533_v49, %v364_v4  ;;  %v3701_v34 = vld [vmem:[%s3507_s12 + $0x30] sm:$0xff]   ;;  %v3316_v4 = vld [vmem:[%s4261_s3 + $0x1e0] sm:$0xff]  }
  0x27   : > { %1091 = vmatmul.mubr.bf16.vlgmr.msra.gmra.mrb[0].mxu0 %v3348_v3  ;;  %3059 = vmatmul.mubr.bf16.vlgmr.msra.gmra.mrb[0].mxu1 %v3348_v3  ;;  %v362_v50 = vmul.f32 %v2611_v38, %v3521_v42  ;;  %v363_v60 = vmul.f32 %v2612_v39, %v3521_v42  ;;  %v3686_v54 = vmax.f32 %v394_v62, 0.0  ;;  %v388_v21 = vadd.f32 %v3533_v49, %v365_v18 }
  0x28   : > { %2883 = vmatpush3.bf16.msra.mxu1 %v3294_v44  ;;  %2963 = vmatpush3.bf16.msra.mxu0 %v3295_v51  ;;  %v3305_v44 = vld [vmem:[%s4261_s3 + $0x1d0] sm:$0xff]   ;;  %v3647_v51 = vpack.c.bf16 %v729_v46, %v730_v47  ;;  %v3719_v46 = vmax.f32 %v387_v26, 0.0  ;;  %v2623_v62 = vunpack.c.l.bf16 %v3701_v34  ;;  %v3314_v26 = vld [vmem:[%s4261_s3 + $0x138] sm:$0xff]  }
  0x29   : > { %2884 = vmatprep.subr.bf16.mxu1 %v3296_v55  ;;  %1098 = vmatprep.mubr.bf16.mxu0 %v3348_v3  ;;  %v3307_v55 = vld [vmem:[%s4261_s3 + $0x190] sm:$0xff]   ;;  %v385_v57 = vadd.f32 %v3533_v49, %v362_v50  ;;  %v386_v6 = vadd.f32 %v3533_v49, %v363_v60  ;;  %v651_v38 = vrot.slane %v3686_v54, 7  ;;  %v3731_v50 = vpack.c.bf16 %v3583_v14, %v3578_v12 }
  0x2a   : > { %2964 = vmatprep.subr.bf16.mxu0 %v3299_v61  ;;  %3062 = vmatprep.mubr.bf16.mxu1 %v3632_v45  ;;  %v728_v61 = vsel %vm717_vm0, %v705_v36, %v706_v25  ;;  %v3311_v36 = vld [vmem:[%s4261_s3 + $0x1d8] sm:$0xff]   ;;  %v709_v12 = vrot.slane %v3719_v46, 1  ;;  %v716_v35 = vrot.slane %v3686_v54, 1 }
  0x2b   : > { %v3677_v2 = vmax.f32 %v385_v57, 0.0 }
  0x2c   : > { %2885 = vmatpush3.bf16.msra.mxu1 %v3297_v63  ;;  %2965 = vmatpush3.bf16.msra.mxu0 %v3301_v8  ;;  %v3304_v63 = vld [vmem:[%s4261_s3 + $0x120] sm:$0xff]   ;;  %v2705_v8 = vld [vmem:[%s3507_s12 + $0x28] sm:$0xff]  }
  0x2d   : > { %2886 = vmatprep.subr.bf16.mxu1 %v3298_v13  ;;  %2966 = vmatprep.subr.bf16.mxu0 %v3305_v44  ;;  %v3308_v13 = vld [vmem:[%s4261_s3 + $0x128] sm:$0xff]   ;;  %v707_v24 = vrot.slane %v3677_v2, 1  ;;  %v2620_v15 = vunpack.c.h.bf16 %v2705_v8 }
  0x2f   : > { %1099 = vmatmul.mubr.bf16.gmra.mrb[4].mxu0 %v3348_v3  ;;  %3063 = vmatmul.mubr.msk.bf16.gmra.mrb[4].mxu1 %vm3641_vm6, %v3647_v51  ;;  %v727_v44 = vsel %vm717_vm0, %v706_v25, %v707_v24  ;;  %v668_v25 = vsel %vm652_vm2, %v651_v38, %v636_v53  ;;  %v3309_v53 = vld [vmem:[%s4261_s3 + $0xe8] sm:$0xff]  }
  0x30   : > { %2887 = vmatpush3.bf16.msra.mxu1 %v3300_v17  ;;  %1106 = vmatprep.mubr.bf16.mxu0 %v3607_v29  ;;  %v2619_v17 = vunpack.c.l.bf16 %v2705_v8  ;;  %v3733_v52 = vpack.c.bf16 %v727_v44, %v728_v61  ;;  %v3745_v57 = vpack.c.bf16 %v667_v9, %v668_v25  ;;  %v666_v8 = vsel %vm652_vm2, %v637_v58, %v638_v43  ;;  %v3312_v9 = vld [vmem:[%s4261_s3 + $0xf0] sm:$0xff]  }
  0x31   : > { %2888 = vmatprep.subr.bf16.mxu1 %v3302_v28  ;;  %2967 = vmatpush3.bf16.msra.mxu0 %v3307_v55  ;;  %v3698_v28 = vmax.f32 %v386_v6, 0.0 }
  0x32   : > { %v366_v40 = vmul.f32 %v2619_v17, %v3521_v42  ;;  %2968 = vmatprep.subr.bf16.mxu0 %v3311_v36  ;;  %3066 = vmatprep.mubr.bf16.mxu1 %v3733_v52 }
  0x33   : > { %v708_v47 = vrot.slane %v3698_v28, 1 }
  0x34   : > { %2889 = vmatpush3.bf16.msra.mxu1 %v3303_v56  ;;  %v389_v55 = vadd.f32 %v3533_v49, %v366_v40  ;;  %v3740_v56 = vmax.f32 %v388_v21, 0.0 }
  0x35   : > { %2890 = vmatprep.subr.bf16.mxu1 %v3304_v63  ;;  %v726_v59 = vsel %vm717_vm0, %v707_v24, %v708_v47  ;;  %v367_v63 = vmul.f32 %v2620_v15, %v3521_v42  ;;  %v725_v6 = vsel %vm717_vm0, %v708_v47, %v709_v12  ;;  %2969 = vmatpush3.bf16.msra.mxu0 %v3313_v32  ;;  %v3315_v47 = vld [vmem:[%s4261_s3 + $0xf8] sm:$0xff]   ;;  %v640_v32 = vrot.slane %v3585_v16, 7 }
  0x36   : > { %v3754_v60 = vmax.f32 %v389_v55, 0.0  ;;  %v710_v61 = vrot.slane %v3740_v56, 1  ;;  %v3788_v17 = vpack.c.bf16 %v725_v6, %v726_v59  ;;  %2970 = vmatprep.subr.bf16.mxu0 %v3316_v4  ;;  %v3833_v55 = vpack.c.bf16 %v3591_v19, %v3585_v16  ;;  %v3319_v59 = vld [vmem:[%s4261_s3 + $0x1a8] sm:$0xff]  }
  0x37   : > { %2725 = vmatmul.mubr.msk.bf16.gmra.mrb[8].mxu0 %vm3710_vm8, %v3745_v57  ;;  %v390_v18 = vadd.f32 %v3533_v49, %v367_v63  ;;  %v537_v63 = vand.u32 31, %v3818_v27  ;;  %v2624_v4 = vunpack.c.h.bf16 %v3701_v34  ;;  %v2627_v6 = vunpack.c.l.bf16 %v3610_v30  ;;  %v3322_v30 = vld [vmem:[%s4261_s3 + $0x1b0] sm:$0xff]  }
  0x38   : > { %2891 = vmatpush3.bf16.msra.mxu1 %v3306_v7  ;;  %v665_v7 = vsel %vm652_vm2, %v638_v43, %v639_v41  ;;  %1114 = vmatprep.mubr.bf16.mxu0 %v3731_v50  ;;  %v711_v11 = vrot.slane %v3754_v60, 1  ;;  %v724_v58 = vsel %vm717_vm0, %v709_v12, %v710_v61  ;;  %v368_v43 = vmul.f32 %v2623_v62, %v3521_v42 }
  0x39   : > { %2892 = vmatprep.subr.bf16.mxu1 %v3308_v13  ;;  %3067 = vmatmul.mubr.msk.bf16.gmra.mrb[8].mxu1 %vm3725_vm9, %v3788_v17  ;;  %v3822_v21 = vpack.c.bf16 %v665_v7, %v666_v8  ;;  %v3824_v44 = vmax.f32 %v390_v18, 0.0  ;;  %v641_v12 = vrot.slane %v3591_v19, 7  ;;  %v3856_v19 = vld [vmem:[%s4261_s3 + $0x140] sm:$0xff]   ;;  %v369_v14 = vmul.f32 %v2624_v4, %v3521_v42 }
  0x3a   : > { %v723_v15 = vsel %vm717_vm0, %v710_v61, %v711_v11  ;;  %v391_v36 = vadd.f32 %v3533_v49, %v368_v43  ;;  %2971 = vmatpush3.bf16.msra.mxu0 %v3317_v1  ;;  %v3321_v61 = vld [vmem:[%s4261_s3 + $0x1f0] sm:$0xff]   ;;  %v370_v31 = vmul.f32 %v2627_v6, %v3521_v42  ;;  %v643_v1 = vrot.slane %v3698_v28, 7 }
  0x3b   : > { %v3820_v40 = vpack.c.bf16 %v723_v15, %v724_v58  ;;  %2972 = vmatprep.subr.bf16.mxu0 %v3318_v23  ;;  %v663_v8 = vsel %vm652_vm2, %v640_v32, %v641_v12  ;;  %v392_v18 = vadd.f32 %v3533_v49, %v369_v14  ;;  %v3906_v42 = vpack.c.bf16 %v3698_v28, %v3677_v2  ;;  %v3325_v15 = vld [vmem:[%s4261_s3 + $0x1b8] sm:$0xff]  }
  0x3c   : > { %2893 = vmatpush3.bf16.msra.mxu1 %v3309_v53  ;;  %v3829_v25 = vmax.f32 %v391_v36, 0.0  ;;  %v712_v53 = vrot.slane %v3824_v44, 1  ;;  %v393_v36 = vadd.f32 %v3533_v49, %v370_v31  ;;  %v733_v23 = vsel %vm717_vm0, %v716_v35, %v701_v22  ;;  %v3334_v58 = vld [vmem:[%s4261_s3 + $0x218] sm:$0xff]  }
  0x3d   : > { %2894 = vmatprep.subr.bf16.mxu1 %v3310_v0  ;;  %3070 = vmatprep.mubr.bf16.mxu1 %v3820_v40  ;;  %vm3257_vm15 = vcmp.ne.s32.totalorder %v537_v63, 31  ;;  %v783_v31 = vpack.c.bf16 %v3824_v44, %v3754_v60  ;;  %v646_v33 = vrot.slane %v3754_v60, 7  ;;  %v3332_v60 = vld [vmem:[%s4261_s3 + $0x168] sm:$0xff]  }
  0x3e   : > { %v713_v62 = vrot.slane %v3829_v25, 1  ;;  %v722_v0 = vsel %vm717_vm0, %v711_v11, %v712_v53  ;;  %2973 = vmatpush3.bf16.msra.mxu0 %v3319_v59  ;;  %v3324_v11 = vld [vmem:[%s4261_s3 + $0x1f8] sm:$0xff]   ;;  %v648_v24 = vrot.slane %v3829_v25, 7  ;;  %v409_v28 = vmax.f32 %v393_v36, 0.0  ;;  %vm3984_vm1 = vmpackc.low %vm3257_vm15, %vm3349_vm5 }
  0x3f   : > { %1115 = vmatmul.mubr.bf16.gmra.mrb[12].mxu0 %v3822_v21  ;;  %2974 = vmatprep.subr.bf16.mxu0 %v3321_v61  ;;  %v3940_v59 = vpack.c.bf16 %v3740_v56, %v3719_v46 }
  0x40   : > { %2895 = vmatpush3.bf16.msra.mxu1 %v3312_v9  ;;  %v721_v7 = vsel %vm717_vm0, %v712_v53, %v713_v62  ;;  %1122 = vmatprep.mubr.bf16.mxu0 %v3833_v55  ;;  %v664_v9 = vsel %vm652_vm2, %v639_v41, %v640_v32  ;;  %v642_v41 = vrot.slane %v3677_v2, 7  ;;  %v3922_v2 = vmax.f32 %v392_v18, 0.0  ;;  %v3323_v53 = vld [vmem:[%s4261_s3 + $0x148] sm:$0xff]  }
  0x41   : > { %2896 = vmatprep.subr.bf16.mxu1 %v3314_v26  ;;  %v3880_v34 = vpack.c.bf16 %v721_v7, %v722_v0  ;;  %v3898_v43 = vpack.c.bf16 %v663_v8, %v664_v9  ;;  %v647_v26 = vrot.slane %v3824_v44, 7  ;;  %v650_v32 = vrot.slane %v409_v28, 7  ;;  %v3329_v18 = vld [vmem:[%s4261_s3 + $0x208] sm:$0xff]  }
  0x42   : > { %2975 = vmatpush3.bf16.msra.mxu0 %v3322_v30  ;;  %v649_v49 = vrot.slane %v3922_v2, 7  ;;  %v661_v22 = vsel %vm652_vm2, %v642_v41, %v643_v1  ;;  %v662_v27 = vsel %vm652_vm2, %v641_v12, %v642_v41  ;;  %v714_v12 = vrot.slane %v3922_v2, 1 }
  0x43   : > { %3071 = vmatmul.mubr.msk.bf16.gmra.mrb[12].mxu1 %vm3849_vm12, %v3880_v34  ;;  %2976 = vmatprep.subr.bf16.mxu0 %v3324_v11  ;;  %v656_v10 = vsel %vm652_vm2, %v647_v26, %v648_v24  ;;  %v653_v4 = vsel %vm652_vm2, %v650_v32, %v651_v38  ;;  %v715_v7 = vrot.slane %v409_v28, 1  ;;  %v3960_v8 = vpack.c.bf16 %v661_v22, %v662_v27  ;;  %v3328_v11 = vld [vmem:[%s4261_s3 + $0x158] sm:$0xff]  }
  0x44   : > { %2897 = vmatpush3.bf16.msra.mxu1 %v3315_v47  ;;  %1517 = vmatprep.mubr.bf16.mxu1 %v3607_v29  ;;  %v3920_v29 = vld [vmem:[%s4261_s3 + $0x200] sm:$0xff]   ;;  %v3936_v47 = vpack.c.bf16 %v3686_v54, %v409_v28  ;;  %v655_v61 = vsel %vm652_vm2, %v648_v24, %v649_v49  ;;  %v654_v6 = vsel %vm652_vm2, %v649_v49, %v650_v32  ;;  %v644_v38 = vrot.slane %v3719_v46, 7 }
  0x45   : > { %3074 = vmatprep.subr.bf16.mxu1 %v3856_v19  ;;  %v3949_v0 = vpack.c.bf16 %v655_v61, %v656_v10  ;;  %v3962_v9 = vpack.c.bf16 %v653_v4, %v654_v6  ;;  %v720_v54 = vsel %vm717_vm0, %v713_v62, %v714_v12  ;;  %v645_v30 = vrot.slane %v3740_v56, 7  ;;  %v3326_v62 = vld [vmem:[%s4261_s3 + $0x150] sm:$0xff]   ;;  %v3336_v24 = vld [vmem:[%s4261_s3 + $0x220] sm:$0xff]  }
  0x46   : > { %2977 = vmatpush3.bf16.msra.mxu0 %v3325_v15  ;;  %v719_v39 = vsel %vm717_vm0, %v714_v12, %v715_v7 }
  0x47   : > { %2729 = vmatmul.mubr.msk.bf16.gmra.mrb[16].mxu0 %vm3894_vm14, %v3898_v43  ;;  %3106 = vmatprep.subr.bf16.mxu0 %v3920_v29  ;;  %v3979_v63 = vpack.c.bf16 %v719_v39, %v720_v54  ;;  %v659_v56 = vsel %vm652_vm2, %v644_v38, %v645_v30 }
  0x48   : > { %1130 = vmatprep.mubr.bf16.mxu0 %v3906_v42 }
  0x4b   : > { %2749 = vmatmul.mubr.msk.bf16.vlgmr.msra.gmra.mrb[16].mxu1 %vm3710_vm8, %v3745_v57  ;;  %v718_v57 = vsel %vm717_vm0, %v715_v7, %v716_v35  ;;  %vm3252_vm0 = vcmp.ne.s32.totalorder %v488_v37, 0  ;;  %v3330_v37 = vld [vmem:[%s4261_s3 + $0x160] sm:$0xff]   ;;  %v658_v35 = vsel %vm652_vm2, %v645_v30, %v646_v33 }
  0x4c   : > { %1525 = vmatprep.mubr.bf16.mxu1 %v3731_v50  ;;  %3075 = vmatpush3.bf16.msra.mxu1 %v3856_v19  ;;  %v3981_v50 = vpack.c.bf16 %v733_v23, %v718_v57  ;;  %v660_v19 = vsel %vm652_vm2, %v643_v1, %v644_v38  ;;  %vm4002_vm3 = vmpackc.low %vm3349_vm5, %vm3252_vm0  ;;  %v3335_v1 = vld [vmem:[%s4261_s3 + $0x178] sm:$0xff]  }
  0x4d   : > { %3076 = vmatprep.subr.bf16.mxu1 %v3323_v53  ;;  %v2732_v14 = vpack.c.bf16 %v659_v56, %v660_v19 }
  0x4f   : > { %1131 = vmatmul.mubr.bf16.gmra.mrb[20].mxu0 %v3960_v8 }
  0x50   : > { %1138 = vmatprep.mubr.bf16.mxu0 %v3940_v59  ;;  %3077 = vmatpush3.bf16.msra.mxu1 %v3323_v53  ;;  %v2630_v53 = vld [vmem:[%s4120_s16] sm:$0xff]  }
  0x51   : > { %3078 = vmatprep.subr.bf16.mxu1 %v3326_v62 }
  0x53   : > { %1526 = vmatmul.mubr.bf16.gmra.mrb[20].mxu1 %v3822_v21  ;;  %v657_v21 = vsel %vm652_vm2, %v646_v33, %v647_v26  ;;  %v3339_v26 = vld [vmem:[%s4261_s3 + $0x238] sm:$0xff]  }
  0x54   : > { %1533 = vmatprep.mubr.bf16.mxu1 %v3833_v55  ;;  %3079 = vmatpush3.bf16.msra.mxu1 %v3326_v62  ;;  %v767_v44 = vpack.c.bf16 %v657_v21, %v658_v35  ;;  %v2708_v62 = vld [vmem:[%s4120_s16 + $0x8] sm:$0xff]  }
  0x55   : > { %3080 = vmatprep.subr.bf16.mxu1 %v3328_v11  ;;  %v2636_v21 = vunpack.c.h.bf16 %v2708_v62 }
  0x57   : > { %2733 = vmatmul.mubr.msk.bf16.gmra.mrb[24].mxu0 %vm4002_vm3, %v2732_v14 }
  0x58   : > { %1146 = vmatprep.mubr.bf16.mxu0 %v783_v31  ;;  %3081 = vmatpush3.bf16.msra.mxu1 %v3328_v11 }
  0x59   : > { %3082 = vmatprep.subr.bf16.mxu1 %v3330_v37 }
  0x5b   : > { %2753 = vmatmul.mubr.msk.bf16.gmra.mrb[24].mxu1 %vm3894_vm14, %v3898_v43 }
  0x5c   : > { %1541 = vmatprep.mubr.bf16.mxu1 %v3906_v42  ;;  %3083 = vmatpush3.bf16.msra.mxu1 %v3330_v37 }
  0x5d   : > { %3084 = vmatprep.subr.bf16.mxu1 %v3332_v60 }
  0x5f   : > { %1147 = vmatmul.mubr.bf16.gmra.mrb[28].mxu0 %v767_v44 }
  0x60   : > { %1944 = vmatprep.mubr.bf16.mxu0 %v3833_v55  ;;  %3085 = vmatpush3.bf16.msra.mxu1 %v3332_v60  ;;  %v3331_v55 = vld [vmem:[%s4261_s3 + $0x210] sm:$0xff]  }
  0x61   : > { %3086 = vmatprep.subr.bf16.mxu1 %v3333_v5 }
  0x63   : > { %1542 = vmatmul.mubr.bf16.gmra.mrb[28].mxu1 %v3960_v8 }
  0x64   : > { %1549 = vmatprep.mubr.bf16.mxu1 %v3940_v59  ;;  %3087 = vmatpush3.bf16.msra.mxu1 %v3333_v5 }
  0x65   : > { %3088 = vmatprep.subr.bf16.mxu1 %v3335_v1 }
  0x67   : > { %2781 = vmatmul.mubr.msk.bf16.vlgmr.msra.gmra.mrb[32].mxu0 %vm3894_vm14, %v3898_v43  ;;  %v784_v43 = vpack.c.bf16 %v3922_v2, %v3829_v25  ;;  %v3338_v25 = vld [vmem:[%s4261_s3 + $0x230] sm:$0xff]  }
  0x68   : > { %3107 = vmatpush3.bf16.msra.mxu0 %v3920_v29  ;;  %1952 = vmatprep.mubr.bf16.mxu0 %v3906_v42  ;;  %v3337_v42 = vld [vmem:[%s4261_s3 + $0x228] sm:$0xff]  }
  0x69   : > { %3108 = vmatprep.subr.bf16.mxu0 %v3329_v18  ;;  %3089 = vmatpush3.bf16.msra.mxu1 %v3335_v1 }
  0x6a   : > { %3138 = vmatprep.subr.bf16.mxu1 %v3920_v29 }
  0x6b   : > { %2757 = vmatmul.mubr.msk.bf16.gmra.mrb[32].mxu1 %vm4002_vm3, %v2732_v14 }
  0x6c   : > { %1557 = vmatprep.mubr.bf16.mxu1 %v783_v31  ;;  %3109 = vmatpush3.bf16.msra.mxu0 %v3329_v18 }
  0x6d   : > { %3110 = vmatprep.subr.bf16.mxu0 %v3331_v55 }
  0x6f   : > { %1953 = vmatmul.mubr.bf16.gmra.mrb[36].mxu0 %v3960_v8  ;;  %v2632_v8 = vunpack.c.h.bf16 %v2630_v53 }
  0x70   : > { %1960 = vmatprep.mubr.bf16.mxu0 %v3940_v59  ;;  %3111 = vmatpush3.bf16.msra.mxu0 %v3331_v55 }
  0x71   : > { %3112 = vmatprep.subr.bf16.mxu0 %v3334_v58 }
  0x73   : > { %1558 = vmatmul.mubr.bf16.gmra.mrb[36].mxu1 %v767_v44 }
  0x74   : > { %1565 = vmatprep.mubr.bf16.mxu1 %v784_v43  ;;  %3113 = vmatpush3.bf16.msra.mxu0 %v3334_v58 }
  0x75   : > { %3114 = vmatprep.subr.bf16.mxu0 %v3336_v24 }
  0x77   : > { %2785 = vmatmul.mubr.msk.bf16.gmra.mrb[40].mxu0 %vm4002_vm3, %v2732_v14  ;;  %v2635_v14 = vunpack.c.l.bf16 %v2708_v62 }
  0x78   : > { %1968 = vmatprep.mubr.bf16.mxu0 %v783_v31  ;;  %3115 = vmatpush3.bf16.msra.mxu0 %v3336_v24 }
  0x79   : > { %3116 = vmatprep.subr.bf16.mxu0 %v3337_v42 }
  0x7b   : > { %2761 = vmatmul.mubr.msk.bf16.gmra.mrb[40].mxu1 %vm3784_vm10, %v3949_v0 }
  0x7c   : > { %1573 = vmatprep.mubr.bf16.mxu1 %v3936_v47  ;;  %3117 = vmatpush3.bf16.msra.mxu0 %v3337_v42 }
  0x7d   : > { %3118 = vmatprep.subr.bf16.mxu0 %v3338_v25 }
  0x7f   : > { %1969 = vmatmul.mubr.bf16.gmra.mrb[44].mxu0 %v767_v44 }
  0x80   : > { %1976 = vmatprep.mubr.bf16.mxu0 %v784_v43  ;;  %3119 = vmatpush3.bf16.msra.mxu0 %v3338_v25 }
  0x81   : > { %3120 = vmatprep.subr.bf16.mxu0 %v3339_v26 }
  0x83   : > { %1574 = vmatmul.mubr.bf16.gmra.mrb[44].mxu1 %v3962_v9 }
  0x84   : > { %3090 = vmatprep.mubr.bf16.mxu1 %v3632_v45  ;;  %3121 = vmatpush3.bf16.msra.mxu0 %v3339_v26 }
  0x87   : > { %2789 = vmatmul.mubr.msk.bf16.gmra.mrb[48].mxu0 %vm3784_vm10, %v3949_v0  ;;  %v2631_v0 = vunpack.c.l.bf16 %v2630_v53 }
  0x88   : > { %1984 = vmatprep.mubr.bf16.mxu0 %v3936_v47 }
  0x8b   : > { %3091 = vmatmul.mubr.msk.bf16.vlgmr.msra.gmra.mrb[0].mxu1 %vm3641_vm6, %v3647_v51 }
  0x8c   : > { %3146 = vmatpush3.bf16.msra.mxu1 %v3920_v29  ;;  %3094 = vmatprep.mubr.bf16.mxu1 %v3733_v52 }
  0x8d   : > { %3139 = vmatprep.subr.bf16.mxu1 %v3329_v18 }
  0x8f   : > { %1985 = vmatmul.mubr.bf16.gmra.mrb[52].mxu0 %v3962_v9 }
  0x90   : > { %3147 = vmatpush3.bf16.msra.mxu1 %v3329_v18  ;;  %1992 = vmatprep.mubr.bf16.mxu0 %v3348_v3 }
  0x91   : > { %3140 = vmatprep.subr.bf16.mxu1 %v3331_v55 }
  0x93   : > { %3095 = vmatmul.mubr.msk.bf16.gmra.mrb[4].mxu1 %vm3725_vm9, %v3788_v17 }
  0x94   : > { %3148 = vmatpush3.bf16.msra.mxu1 %v3331_v55  ;;  %3098 = vmatprep.mubr.bf16.mxu1 %v3820_v40  ;;  %v2709_v55 = vld [vmem:[%s4120_s16 + $0x10] sm:$0xff]  }
  0x95   : > { %3141 = vmatprep.subr.bf16.mxu1 %v3334_v58 }
  0x97   : > { %1993 = vmatmul.mubr.bf16.gmra.mrb[56].mxu0 %v3348_v3 }
  0x98   : > { %3149 = vmatpush3.bf16.msra.mxu1 %v3334_v58  ;;  %2000 = vmatprep.mubr.bf16.mxu0 %v3348_v3 }
  0x99   : > { %3142 = vmatprep.subr.bf16.mxu1 %v3336_v24 }
  0x9b   : > { %3099 = vmatmul.mubr.msk.bf16.gmra.mrb[8].mxu1 %vm3849_vm12, %v3880_v34 }
  0x9c   : > { %3150 = vmatpush3.bf16.msra.mxu1 %v3336_v24  ;;  %3102 = vmatprep.mubr.bf16.mxu1 %v3979_v63 }
  0x9d   : > { %3143 = vmatprep.subr.bf16.mxu1 %v3337_v42 }
  0x9f   : > { %2001 = vmatmul.mubr.bf16.gmra.mrb[60].mxu0 %v3348_v3 }
  0xa0   : > { %3151 = vmatpush3.bf16.msra.mxu1 %v3337_v42  ;;  %3122 = vmatprep.mubr.bf16.mxu0 %v3733_v52 }
  0xa1   : > { %3144 = vmatprep.subr.bf16.mxu1 %v3338_v25 }
  0xa3   : > { %3103 = vmatmul.mubr.msk.bf16.gmra.mrb[12].mxu1 %vm3984_vm1, %v3981_v50 }
  0xa4   : > { %3152 = vmatpush3.bf16.msra.mxu1 %v3338_v25  ;;  %3130 = vmatprep.mubr.bf16.mxu1 %v3979_v63 }
  0xa5   : > { %3145 = vmatprep.subr.bf16.mxu1 %v3339_v26 }
  0xa7   : > { %3123 = vmatmul.mubr.msk.bf16.vlgmr.msra.gmra.mrb[64].mxu0 %vm3725_vm9, %v3788_v17 }
  0xa8   : > { %3153 = vmatpush3.bf16.msra.mxu1 %v3339_v26  ;;  %3126 = vmatprep.mubr.bf16.mxu0 %v3820_v40 }
  0xab   : > { %3131 = vmatmul.mubr.msk.bf16.vlgmr.msra.gmra.mrb[8].mxu1 %vm3984_vm1, %v3981_v50 }
  0xac   : > { %3134 = vmatprep.mubr.bf16.mxu1 %v3348_v3 }
  0xaf   : > { %3127 = vmatmul.mubr.msk.bf16.gmra.mrb[68].mxu0 %vm3849_vm12, %v3880_v34 }
  0xb3   : > { %3135 = vmatmul.mubr.bf16.gmra.mrb[12].mxu1 %v3348_v3 }
  0xfa   : > { %v2818_v45 = vpop.f32.mrb[0].mxu0 }
  0xfb   : > { %v2819_v48 = vpop.f32.mrb[1].mxu0 }
  0xfc   : > { %v2820_v51 = vadd.f32 %v2819_v48, %v2818_v45  ;;  %v2821_v20 = vpop.f32.mrb[2].mxu0  ;;  %v2639_v45 = vunpack.c.l.bf16 %v2709_v55 }
  0xfd   : > { %v2822_v52 = vpop.f32.mrb[3].mxu0 }
  0xfe   : > { %v2823_v13 = vadd.f32 %v2822_v52, %v2821_v20  ;;  %v3159_v30 = vadd.f32 %v2820_v51, %v2631_v0 }
 0x100   : > { %v3169_v50 = vadd.f32 %v2823_v13, %v2632_v8  ;;  %v2640_v13 = vunpack.c.h.bf16 %v2709_v55 }
 0x102   : > { %v2824_v17 = vpop.f32.mrb[4].mxu0 }
 0x103   : > { %v2825_v40 = vpop.f32.mrb[5].mxu0 }
 0x104   : > { %v2826_v15 = vadd.f32 %v2825_v40, %v2824_v17  ;;  %v2827_v36 = vpop.f32.mrb[6].mxu0 }
 0x105   : > { %v2828_v23 = vpop.f32.mrb[7].mxu0 }
 0x106   : > { %v2829_v29 = vadd.f32 %v2828_v23, %v2827_v36  ;;  %v3154_v5 = vadd.f32 %v2826_v15, %v2635_v14 }
 0x108   : > { %v3164_v43 = vadd.f32 %v2829_v29, %v2636_v21 }
 0x10a   : > { %v2830_v2 = vpop.f32.mrb[8].mxu0 }
 0x10b   : > { %v2831_v28 = vpop.f32.mrb[9].mxu0 }
 0x10c   : > { %v2832_v49 = vadd.f32 %v2831_v28, %v2830_v2  ;;  %v2833_v16 = vpop.f32.mrb[10].mxu0  ;;  %v2710_v2 = vld [vmem:[%s4120_s16 + $0x18] sm:$0xff]  }
 0x10d   : > { %v2834_v34 = vpop.f32.mrb[11].mxu0 }
 0x10e   : > { %v2835_v10 = vadd.f32 %v2834_v34, %v2833_v16  ;;  %v3179_v36 = vadd.f32 %v2832_v49, %v2639_v45 }
 0x110   : > { %v3189_v16 = vadd.f32 %v2835_v10, %v2640_v13 }
 0x112   : > { %v2836_v3 = vpop.f32.mrb[12].mxu0 }
 0x113   : > { %v2837_v22 = vpop.f32.mrb[13].mxu0 }
 0x114   : > { %v4114_v27 = vadd.f32 %v2837_v22, %v2836_v3  ;;  %v2839_v47 = vpop.f32.mrb[14].mxu0 }
 0x115   : > { %v2840_v32 = vpop.f32.mrb[15].mxu0 }
 0x116   : > { %v4122_v59 = vadd.f32 %v2840_v32, %v2839_v47  ;;  %v2643_v32 = vunpack.c.l.bf16 %v2710_v2 }
 0x118   : > { %v3174_v10 = vadd.f32 %v4114_v27, %v2643_v32 }
 0x11a   : > { %v2842_v61 = vpop.f32.mrb[16].mxu0 }
 0x11b   : > { %v2843_v12 = vpop.f32.mrb[17].mxu0 }
 0x11c   : > { %v4125_v4 = vadd.f32 %v2843_v12, %v2842_v61  ;;  %v2845_v6 = vpop.f32.mrb[18].mxu0 }
 0x11d   : > { %v2846_v7 = vpop.f32.mrb[19].mxu0 }
 0x11e   : > { %v2898_v9 = vpop.f32.mrb[16].mxu1  ;;  %v4127_v54 = vadd.f32 %v2846_v7, %v2845_v6  ;;  %v2644_v6 = vunpack.c.h.bf16 %v2710_v2 }
 0x11f   : > { %v2899_v38 = vpop.f32.mrb[17].mxu1 }
 0x120   : > { %v2900_v39 = vadd.f32 %v2899_v38, %v2898_v9  ;;  %v2901_v57 = vpop.f32.mrb[18].mxu1 }
 0x121   : > { %v2902_v63 = vpop.f32.mrb[19].mxu1 }
 0x122   : > { %v2903_v46 = vadd.f32 %v2902_v63, %v2901_v57  ;;  %v2848_v56 = vpop.f32.mrb[20].mxu0  ;;  %v4130_v19 = vadd.f32 %v3159_v30, %v2900_v39  ;;  %v2711_v30 = vld [vmem:[%s4120_s16 + $0x20] sm:$0xff]   ;;  %v3184_v57 = vadd.f32 %v4122_v59, %v2644_v6 }
 0x123   : > { %v2849_v11 = vpop.f32.mrb[21].mxu0  ;;  %v2648_v27 = vunpack.c.h.bf16 %v2711_v30 }
 0x124   : > { %v4132_v41 = vadd.f32 %v2849_v11, %v2848_v56  ;;  %v2851_v31 = vpop.f32.mrb[22].mxu0  ;;  %v4134_v33 = vadd.f32 %v3169_v50, %v2903_v46  ;;  %v2647_v56 = vunpack.c.l.bf16 %v2711_v30 }
 0x125   : > { %v2852_v37 = vpop.f32.mrb[23].mxu0 }
 0x126   : > { %v2904_v35 = vpop.f32.mrb[20].mxu1  ;;  %v4136_v60 = vadd.f32 %v2852_v37, %v2851_v31  ;;  %v3198_v59 = vadd.f32 %v4125_v4, %v2647_v56 }
 0x127   : > { %v2905_v44 = vpop.f32.mrb[21].mxu1 }
 0x128   : > { %v2906_v1 = vadd.f32 %v2905_v44, %v2904_v35  ;;  %v2907_v18 = vpop.f32.mrb[22].mxu1 }
 0x129   : > { %v2908_v58 = vpop.f32.mrb[23].mxu1 }
 0x12a   : > { %v2909_v24 = vadd.f32 %v2908_v58, %v2907_v18  ;;  %v2854_v42 = vpop.f32.mrb[24].mxu0  ;;  %v4139_v25 = vadd.f32 %v3154_v5, %v2906_v1  ;;  %v2712_v18 = vld [vmem:[%s4120_s16 + $0x28] sm:$0xff]   ;;  %v3206_v58 = vadd.f32 %v4127_v54, %v2648_v27 }
 0x12b   : > { %v2855_v26 = vpop.f32.mrb[25].mxu0  ;;  %v2651_v45 = vunpack.c.l.bf16 %v2712_v18  ;;  %v2652_v4 = vunpack.c.h.bf16 %v2712_v18 }
 0x12c   : > { %v4141_v48 = vadd.f32 %v2855_v26, %v2854_v42  ;;  %v2857_v51 = vpop.f32.mrb[26].mxu0  ;;  %v4143_v20 = vadd.f32 %v3164_v43, %v2909_v24 }
 0x12d   : > { %v2858_v52 = vpop.f32.mrb[27].mxu0  ;;  %v3194_v54 = vadd.f32 %v4132_v41, %v2651_v45 }
 0x12e   : > { %v2910_v17 = vpop.f32.mrb[24].mxu1  ;;  %v4145_v40 = vadd.f32 %v2858_v52, %v2857_v51 }
 0x12f   : > { %v2911_v15 = vpop.f32.mrb[25].mxu1 }
 0x130   : > { %v2912_v23 = vadd.f32 %v2911_v15, %v2910_v17  ;;  %v2913_v29 = vpop.f32.mrb[26].mxu1 }
 0x131   : > { %v2914_v28 = vpop.f32.mrb[27].mxu1 }
 0x132   : > { %v2915_v34 = vadd.f32 %v2914_v28, %v2913_v29  ;;  %v2860_v3 = vpop.f32.mrb[28].mxu0  ;;  %v4148_v22 = vadd.f32 %v3179_v36, %v2912_v23  ;;  %v2713_v28 = vld [vmem:[%s4120_s16 + $0x30] sm:$0xff]  }
 0x133   : > { %v2861_v47 = vpop.f32.mrb[29].mxu0  ;;  %v2656_v41 = vunpack.c.h.bf16 %v2713_v28 }
 0x134   : > { %v4150_v53 = vadd.f32 %v2861_v47, %v2860_v3  ;;  %v2863_v61 = vpop.f32.mrb[30].mxu0  ;;  %v4152_v12 = vadd.f32 %v3189_v16, %v2915_v34  ;;  %v3202_v34 = vadd.f32 %v4136_v60, %v2652_v4 }
 0x135   : > { %v2864_v0 = vpop.f32.mrb[31].mxu0 }
 0x136   : > { %v2916_v49 = vpop.f32.mrb[28].mxu1  ;;  %v4154_v7 = vadd.f32 %v2864_v0, %v2863_v61  ;;  %v2655_v0 = vunpack.c.l.bf16 %v2713_v28 }
 0x137   : > { %v2917_v8 = vpop.f32.mrb[29].mxu1 }
 0x138   : > { %v2918_v9 = vadd.f32 %v2917_v8, %v2916_v49  ;;  %v2919_v38 = vpop.f32.mrb[30].mxu1  ;;  %v3214_v60 = vadd.f32 %v4141_v48, %v2655_v0 }
 0x139   : > { %v2920_v39 = vpop.f32.mrb[31].mxu1 }
 0x13a   : > { %v2921_v62 = vadd.f32 %v2920_v39, %v2919_v38  ;;  %v2978_v63 = vpop.f32.mrb[32].mxu0  ;;  %v4159_v50 = vadd.f32 %v3174_v10, %v2918_v9 }
 0x13b   : > { %v2979_v46 = vpop.f32.mrb[33].mxu0 }
 0x13c   : > { %v4161_v11 = vadd.f32 %v2979_v46, %v2978_v63  ;;  %v2981_v14 = vpop.f32.mrb[34].mxu0  ;;  %v4163_v31 = vadd.f32 %v3184_v57, %v2921_v62  ;;  %v2714_v62 = vld [vmem:[%s4120_s16 + $0x38] sm:$0xff]   ;;  %v3222_v46 = vadd.f32 %v4145_v40, %v2656_v41 }
 0x13d   : > { %v2982_v37 = vpop.f32.mrb[35].mxu0  ;;  %v2660_v18 = vunpack.c.h.bf16 %v2714_v62 }
 0x13e   : > { %v2922_v21 = vpop.f32.mrb[32].mxu1  ;;  %v4165_v35 = vadd.f32 %v2982_v37, %v2981_v14 }
 0x13f   : > { %v2923_v44 = vpop.f32.mrb[33].mxu1  ;;  %v3218_v45 = vadd.f32 %v4154_v7, %v2660_v18 }
 0x140   : > { %v2924_v5 = vadd.f32 %v2923_v44, %v2922_v21  ;;  %v2925_v1 = vpop.f32.mrb[34].mxu1  ;;  %v2659_v21 = vunpack.c.l.bf16 %v2714_v62 }
 0x141   : > { %v2926_v55 = vpop.f32.mrb[35].mxu1 }
 0x142   : > { %v4170_v43 = vadd.f32 %v3198_v59, %v2924_v5  ;;  %v2927_v24 = vadd.f32 %v2926_v55, %v2925_v1  ;;  %v2984_v42 = vpop.f32.mrb[36].mxu0 }
 0x143   : > { %v2985_v26 = vpop.f32.mrb[37].mxu0 }
 0x144   : > { %v4172_v51 = vadd.f32 %v3206_v58, %v2927_v24  ;;  %v4174_v52 = vadd.f32 %v2985_v26, %v2984_v42  ;;  %v2987_v13 = vpop.f32.mrb[38].mxu0  ;;  %v3210_v24 = vadd.f32 %v4150_v53, %v2659_v21 }
 0x145   : > { %v2988_v17 = vpop.f32.mrb[39].mxu0 }
 0x146   : > { %v2928_v15 = vpop.f32.mrb[36].mxu1  ;;  %v4176_v36 = vadd.f32 %v2988_v17, %v2987_v13 }
 0x147   : > { %v2929_v23 = vpop.f32.mrb[37].mxu1 }
 0x148   : > { %v2930_v29 = vadd.f32 %v2929_v23, %v2928_v15  ;;  %v2931_v2 = vpop.f32.mrb[38].mxu1 }
 0x149   : > { %v2932_v16 = vpop.f32.mrb[39].mxu1 }
 0x14a   : > { %v4181_v3 = vadd.f32 %v3194_v54, %v2930_v29  ;;  %v2933_v47 = vadd.f32 %v2932_v16, %v2931_v2  ;;  %v2990_v32 = vpop.f32.mrb[40].mxu0 }
 0x14b   : > { %v2991_v61 = vpop.f32.mrb[41].mxu0 }
 0x14c   : > { %v4183_v6 = vadd.f32 %v3202_v34, %v2933_v47  ;;  %v4185_v49 = vadd.f32 %v2991_v61, %v2990_v32  ;;  %v2993_v8 = vpop.f32.mrb[42].mxu0 }
 0x14d   : > { %v2994_v10 = vpop.f32.mrb[43].mxu0 }
 0x14e   : > { %v2934_v9 = vpop.f32.mrb[40].mxu1  ;;  %v4187_v38 = vadd.f32 %v2994_v10, %v2993_v8 }
 0x14f   : > { %v2935_v30 = vpop.f32.mrb[41].mxu1 }
 0x150   : > { %v2936_v39 = vadd.f32 %v2935_v30, %v2934_v9  ;;  %v2937_v57 = vpop.f32.mrb[42].mxu1 }
 0x151   : > { %v2938_v63 = vpop.f32.mrb[43].mxu1 }
 0x152   : > { %v4192_v56 = vadd.f32 %v3214_v60, %v2936_v39  ;;  %v2939_v14 = vadd.f32 %v2938_v63, %v2937_v57  ;;  %v2996_v37 = vpop.f32.mrb[44].mxu0 }
 0x153   : > { %v2997_v27 = vpop.f32.mrb[45].mxu0 }
 0x154   : > { %v4194_v44 = vadd.f32 %v3222_v46, %v2939_v14  ;;  %v2998_v59 = vadd.f32 %v2997_v27, %v2996_v37  ;;  %v2999_v5 = vpop.f32.mrb[46].mxu0 }
 0x155   : > { %v3000_v1 = vpop.f32.mrb[47].mxu0 }
 0x156   : > { %v2940_v55 = vpop.f32.mrb[44].mxu1  ;;  %v3001_v48 = vadd.f32 %v3000_v1, %v2999_v5 }
 0x157   : > { %v2941_v58 = vpop.f32.mrb[45].mxu1 }
 0x158   : > { %v2942_v42 = vadd.f32 %v2941_v58, %v2940_v55  ;;  %v2943_v26 = vpop.f32.mrb[46].mxu1 }
 0x159   : > { %v2944_v40 = vpop.f32.mrb[47].mxu1 }
 0x15a   : > { %v3211_v13 = vadd.f32 %v3210_v24, %v2942_v42  ;;  %v2945_v17 = vadd.f32 %v2944_v40, %v2943_v26  ;;  %v3002_v4 = vpop.f32.mrb[48].mxu0 }
 0x15b   : > { %v3003_v15 = vpop.f32.mrb[49].mxu0 }
 0x15c   : > { %v3219_v23 = vadd.f32 %v3218_v45, %v2945_v17  ;;  %v3004_v54 = vadd.f32 %v3003_v15, %v3002_v4  ;;  %v3005_v29 = vpop.f32.mrb[50].mxu0 }
 0x15d   : > { %v3006_v2 = vpop.f32.mrb[51].mxu0 }
 0x15e   : > { %v3092_v28 = vpop.f32.mrb[0].mxu1  ;;  %v3007_v16 = vadd.f32 %v3006_v2, %v3005_v29  ;;  %v4199_v34 = vadd.f32 %v4170_v43, %v3004_v54 }
 0x15f   : > { %v3156_v53 = vadd.f32 %v4139_v25, %v3092_v28  ;;  %v1616_v47 = vpop.f32.mrb[1].mxu1 }
 0x160   : > { %v3161_v32 = vadd.f32 %v4130_v19, %v1616_v47  ;;  %v3093_v61 = vpop.f32.mrb[2].mxu1  ;;  %v4204_v7 = vadd.f32 %v4172_v51, %v3007_v16 }
 0x161   : > { %v3166_v0 = vadd.f32 %v4143_v20, %v3093_v61  ;;  %v1619_v8 = vpop.f32.mrb[3].mxu1  ;;  %v3157_v10 = vadd.f32 %v3156_v53, %v4174_v52 }
 0x162   : > { %v3171_v41 = vadd.f32 %v4134_v33, %v1619_v8  ;;  %v3008_v9 = vpop.f32.mrb[52].mxu0  ;;  %v3162_v43 = vadd.f32 %v3161_v32, %v4161_v11 }
 0x163   : > { %v3009_v30 = vpop.f32.mrb[53].mxu0  ;;  %v3167_v25 = vadd.f32 %v3166_v0, %v4176_v36 }
 0x164   : > { %v3010_v60 = vadd.f32 %v3009_v30, %v3008_v9  ;;  %v3011_v39 = vpop.f32.mrb[54].mxu0  ;;  %v3172_v19 = vadd.f32 %v3171_v41, %v4165_v35 }
 0x165   : > { %v3012_v57 = vpop.f32.mrb[55].mxu0 }
 0x166   : > { %v3096_v51 = vpop.f32.mrb[4].mxu1  ;;  %v3013_v62 = vadd.f32 %v3012_v57, %v3011_v39  ;;  %v3196_v20 = vadd.f32 %v4181_v3, %v3010_v60 }
 0x167   : > { %v3176_v63 = vadd.f32 %v4159_v50, %v3096_v51  ;;  %v1632_v52 = vpop.f32.mrb[5].mxu1 }
 0x168   : > { %v3181_v33 = vadd.f32 %v4148_v22, %v1632_v52  ;;  %v3097_v46 = vpop.f32.mrb[6].mxu1  ;;  %v3204_v11 = vadd.f32 %v4183_v6, %v3013_v62 }
 0x169   : > { %v3186_v14 = vadd.f32 %v4163_v31, %v3097_v46  ;;  %v1635_v36 = vpop.f32.mrb[7].mxu1  ;;  %v3177_v37 = vadd.f32 %v3176_v63, %v2998_v59 }
 0x16a   : > { %v3191_v27 = vadd.f32 %v4152_v12, %v1635_v36  ;;  %v3014_v35 = vpop.f32.mrb[56].mxu0  ;;  %v3182_v21 = vadd.f32 %v3181_v33, %v4185_v49 }
 0x16b   : > { %v3015_v5 = vpop.f32.mrb[57].mxu0  ;;  %v3187_v1 = vadd.f32 %v3186_v14, %v3001_v48 }
 0x16c   : > { %v3016_v3 = vadd.f32 %v3015_v5, %v3014_v35  ;;  %v3017_v18 = vpop.f32.mrb[58].mxu0  ;;  %v3192_v50 = vadd.f32 %v3191_v27, %v4187_v38 }
 0x16d   : > { %v3018_v55 = vpop.f32.mrb[59].mxu0 }
 0x16e   : > { %v3019_v22 = vadd.f32 %v3018_v55, %v3017_v18  ;;  %v3216_v58 = vadd.f32 %v4192_v56, %v3016_v3 }
 0x170   : > { %v4222_v6 = vadd.f32 %v4194_v44, %v3019_v22 }
 0x172   : > { %v3020_v31 = vpop.f32.mrb[60].mxu0 }
 0x173   : > { %v3021_v59 = vpop.f32.mrb[61].mxu0 }
 0x174   : > { %v3022_v12 = vadd.f32 %v3021_v59, %v3020_v31  ;;  %v3023_v24 = vpop.f32.mrb[62].mxu0 }
 0x175   : > { %v3024_v42 = vpop.f32.mrb[63].mxu0 }
 0x176   : > { %v3025_v49 = vadd.f32 %v3024_v42, %v3023_v24  ;;  %v3212_v26 = vadd.f32 %v3211_v13, %v3022_v12 }
 0x178   : > { %v3220_v48 = vadd.f32 %v3219_v23, %v3025_v49 }
 0x17a   : > { %v3124_v40 = vpop.f32.mrb[64].mxu0 }
 0x17b   : > { %v3158_v45 = vadd.f32 %v3157_v10, %v3124_v40  ;;  %v2043_v17 = vpop.f32.mrb[65].mxu0 }
 0x17c   : > { %v3163_v38 = vadd.f32 %v3162_v43, %v2043_v17  ;;  %v3125_v4 = vpop.f32.mrb[66].mxu0 }
 0x17d   : > { %v3168_v15 = vadd.f32 %v3167_v25, %v3125_v4  ;;  %v2046_v54 = vpop.f32.mrb[67].mxu0  ;;  %v2226_v8 = vmul.f32 %v3158_v45, %v3158_v45 }
 0x17e   : > { %v3132_v56 = vpop.f32.mrb[8].mxu1  ;;  %v3173_v44 = vadd.f32 %v3172_v19, %v2046_v54  ;;  %v2224_v13 = vmul.f32 %v3163_v38, %v3163_v38 }
 0x17f   : > { %v4230_v29 = vadd.f32 %v3196_v20, %v3132_v56  ;;  %v2075_v23 = vpop.f32.mrb[9].mxu1  ;;  %v2669_v2 = vpack.c.bf16 %v3168_v15, %v3158_v45  ;;  %v2227_v60 = vmul.f32 %v3168_v15, %v3168_v15 }
 0x180   : > { %v3201_v28 = vadd.f32 %v4199_v34, %v2075_v23  ;;  %v3133_v16 = vpop.f32.mrb[10].mxu1  ;;  %v2664_v53 = vpack.c.bf16 %v3173_v44, %v3163_v38  ;;  %v2202_v47 = vadd.f32 %v3173_v44, %v3163_v38  ;;  %v2225_v32 = vmul.f32 %v3173_v44, %v3173_v44 }
 0x181   : > { %2715 = vst [vmem:[%s4228_s19 + $0x8] sm:$0xff] %v2669_v2   ;;  %v3205_v61 = vadd.f32 %v3204_v11, %v3133_v16  ;;  %v2078_v0 = vpop.f32.mrb[11].mxu1  ;;  %v2234_v4 = vmul.f32 %v4230_v29, %v4230_v29 }
 0x182   : > { %2665 = vst [vmem:[%s4228_s19] sm:$0xff] %v2664_v53   ;;  %v2203_v10 = vadd.f32 %v3158_v45, %v2202_v47  ;;  %v2240_v41 = vadd.f32 %v2225_v32, %v2224_v13  ;;  %v3209_v9 = vadd.f32 %v4204_v7, %v2078_v0  ;;  %v3128_v43 = vpop.f32.mrb[68].mxu0 }
 0x183   : > { %v2689_v30 = vpack.c.bf16 %v3205_v61, %v4230_v29  ;;  %v3178_v25 = vadd.f32 %v3177_v37, %v3128_v43  ;;  %v2059_v34 = vpop.f32.mrb[69].mxu0  ;;  %v2235_v54 = vmul.f32 %v3205_v61, %v3205_v61 }
 0x184   : > { %v2241_v39 = vadd.f32 %v2240_v41, %v2226_v8  ;;  %v2684_v19 = vpack.c.bf16 %v3209_v9, %v3201_v28  ;;  %v3183_v57 = vadd.f32 %v3182_v21, %v2059_v34  ;;  %v3129_v51 = vpop.f32.mrb[70].mxu0  ;;  %v2204_v62 = vadd.f32 %v3168_v15, %v2203_v10 }
 0x185   : > { %2719 = vst [vmem:[%s4228_s19 + $0x28] sm:$0xff] %v2689_v30   ;;  %v3188_v20 = vadd.f32 %v3187_v1, %v3129_v51  ;;  %v2062_v63 = vpop.f32.mrb[71].mxu0  ;;  %v2230_v22 = vmul.f32 %v3178_v25, %v3178_v25 }
 0x186   : > { %2718 = vst [vmem:[%s4228_s19 + $0x20] sm:$0xff] %v2684_v19   ;;  %v3136_v52 = vpop.f32.mrb[12].mxu1  ;;  %v2228_v33 = vmul.f32 %v3183_v57, %v3183_v57  ;;  %v2242_v46 = vadd.f32 %v2241_v39, %v2227_v60  ;;  %v3193_v7 = vadd.f32 %v3192_v50, %v2062_v63  ;;  %v2205_v14 = vadd.f32 %v3183_v57, %v2204_v62 }
 0x187   : > { %v3213_v11 = vadd.f32 %v3212_v26, %v3136_v52  ;;  %v2091_v36 = vpop.f32.mrb[13].mxu1  ;;  %v2679_v37 = vpack.c.bf16 %v3188_v20, %v3178_v25  ;;  %v2231_v24 = vmul.f32 %v3188_v20, %v3188_v20  ;;  %v2232_v26 = vmul.f32 %v3201_v28, %v3201_v28 }
 0x188   : > { %v2243_v27 = vadd.f32 %v2242_v46, %v2228_v33  ;;  %v3217_v35 = vadd.f32 %v3216_v58, %v2091_v36  ;;  %v3137_v5 = vpop.f32.mrb[14].mxu1  ;;  %v2674_v21 = vpack.c.bf16 %v3193_v7, %v3183_v57  ;;  %v2229_v3 = vmul.f32 %v3193_v7, %v3193_v7 }
 0x189   : > { %2717 = vst [vmem:[%s4228_s19 + $0x18] sm:$0xff] %v2679_v37   ;;  %v3221_v1 = vadd.f32 %v3220_v48, %v3137_v5  ;;  %v2206_v18 = vadd.f32 %v3193_v7, %v2205_v14  ;;  %v2094_v55 = vpop.f32.mrb[15].mxu1  ;;  %v2233_v48 = vmul.f32 %v3209_v9, %v3209_v9  ;;  %v2238_v32 = vmul.f32 %v3213_v11, %v3213_v11 }
 0x18a   : > { %2716 = vst [vmem:[%s4228_s19 + $0x10] sm:$0xff] %v2674_v21   ;;  %v2244_v31 = vadd.f32 %v2243_v27, %v2229_v3  ;;  %v3225_v50 = vadd.f32 %v4222_v6, %v2094_v55  ;;  %v2236_v13 = vmul.f32 %v3217_v35, %v3217_v35 }
 0x18b   : > { %v2699_v59 = vpack.c.bf16 %v3221_v1, %v3213_v11  ;;  %v2207_v12 = vadd.f32 %v3178_v25, %v2206_v18  ;;  %v2239_v8 = vmul.f32 %v3221_v1, %v3221_v1 }
 0x18c   : > { %v2245_v42 = vadd.f32 %v2244_v31, %v2230_v22  ;;  %v2694_v49 = vpack.c.bf16 %v3225_v50, %v3217_v35  ;;  %v2237_v16 = vmul.f32 %v3225_v50, %v3225_v50 }
 0x18d   : > { %2721 = vst [vmem:[%s4228_s19 + $0x38] sm:$0xff] %v2699_v59   ;;  %v2208_v58 = vadd.f32 %v3188_v20, %v2207_v12 }
 0x18e   : > { %v2246_v40 = vadd.f32 %v2245_v42, %v2231_v24  ;;  %2720 = vst [vmem:[%s4228_s19 + $0x30] sm:$0xff] %v2694_v49  }
 0x18f   : > { %v2209_v45 = vadd.f32 %v3201_v28, %v2208_v58 }
 0x190   : > { %v2247_v17 = vadd.f32 %v2246_v40, %v2232_v26 }
 0x191   : > { %v2210_v38 = vadd.f32 %v3209_v9, %v2209_v45 }
 0x192   : > { %v2248_v15 = vadd.f32 %v2247_v17, %v2233_v48 }
 0x193   : > { %v2211_v6 = vadd.f32 %v4230_v29, %v2210_v38 }
 0x194   : > { %v2249_v56 = vadd.f32 %v2248_v15, %v2234_v4 }
 0x195   : > { %v2212_v44 = vadd.f32 %v3205_v61, %v2211_v6 }
 0x196   : > { %v2250_v23 = vadd.f32 %v2249_v56, %v2235_v54 }
 0x197   : > { %v2213_v2 = vadd.f32 %v3217_v35, %v2212_v44 }
 0x198   : > { %v2251_v53 = vadd.f32 %v2250_v23, %v2236_v13 }
 0x199   : > { %v2214_v47 = vadd.f32 %v3225_v50, %v2213_v2 }
 0x19a   : > { %v2252_v28 = vadd.f32 %v2251_v53, %v2237_v16 }
 0x19b   : > { %v2215_v0 = vadd.f32 %v3213_v11, %v2214_v47 }
 0x19c   : > { %v2253_v10 = vadd.f32 %v2252_v28, %v2238_v32 }
 0x19d   : > { %v2216_v41 = vadd.f32 %v3221_v1, %v2215_v0 }
 0x19e   : > { %v2254_v9 = vadd.f32 %v2253_v10, %v2239_v8 }
 0x19f   : > { %v2217_v43 = vrot.slane %v2216_v41, 4 }
 0x1a0   : > { %v2255_v29 = vrot.slane %v2254_v9, 4 }
 0x1a1   : > { %v2218_v30 = vadd.f32 %v2217_v43, %v2216_v41 }
 0x1a2   : > { %v2256_v25 = vadd.f32 %v2255_v29, %v2254_v9 }
 0x1a3   : > { %v2219_v61 = vrot.slane %v2218_v30, 2 }
 0x1a4   : > { %v2257_v34 = vrot.slane %v2256_v25, 2 }
 0x1a5   : > { %v2220_v60 = vadd.f32 %v2219_v61, %v2218_v30 }
 0x1a6   : > { %v2258_v39 = vadd.f32 %v2257_v34, %v2256_v25 }
 0x1a7   : > { %v2221_v19 = vrot.slane %v2220_v60, 1 }
 0x1a8   : > { %v2259_v57 = vrot.slane %v2258_v39, 1 }
 0x1a9   : > { %v2222_v51 = vadd.f32 %v2221_v19, %v2220_v60 }
 0x1aa   : > { %v2260_v62 = vadd.f32 %v2259_v57, %v2258_v39 }
 0x1ab   : > { %2223 = vst [vmem:[%s312_s21] sm:$0x1] %v2222_v51 }
 0x1ac   : > { %2261 = vst [vmem:[%s315_s27] sm:$0x1] %v2260_v62 }
 0x1ad PF: > { %s18_s24 = sadd.s32 1, %s3346_s24  }
 0x1ae   : > { %p15_p4 = scmp.ge.s32.totalorder %s18_s24, 4  }
 0x1b0   :  { %17 = sbr.rel (!%p15_p4) target bundleno = 1 (0x1), region = 99 }

// kernel: upconvblock_forward.7
= control target key start
LH: loop header
LB: loop body
LE: loop exit
PB: predicated region body
PF: predicated region fallthrough
CT: control target
= control target key end

     0   :  { %12 = vsyncpa [#allocation4], 0  ;;  %s4136_s0 = inlined_call_operand.vmem [shape: bf16[2,4,32,128], index: 0, kind: input, shape index: {}]   ;;  %s4137_s1 = inlined_call_operand.vmem [shape: f32[1,128], index: 1, kind: input, shape index: {}]   ;;  %s4138_s2 = inlined_call_operand.vmem [shape: f32[1,128], index: 2, kind: input, shape index: {}]   ;;  %s4139_s3 = inlined_call_operand.vmem [shape: bf16[3,384,128], index: 3, kind: input, shape index: {}]   ;;  %s4140_s4 = inlined_call_operand.vmem [shape: f32[2,4,32,128], index: 4, kind: output, shape index: {0}]   ;;  %s4141_s5 = inlined_call_operand.hbm [shape: f32[2,1,128], index: 5, kind: output, shape index: {1}]   ;;  %s4142_s6 = inlined_call_operand.hbm [shape: f32[2,1,128], index: 6, kind: output, shape index: {2}]  }
   0x1   :  { %14 = vsyncpa [#allocation4 + $0x1], 0 }
   0x2   :  { %15 = vsyncpa [#allocation6], 0 }
   0x3   :  { %17 = vsyncpa [#allocation6 + $0x1], 0  ;;  %s3213_s21 = smov 0   ;;  %s3215_s22 = smov 0  }
   0x4   :  { %s3217_s23 = smov 0   ;;  %s3219_s24 = smov 0  }
   0x5 LB: > { %s3234_s25 = sadd.s32 4294967295, %s3172_s24   ;;  %s2217_s26 = sadd.s32 4294967294, %s3172_s24   ;;  %s3172_s24 = sphi %s3219_s24, %s4174_s24   ;;  %s3168_s23 = sphi %s3217_s23, %s4173_s23   ;;  %s3164_s22 = sphi %s3215_s22, %s4172_s22   ;;  %s3160_s21 = sphi %s3213_s21, %s4171_s21  }
   0x6   : > { %s3238_s27 = sadd.s32 1, %s3172_s24   ;;  %s145_s28 = sadd.s32 1, %s3168_s23 }
   0x7   : > { %s142_s29 = ssub.s32 %s3172_s24, %s3238_s27  ;;  %p155_p0 = scmp.ne.s32.totalorder %s3168_s23, %s3164_s22 }
   0x8   : > { %p143_p1 = scmp.eq.s32.totalorder %s142_s29, 0  ;;  %p156_p2 = scmp.eq.s32.totalorder %s3234_s25, 1 }
   0x9   : > { %p161_p3 = scmp.ne.s32.totalorder %s3164_s22, %s3160_s21  ;;  %p162_p4 = scmp.eq.s32.totalorder %s2217_s26, 1 }
   0xa   : > { %s3249_s30 = scalar_select %p143_p1, %s3168_s23, %s145_s28  }
   0xb   : > { %p3251_p5 = por %p156_p2, %p155_p0  ;;  %p3255_p6 = por %p162_p4, %p161_p3 }
   0xc   : > { %p2220_p7 = scmp.ge.s32.totalorder %s3172_s24, 1  ;;  %p223_p8 = scmp.lt.s32.totalorder %s3172_s24, 3 }
   0xe   : > { %p224_p9 = pnand %p2220_p7, %p223_p8 }
   0xf   : > { %v3006_v0 = vld [vmem:[%s4139_s3 + $0x100] sm:$0xff] (!%p224_p9)   ;;  %v366_v2 = vlaneseq (!%p224_p9)  ;;  %v3009_v4 = vld [vmem:[%s4139_s3 + $0x108] sm:$0xff] (!%p224_p9)   ;;  %v3012_v8 = vld [vmem:[%s4139_s3 + $0x110] sm:$0xff] (!%p224_p9)   ;;  %p261_p10 = scmp.lt.s32.totalorder (!%p224_p9), %s3234_s25, 1  ;;  %vm3174_vm4 = vmmov (!%p224_p9), 1   ;;  %s2395_s12 = sshll.u32 (!%p224_p9), %s3234_s25, 4 }
  0x10   : > { %227 = sbr.rel (%p224_p9) target bundleno = 473 (0x1d9), region = 36  ;;  %v3007_v1 = vld [vmem:[%s4139_s3 + $0x140] sm:$0xff] (!%p224_p9)   ;;  %2520 = vmatprep.subr.bf16.mxu0 (!%p224_p9), %v3006_v0  ;;  %v3010_v5 = vld [vmem:[%s4139_s3 + $0x148] sm:$0xff] (!%p224_p9)   ;;  %v3013_v9 = vld [vmem:[%s4139_s3 + $0x150] sm:$0xff] (!%p224_p9)   ;;  %s4062_s18 = scalar_lea.hbm (!%p224_p9), %s4141_s5, %s2395_s12 }
  0x11   : > { %v3008_v3 = vld [vmem:[%s4139_s3 + $0xc0] sm:$0xff] (!%p224_p9)   ;;  %2760 = vmatprep.subr.bf16.mxu1 (!%p224_p9), %v3007_v1  ;;  %v3011_v6 = vld [vmem:[%s4139_s3 + $0xc8] sm:$0xff] (!%p224_p9)   ;;  %v3279_v7 = vshrl.u32 (!%p224_p9), %v366_v2, 7  ;;  %v3014_v11 = vld [vmem:[%s4139_s3 + $0xd0] sm:$0xff] (!%p224_p9)   ;;  %s4069_s20 = scalar_lea.hbm (!%p224_p9), %s4142_s6, %s2395_s12  ;;  %s3176_s10 = smov (!%p224_p9), [#allocation3]  }
  0x12   : > { %2521 = vmatpush3.bf16.msra.mxu0 (!%p224_p9), %v3008_v3  ;;  %2761 = vmatpush3.bf16.msra.mxu1 (!%p224_p9), %v3007_v1  ;;  %v3015_v12 = vld [vmem:[%s4139_s3 + $0x118] sm:$0xff] (!%p224_p9)   ;;  %v3018_v16 = vld [vmem:[%s4139_s3 + $0x120] sm:$0xff] (!%p224_p9)   ;;  %v3021_v22 = vld [vmem:[%s4139_s3 + $0x128] sm:$0xff] (!%p224_p9)  }
  0x13   : > { %2522 = vmatprep.subr.bf16.mxu0 (!%p224_p9), %v3009_v4  ;;  %2762 = vmatprep.subr.bf16.mxu1 (!%p224_p9), %v3010_v5  ;;  %v387_v10 = vand.u32 (!%p224_p9), 31, %v3279_v7  ;;  %v3016_v13 = vld [vmem:[%s4139_s3 + $0x158] sm:$0xff] (!%p224_p9)   ;;  %v3302_v15 = vadd.s32 (!%p224_p9), 24, %v3279_v7  ;;  %v3308_v17 = vadd.s32 (!%p224_p9), 56, %v3279_v7  ;;  %v3019_v18 = vld [vmem:[%s4139_s3 + $0x160] sm:$0xff] (!%p224_p9)   ;;  %v3022_v23 = vld [vmem:[%s4139_s3 + $0x168] sm:$0xff] (!%p224_p9)  }
  0x14   : > { %v3017_v14 = vld [vmem:[%s4139_s3 + $0xd8] sm:$0xff] (!%p224_p9)   ;;  %v3020_v20 = vld [vmem:[%s4139_s3 + $0xe0] sm:$0xff] (!%p224_p9)   ;;  %v3023_v24 = vld [vmem:[%s4139_s3 + $0xe8] sm:$0xff] (!%p224_p9)   ;;  %v3332_v25 = vadd.s32 (!%p224_p9), 32, %v3279_v7  ;;  %v3338_v27 = vadd.s32 (!%p224_p9), 88, %v3279_v7  ;;  %vm607_vm0 = vcmp.lt.s32.totalorder (!%p224_p9), %v3279_v7, 1 }
  0x15   : > { %v408_v19 = vand.u32 (!%p224_p9), 31, %v3302_v15  ;;  %v436_v21 = vand.u32 (!%p224_p9), 31, %v3308_v17  ;;  %v3024_v26 = vld [vmem:[%s4139_s3 + $0x130] sm:$0xff] (!%p224_p9)   ;;  %v3027_v32 = vld [vmem:[%s4139_s3 + $0x138] sm:$0xff] (!%p224_p9)   ;;  %v3360_v34 = vld [vmem:[%s4137_s1] ss:$0 sm:$0xff] (!%p224_p9) }
  0x16   : > { %2523 = vmatpush3.bf16.msra.mxu0 (!%p224_p9), %v3011_v6  ;;  %2763 = vmatpush3.bf16.msra.mxu1 (!%p224_p9), %v3010_v5  ;;  %v3025_v28 = vld [vmem:[%s4139_s3 + $0x170] sm:$0xff] (!%p224_p9)   ;;  %v415_v29 = vand.u32 (!%p224_p9), 31, %v3332_v25  ;;  %v464_v31 = vand.u32 (!%p224_p9), 31, %v3338_v27  ;;  %v3028_v35 = vld [vmem:[%s4139_s3 + $0x178] sm:$0xff] (!%p224_p9)   ;;  %vm672_vm1 = vcmp.lt.s32.totalorder (!%p224_p9), %v3279_v7, 7  ;;  %vm3369_vm2 = vcmp.ne.s32.totalorder (!%p224_p9), %v387_v10, 0 }
  0x17   : > { %2524 = vmatprep.subr.bf16.mxu0 %v3012_v8  ;;  %2764 = vmatprep.subr.bf16.mxu1 %v3013_v9  ;;  %s3318_s9 = scalar_select %p261_p10, %s3234_s25, 1  ;;  %v3026_v30 = vld [vmem:[%s4139_s3 + $0xf0] sm:$0xff]   ;;  %v3376_v41 = vld [vmem:[%s4138_s2] ss:$0 sm:$0xff]  ;;  %v3029_v47 = vld [vmem:[%s4139_s3 + $0xf8] sm:$0xff]   ;;  %vm3387_vm3 = vcmp.ne.s32.totalorder %v408_v19, 31 }
  0x18   : > { %v3030_v56 = vld [vmem:[%s4139_s3 + $0x40] sm:$0xff]   ;;  %v3401_v61 = vadd.s32 120, %v3279_v7  ;;  %vm3427_vm5 = vmpackc.low %vm3174_vm4, %vm3369_vm2  ;;  %vm3465_vm7 = vcmp.ne.s32.totalorder %v436_v21, 31  ;;  %v3034_v21 = vld [vmem:[%s4139_s3 + $0x48] sm:$0xff]   ;;  %vm3525_vm8 = vcmp.ne.s32.totalorder %v415_v29, 0  ;;  %vm3568_vm9 = vcmp.ne.s32.totalorder %v464_v31, 31 }
  0x19   : > { %s2399_s14 = sshll.u32 %s3318_s9, 6  ;;  %v3031_v60 = vld [vmem:[%s4139_s3 + $0x1c0] sm:$0xff]   ;;  %vm3437_vm6 = vmpackc.low %vm3387_vm3, %vm3174_vm4  ;;  %v3035_v55 = vld [vmem:[%s4139_s3 + $0x8] sm:$0xff]   ;;  %s2400_s26 = sshll.u32 %s3318_s9, 7 }
  0x1a   : > { %2525 = vmatpush3.bf16.msra.mxu0 %v3014_v11  ;;  %2765 = vmatpush3.bf16.msra.mxu1 %v3013_v9  ;;  %s3346_s29 = scalar_lea.vmem %s4136_s0, %s2399_s14  ;;  %v3032_v17 = vld [vmem:[%s4139_s3] sm:$0xff]   ;;  %vm3581_vm10 = vmpackc.low %vm3465_vm7, %vm3174_vm4  ;;  %v3040_v27 = vld [vmem:[%s4139_s3 + $0x58] sm:$0xff]   ;;  %s4023_s11 = scalar_lea.vmem %s4140_s4, %s2400_s26 }
  0x1b   : > { %2526 = vmatprep.subr.bf16.mxu0 %v3015_v12  ;;  %2766 = vmatprep.subr.bf16.mxu1 %v3016_v13  ;;  %v2402_v33 = vld [vmem:[%s3346_s29] sm:$0xff]   ;;  %v2433_v38 = vld [vmem:[%s3346_s29 + $0x8] sm:$0xff]   ;;  %v2439_v39 = vld [vmem:[%s3346_s29 + $0x38] sm:$0xff]   ;;  %s4052_s9 = sand.u32 1, %s3164_s22  }
  0x1c   : > { %v2403_v36 = vunpack.c.l.bf16 %v2402_v33  ;;  %v2404_v37 = vunpack.c.h.bf16 %v2402_v33  ;;  %v2407_v42 = vunpack.c.l.bf16 %v2433_v38  ;;  %v2408_v43 = vunpack.c.h.bf16 %v2433_v38  ;;  %v2434_v45 = vld [vmem:[%s3346_s29 + $0x10] sm:$0xff]   ;;  %v2435_v10 = vld [vmem:[%s3346_s29 + $0x18] sm:$0xff]   ;;  %v2436_v38 = vld [vmem:[%s3346_s29 + $0x20] sm:$0xff]   ;;  %s254_s13 = scalar_lea.vmem [#allocation3], %s4052_s9  ;;  %s260_s15 = scalar_lea.vmem [#allocation5], %s4052_s9 }
  0x1d   : > { %v2432_v44 = vunpack.c.h.bf16 %v2439_v39  ;;  %v2431_v46 = vunpack.c.l.bf16 %v2439_v39  ;;  %v2411_v50 = vunpack.c.l.bf16 %v2434_v45  ;;  %v2412_v51 = vunpack.c.h.bf16 %v2434_v45  ;;  %v3037_v45 = vld [vmem:[%s4139_s3 + $0x1c8] sm:$0xff]   ;;  %vm3636_vm11 = vmpackc.low %vm3174_vm4, %vm3525_vm8  ;;  %s2096_s14 = sshll.u32 %s254_s13, 4  ;;  %s2077_s26 = scalar_lea.sflag [#allocation4], %s4052_s9  ;;  %s4064_s14 = int_to_ptr.vmem [resolvable:$true] %s2096_s14 }
  0x1e   : > { %2527 = vmatpush3.bf16.msra.mxu0 %v3017_v14  ;;  %2767 = vmatpush3.bf16.msra.mxu1 %v3016_v13  ;;  %v311_v48 = vmul.f32 %v2403_v36, %v3360_v34  ;;  %v312_v49 = vmul.f32 %v2404_v37, %v3360_v34  ;;  %v313_v52 = vmul.f32 %v2407_v42, %v3360_v34  ;;  %vm3689_vm12 = vmpackc.low %vm3568_vm9, %vm3174_vm4  ;;  %s3078_s28 = scalar_lea.vmem %s4064_s14, 16 }
  0x1f   : > { %2528 = vmatprep.subr.bf16.mxu0 %v3018_v16  ;;  %2768 = vmatprep.subr.bf16.mxu1 %v3019_v18  ;;  %v326_v53 = vmul.f32 %v2432_v44, %v3360_v34  ;;  %v314_v54 = vmul.f32 %v2408_v43, %v3360_v34  ;;  %v315_v59 = vmul.f32 %v2411_v50, %v3360_v34  ;;  %v2416_v44 = vunpack.c.h.bf16 %v2435_v10  ;;  %v3067_v16 = vld [vmem:[%s4139_s3 + $0x208] sm:$0xff]   ;;  %p3079_p11 = scmp.ne.s32.totalorder %s4064_s14, %s3078_s28 }
  0x20   : > { %v334_v57 = vadd.f32 %v3376_v41, %v311_v48  ;;  %v335_v58 = vadd.f32 %v3376_v41, %v312_v49  ;;  %v336_v62 = vadd.f32 %v3376_v41, %v313_v52  ;;  %v316_v1 = vmul.f32 %v2412_v51, %v3360_v34 }
  0x21   : > { %v349_v63 = vadd.f32 %v3376_v41, %v326_v53  ;;  %v337_v0 = vadd.f32 %v3376_v41, %v314_v54  ;;  %v338_v4 = vadd.f32 %v3376_v41, %v315_v59  ;;  %v3411_v5 = vmul.f32 %v2431_v46, %v3360_v34  ;;  %v3039_v54 = vld [vmem:[%s4139_s3 + $0x188] sm:$0xff]   ;;  %p3080_p12 = pnand %p3079_p11, %p3251_p5 }
  0x22   : > { %2529 = vmatpush3.bf16.msra.mxu0 %v3020_v20  ;;  %2769 = vmatpush3.bf16.msra.mxu1 %v3019_v18  ;;  %v3407_v2 = vmax.f32 %v334_v57, 0.0  ;;  %v351_v3 = vmax.f32 %v335_v58, 0.0  ;;  %v352_v6 = vmax.f32 %v336_v62, 0.0  ;;  %v339_v11 = vadd.f32 %v3376_v41, %v316_v1  ;;  %v3036_v1 = vld [vmem:[%s4139_s3 + $0x50] sm:$0xff]  }
  0x23   : > { %2530 = vmatprep.subr.bf16.mxu0 %v3021_v22  ;;  %2770 = vmatprep.subr.bf16.mxu1 %v3022_v23  ;;  %v3413_v8 = vmax.f32 %v349_v63, 0.0  ;;  %v3415_v9 = vmax.f32 %v337_v0, 0.0  ;;  %v3432_v22 = vmax.f32 %v338_v4, 0.0  ;;  %v2419_v52 = vunpack.c.l.bf16 %v2436_v38  ;;  %p3081_p13 = pneg %p3080_p12 }
  0x24   : > { %v591_v12 = vrot.slane %v3407_v2, 7  ;;  %v592_v13 = vrot.slane %v351_v3, 7  ;;  %v3421_v14 = vpack.c.bf16 %v351_v3, %v3407_v2  ;;  %v656_v15 = vrot.slane %v3407_v2, 1  ;;  %v3052_v2 = vld [vmem:[%s4139_s3 + $0x78] sm:$0xff]  }
  0x25   : > { %v657_v18 = vrot.slane %v351_v3, 1  ;;  %v658_v19 = vrot.slane %v352_v6, 1  ;;  %v606_v20 = vrot.slane %v3413_v8, 7  ;;  %v660_v37 = vrot.slane %v3432_v22, 1 }
  0x26   : > { %2531 = vmatpush3.bf16.msra.mxu0 %v3023_v24  ;;  %2771 = vmatpush3.bf16.msra.mxu1 %v3022_v23  ;;  %v622_v24 = vsel %vm607_vm0, %v591_v12, %v592_v13  ;;  %v3487_v48 = vmax.f32 %v339_v11, 0.0  ;;  %v593_v49 = vrot.slane %v352_v6, 7  ;;  %v594_v51 = vrot.slane %v3415_v9, 7 }
  0x27   : > { %2532 = vmatprep.subr.bf16.mxu0 %v3024_v26  ;;  %2772 = vmatprep.subr.bf16.mxu1 %v3025_v28  ;;  %v659_v26 = vrot.slane %v3415_v9, 1  ;;  %v686_v33 = vsel %vm672_vm1, %v657_v18, %v658_v19  ;;  %v623_v36 = vsel %vm607_vm0, %v606_v20, %v591_v12  ;;  %v318_v53 = vmul.f32 %v2416_v44, %v3360_v34  ;;  %v2438_v12 = vld [vmem:[%s3346_s29 + $0x30] sm:$0xff]  }
  0x28   : > { %1068 = vmatprep.mubr.bf16.mxu0 %v3421_v14  ;;  %v3471_v42 = vpack.c.bf16 %v622_v24, %v623_v36  ;;  %v661_v57 = vrot.slane %v3487_v48, 1  ;;  %v621_v58 = vsel %vm607_vm0, %v592_v13, %v593_v49  ;;  %v3510_v59 = vpack.c.bf16 %v3487_v48, %v3432_v22  ;;  %v3038_v36 = vld [vmem:[%s4139_s3 + $0x10] sm:$0xff]  }
  0x29   : > { %v685_v43 = vsel %vm672_vm1, %v658_v19, %v659_v26  ;;  %v684_v46 = vsel %vm672_vm1, %v659_v26, %v660_v37  ;;  %v620_v62 = vsel %vm607_vm0, %v593_v49, %v594_v51  ;;  %v319_v63 = vmul.f32 %v2419_v52, %v3360_v34  ;;  %v3043_v19 = vld [vmem:[%s4139_s3 + $0x1d0] sm:$0xff]  }
  0x2a   : > { %2533 = vmatpush3.bf16.msra.mxu0 %v3026_v30  ;;  %2773 = vmatpush3.bf16.msra.mxu1 %v3025_v28  ;;  %v3033_v28 = vld [vmem:[%s4139_s3 + $0x180] sm:$0xff]   ;;  %v3449_v30 = vpack.c.bf16 %v3415_v9, %v352_v6  ;;  %v3493_v50 = vpack.c.bf16 %v684_v46, %v685_v43  ;;  %v341_v0 = vadd.f32 %v3376_v41, %v318_v53  ;;  %v2420_v3 = vunpack.c.h.bf16 %v2436_v38  ;;  %v3045_v43 = vld [vmem:[%s4139_s3 + $0x190] sm:$0xff]  }
  0x2b   : > { %2534 = vmatprep.subr.bf16.mxu0 %v3027_v32  ;;  %2774 = vmatprep.subr.bf16.mxu1 %v3028_v35  ;;  %v2415_v32 = vunpack.c.l.bf16 %v2435_v10  ;;  %v683_v9 = vsel %vm672_vm1, %v660_v37, %v661_v57  ;;  %v3533_v10 = vpack.c.bf16 %v620_v62, %v621_v58  ;;  %v342_v13 = vadd.f32 %v3376_v41, %v319_v63 }
  0x2c   : > { %v320_v29 = vmul.f32 %v2420_v3, %v3360_v34  ;;  %v2427_v38 = vunpack.c.l.bf16 %v2438_v12  ;;  %v2428_v62 = vunpack.c.h.bf16 %v2438_v12  ;;  %v3042_v12 = vld [vmem:[%s4139_s3 + $0x60] sm:$0xff]  }
  0x2e   : > { %2535 = vmatpush3.bf16.msra.mxu0 %v3029_v47  ;;  %2775 = vmatpush3.bf16.msra.mxu1 %v3028_v35  ;;  %v687_v35 = vsel %vm672_vm1, %v656_v15, %v657_v18  ;;  %v317_v47 = vmul.f32 %v2415_v32, %v3360_v34  ;;  %v3537_v18 = vmax.f32 %v341_v0, 0.0  ;;  %v596_v32 = vrot.slane %v3487_v48, 7 }
  0x2f   : > { %2600 = vmatprep.subr.bf16.mxu1 %v3030_v56  ;;  %2680 = vmatprep.subr.bf16.mxu0 %v3031_v60  ;;  %v3469_v40 = vpack.c.bf16 %v686_v33, %v687_v35  ;;  %v2437_v60 = vld [vmem:[%s3346_s29 + $0x28] sm:$0xff]   ;;  %v3547_v33 = vmax.f32 %v342_v13, 0.0  ;;  %v343_v37 = vadd.f32 %v3376_v41, %v320_v29  ;;  %v323_v39 = vmul.f32 %v2427_v38, %v3360_v34  ;;  %s2109_s29 = sshll.u32 %s260_s15, 4  ;;  %s4071_s29 = int_to_ptr.vmem [resolvable:$true] %s2109_s29 }
  0x30   : > { %v340_v56 = vadd.f32 %v3376_v41, %v317_v47  ;;  %v2423_v11 = vunpack.c.l.bf16 %v2437_v60  ;;  %v2424_v25 = vunpack.c.h.bf16 %v2437_v60  ;;  %v663_v35 = vrot.slane %v3537_v18, 1 }
  0x31   : > { %2776 = vmatprep.mubr.bf16.mxu1 %v3469_v40  ;;  %2443 = vmatmul.mubr.msk.bf16.vlgmr.msra.gmra.mrb[0].mxu0 %vm3427_vm5, %v3471_v42  ;;  %v664_v47 = vrot.slane %v3547_v33, 1  ;;  %v3588_v31 = vmax.f32 %v343_v37, 0.0  ;;  %v346_v3 = vadd.f32 %v3376_v41, %v323_v39  ;;  %v324_v13 = vmul.f32 %v2428_v62, %v3360_v34  ;;  %v3047_v39 = vld [vmem:[%s4139_s3 + $0x28] sm:$0xff]  }
  0x32   : > { %2681 = vmatpush3.bf16.msra.mxu0 %v3033_v28  ;;  %1076 = vmatprep.mubr.bf16.mxu0 %v3449_v30  ;;  %v3529_v6 = vmax.f32 %v340_v56, 0.0  ;;  %v321_v26 = vmul.f32 %v2423_v11, %v3360_v34  ;;  %v595_v28 = vrot.slane %v3432_v22, 7 }
  0x33   : > { %2777 = vmatmul.mubr.msk.bf16.vlgmr.msra.gmra.mrb[0].mxu1 %vm3437_vm6, %v3493_v50  ;;  %2682 = vmatprep.subr.bf16.mxu0 %v3037_v45  ;;  %v680_v56 = vsel %vm672_vm1, %v663_v35, %v664_v47  ;;  %v665_v58 = vrot.slane %v3588_v31, 1  ;;  %v347_v4 = vadd.f32 %v3376_v41, %v324_v13  ;;  %v3712_v62 = vpack.c.bf16 %v3588_v31, %v3547_v33 }
  0x34   : > { %2601 = vmatpush3.bf16.msra.mxu1 %v3032_v17  ;;  %v662_v24 = vrot.slane %v3529_v6, 1  ;;  %v344_v44 = vadd.f32 %v3376_v41, %v321_v26  ;;  %v618_v45 = vsel %vm607_vm0, %v595_v28, %v596_v32  ;;  %v619_v46 = vsel %vm607_vm0, %v594_v51, %v595_v28 }
  0x35   : > { %2602 = vmatprep.subr.bf16.mxu1 %v3034_v21  ;;  %v3593_v53 = vpack.c.bf16 %v618_v45, %v619_v46  ;;  %v3609_v60 = vpack.c.bf16 %v3537_v18, %v3529_v6  ;;  %v679_v11 = vsel %vm672_vm1, %v664_v47, %v665_v58  ;;  %v597_v29 = vrot.slane %v3529_v6, 7  ;;  %v3056_v46 = vld [vmem:[%s4139_s3 + $0x1e8] sm:$0xff]  }
  0x36   : > { %2683 = vmatpush3.bf16.msra.mxu0 %v3039_v54  ;;  %v682_v22 = vsel %vm672_vm1, %v661_v57, %v662_v24  ;;  %v681_v49 = vsel %vm672_vm1, %v662_v24, %v663_v35  ;;  %v3591_v52 = vmax.f32 %v344_v44, 0.0  ;;  %v322_v54 = vmul.f32 %v2424_v25, %v3360_v34  ;;  %v3041_v57 = vld [vmem:[%s4139_s3 + $0x18] sm:$0xff]  }
  0x37   : > { %2684 = vmatprep.subr.bf16.mxu0 %v3043_v19  ;;  %v3572_v21 = vpack.c.bf16 %v682_v22, %v683_v9  ;;  %v3611_v63 = vpack.c.bf16 %v680_v56, %v681_v49  ;;  %v3051_v9 = vld [vmem:[%s4139_s3 + $0x198] sm:$0xff]   ;;  %v348_v25 = vadd.f32 %v3376_v41, %v3411_v5  ;;  %v3642_v26 = vmax.f32 %v346_v3, 0.0  ;;  %v3044_v5 = vld [vmem:[%s4139_s3 + $0x20] sm:$0xff]  }
  0x38   : > { %2603 = vmatpush3.bf16.msra.mxu1 %v3035_v55  ;;  %v3049_v55 = vld [vmem:[%s4139_s3 + $0x1d8] sm:$0xff]   ;;  %v666_v0 = vrot.slane %v3591_v52, 1  ;;  %v598_v6 = vrot.slane %v3537_v18, 7  ;;  %v3055_v18 = vld [vmem:[%s4139_s3 + $0x1a0] sm:$0xff]   ;;  %v3669_v22 = vmax.f32 %v347_v4, 0.0  ;;  %v617_v45 = vsel %vm607_vm0, %v596_v32, %v597_v29 }
  0x39   : > { %1077 = vmatmul.mubr.bf16.gmra.mrb[4].mxu0 %v3533_v10  ;;  %2604 = vmatprep.subr.bf16.mxu1 %v3036_v1  ;;  %v345_v1 = vadd.f32 %v3376_v41, %v322_v54  ;;  %v3651_v35 = vmax.f32 %v348_v25, 0.0  ;;  %v668_v38 = vrot.slane %v3642_v26, 1  ;;  %v3046_v41 = vld [vmem:[%s4139_s3 + $0x68] sm:$0xff]   ;;  %v671_v54 = vrot.slane %v3413_v8, 1 }
  0x3a   : > { %1084 = vmatprep.mubr.bf16.mxu0 %v3510_v59  ;;  %2685 = vmatpush3.bf16.msra.mxu0 %v3045_v43  ;;  %v678_v19 = vsel %vm672_vm1, %v665_v58, %v666_v0  ;;  %v492_v43 = vand.u32 31, %v3401_v61  ;;  %v616_v61 = vsel %vm607_vm0, %v597_v29, %v598_v6  ;;  %v375_v17 = vadd.s32 64, %v3279_v7  ;;  %v3048_v58 = vld [vmem:[%s4139_s3 + $0x70] sm:$0xff]  }
  0x3b   : > { %2780 = vmatprep.mubr.bf16.mxu1 %v3572_v21  ;;  %2686 = vmatprep.subr.bf16.mxu0 %v3049_v55  ;;  %v3640_v34 = vmax.f32 %v345_v1, 0.0  ;;  %v3648_v28 = vpack.c.bf16 %v678_v19, %v679_v11  ;;  %v670_v44 = vrot.slane %v3651_v35, 1  ;;  %v3700_v55 = vpack.c.bf16 %v616_v61, %v617_v45  ;;  %v3050_v1 = vld [vmem:[%s4139_s3 + $0x30] sm:$0xff]   ;;  %v3063_v45 = vld [vmem:[%s4139_s3 + $0x1b8] sm:$0xff]  }
  0x3c   : > { %2605 = vmatpush3.bf16.msra.mxu1 %v3038_v36  ;;  %v3054_v36 = vld [vmem:[%s4139_s3 + $0x1e0] sm:$0xff]   ;;  %v443_v3 = vand.u32 31, %v375_v17  ;;  %v600_v11 = vrot.slane %v3588_v31, 7  ;;  %v688_v25 = vsel %vm672_vm1, %v671_v54, %v656_v15  ;;  %v379_v29 = vadd.s32 96, %v3279_v7  ;;  %v3053_v15 = vld [vmem:[%s4139_s3 + $0x38] sm:$0xff]   ;;  %v3071_v7 = vld [vmem:[%s4139_s3 + $0xb0] sm:$0xff]  }
  0x3d   : > { %2606 = vmatprep.subr.bf16.mxu1 %v3040_v27  ;;  %2781 = vmatmul.mubr.msk.bf16.gmra.mrb[4].mxu1 %vm3581_vm10, %v3611_v63  ;;  %v667_v37 = vrot.slane %v3640_v34, 1  ;;  %v669_v27 = vrot.slane %v3669_v22, 1  ;;  %v673_v13 = vsel %vm672_vm1, %v670_v44, %v671_v54  ;;  %vm2970_vm13 = vcmp.ne.s32.totalorder %v492_v43, 31 }
  0x3e   : > { %2687 = vmatpush3.bf16.msra.mxu0 %v3051_v9  ;;  %2784 = vmatprep.mubr.bf16.mxu1 %v3648_v28  ;;  %v599_v9 = vrot.slane %v3547_v33, 7  ;;  %v3059_v33 = vld [vmem:[%s4139_s3 + $0x1f0] sm:$0xff]   ;;  %v471_v31 = vand.u32 31, %v379_v29  ;;  %v3742_v19 = vpack.c.bf16 %v688_v25, %v673_v13  ;;  %vm2965_vm14 = vcmp.ne.s32.totalorder %v443_v3, 0  ;;  %vm3756_vm15 = vmpackc.low %vm2970_vm13, %vm3174_vm4 }
  0x3f   : > { %v676_v47 = vsel %vm672_vm1, %v667_v37, %v668_v38  ;;  %v677_v49 = vsel %vm672_vm1, %v666_v0, %v667_v37  ;;  %2688 = vmatprep.subr.bf16.mxu0 %v3054_v36  ;;  %v674_v56 = vsel %vm672_vm1, %v669_v27, %v670_v44  ;;  %v3060_v36 = vld [vmem:[%s4139_s3 + $0x1b0] sm:$0xff]   ;;  %v3779_v44 = vpack.c.bf16 %v3640_v34, %v3591_v52 }
  0x40   : > { %2607 = vmatpush3.bf16.msra.mxu1 %v3041_v57  ;;  %v3693_v32 = vpack.c.bf16 %v676_v47, %v677_v49  ;;  %v675_v57 = vsel %vm672_vm1, %v668_v38, %v669_v27  ;;  %v615_v4 = vsel %vm607_vm0, %v598_v6, %v599_v9  ;;  %v3062_v38 = vld [vmem:[%s4139_s3 + $0x1f8] sm:$0xff]   ;;  %v3058_v6 = vld [vmem:[%s4139_s3 + $0x80] sm:$0xff]   ;;  %vm3767_vm1 = vmpackc.low %vm3174_vm4, %vm2965_vm14  ;;  %v602_v61 = vrot.slane %v3640_v34, 7 }
  0x41   : > { %2447 = vmatmul.mubr.msk.bf16.gmra.mrb[8].mxu0 %vm3636_vm11, %v3593_v53  ;;  %2608 = vmatprep.subr.bf16.mxu1 %v3042_v12  ;;  %v3717_v0 = vpack.c.bf16 %v674_v56, %v675_v57  ;;  %v3057_v12 = vld [vmem:[%s4139_s3 + $0x1a8] sm:$0xff]   ;;  %v3789_v47 = vld [vmem:[%s4139_s3 + $0x200] sm:$0xff]   ;;  %v3808_v54 = vpack.c.bf16 %v3669_v22, %v3642_v26  ;;  %v604_v17 = vrot.slane %v3669_v22, 7  ;;  %v3064_v56 = vld [vmem:[%s4139_s3 + $0x90] sm:$0xff]   ;;  %vm2966_vm2 = vcmp.ne.s32.totalorder %v471_v31, 0 }
  0x42   : > { %1092 = vmatprep.mubr.bf16.mxu0 %v3609_v60  ;;  %2689 = vmatpush3.bf16.msra.mxu0 %v3055_v18  ;;  %v3061_v49 = vld [vmem:[%s4139_s3 + $0x88] sm:$0xff]   ;;  %v3066_v22 = vld [vmem:[%s4139_s3 + $0x98] sm:$0xff]   ;;  %vm3829_vm3 = vmpackc.low %vm3174_vm4, %vm2966_vm2  ;;  %v3835_v3 = vpack.c.bf16 %v3413_v8, %v3651_v35 }
  0x43   : > { %2690 = vmatprep.subr.bf16.mxu0 %v3056_v46  ;;  %v3175_v46 = vmov 0   ;;  %v3073_v8 = vld [vmem:[%s4139_s3 + $0xb8] sm:$0xff]  }
  0x44   : > { %2609 = vmatpush3.bf16.msra.mxu1 %v3044_v5  ;;  %v614_v5 = vsel %vm607_vm0, %v599_v9, %v600_v11  ;;  %v605_v9 = vrot.slane %v3651_v35, 7  ;;  %v3070_v35 = vld [vmem:[%s4139_s3 + $0xa8] sm:$0xff]  }
  0x45   : > { %2610 = vmatprep.subr.bf16.mxu1 %v3046_v41  ;;  %2785 = vmatmul.mubr.msk.bf16.gmra.mrb[8].mxu1 %vm3689_vm12, %v3693_v32  ;;  %v3771_v18 = vpack.c.bf16 %v614_v5, %v615_v4  ;;  %v601_v41 = vrot.slane %v3591_v52, 7 }
  0x46   : > { %2788 = vmatprep.mubr.bf16.mxu1 %v3717_v0  ;;  %2691 = vmatpush3.bf16.msra.mxu0 %v3057_v12  ;;  %v608_v12 = vsel %vm607_vm0, %v605_v9, %v606_v20  ;;  %v3069_v20 = vld [vmem:[%s4139_s3 + $0x210] sm:$0xff]  }
  0x47   : > { %2692 = vmatprep.subr.bf16.mxu0 %v3059_v33  ;;  %v612_v52 = vsel %vm607_vm0, %v601_v41, %v602_v61  ;;  %v613_v34 = vsel %vm607_vm0, %v600_v11, %v601_v41  ;;  %v3068_v11 = vld [vmem:[%s4139_s3 + $0xa0] sm:$0xff]  }
  0x48   : > { %2611 = vmatpush3.bf16.msra.mxu1 %v3047_v39  ;;  %v3803_v27 = vpack.c.bf16 %v612_v52, %v613_v34  ;;  %v603_v39 = vrot.slane %v3642_v26, 7 }
  0x49   : > { %1093 = vmatmul.mubr.bf16.gmra.mrb[12].mxu0 %v3700_v55  ;;  %2612 = vmatprep.subr.bf16.mxu1 %v3048_v58 }
  0x4a   : > { %1100 = vmatprep.mubr.bf16.mxu0 %v3712_v62  ;;  %2693 = vmatpush3.bf16.msra.mxu0 %v3060_v36  ;;  %v610_v57 = vsel %vm607_vm0, %v603_v39, %v604_v17  ;;  %v611_v26 = vsel %vm607_vm0, %v602_v61, %v603_v39 }
  0x4b   : > { %2694 = vmatprep.subr.bf16.mxu0 %v3062_v38  ;;  %v3825_v58 = vpack.c.bf16 %v610_v57, %v611_v26 }
  0x4c   : > { %2613 = vmatpush3.bf16.msra.mxu1 %v3050_v1 }
  0x4d   : > { %2614 = vmatprep.subr.bf16.mxu1 %v3052_v2  ;;  %2789 = vmatmul.mubr.msk.bf16.gmra.mrb[12].mxu1 %vm3756_vm15, %v3742_v19 }
  0x4e   : > { %1406 = vmatprep.mubr.bf16.mxu1 %v3175_v46  ;;  %2695 = vmatpush3.bf16.msra.mxu0 %v3063_v45 }
  0x4f   : > { %2824 = vmatprep.subr.bf16.mxu0 %v3789_v47 }
  0x50   : > { %2615 = vmatpush3.bf16.msra.mxu1 %v3053_v15 }
  0x51   : > { %2451 = vmatmul.mubr.msk.bf16.gmra.mrb[16].mxu0 %vm3767_vm1, %v3771_v18  ;;  %2792 = vmatprep.subr.bf16.mxu1 %v3058_v6 }
  0x52   : > { %1108 = vmatprep.mubr.bf16.mxu0 %v3779_v44 }
  0x55   : > { %1407 = vmatmul.mubr.bf16.vlgmr.msra.gmra.mrb[16].mxu1 %v3175_v46 }
  0x56   : > { %1414 = vmatprep.mubr.bf16.mxu1 %v3175_v46  ;;  %2793 = vmatpush3.bf16.msra.mxu1 %v3058_v6 }
  0x57   : > { %2794 = vmatprep.subr.bf16.mxu1 %v3061_v49 }
  0x59   : > { %1109 = vmatmul.mubr.bf16.gmra.mrb[20].mxu0 %v3803_v27 }
  0x5a   : > { %1116 = vmatprep.mubr.bf16.mxu0 %v3808_v54  ;;  %2795 = vmatpush3.bf16.msra.mxu1 %v3061_v49 }
  0x5b   : > { %2796 = vmatprep.subr.bf16.mxu1 %v3064_v56 }
  0x5d   : > { %1415 = vmatmul.mubr.bf16.gmra.mrb[20].mxu1 %v3175_v46 }
  0x5e   : > { %1422 = vmatprep.mubr.bf16.mxu1 %v3421_v14  ;;  %2797 = vmatpush3.bf16.msra.mxu1 %v3064_v56  ;;  %v609_v14 = vsel %vm607_vm0, %v604_v17, %v605_v9 }
  0x5f   : > { %2798 = vmatprep.subr.bf16.mxu1 %v3066_v22  ;;  %v724_v13 = vpack.c.bf16 %v608_v12, %v609_v14 }
  0x61   : > { %2455 = vmatmul.mubr.msk.bf16.gmra.mrb[24].mxu0 %vm3829_vm3, %v3825_v58 }
  0x62   : > { %1124 = vmatprep.mubr.bf16.mxu0 %v3835_v3  ;;  %2799 = vmatpush3.bf16.msra.mxu1 %v3066_v22 }
  0x63   : > { %2800 = vmatprep.subr.bf16.mxu1 %v3068_v11 }
  0x65   : > { %2475 = vmatmul.mubr.msk.bf16.gmra.mrb[24].mxu1 %vm3427_vm5, %v3471_v42  ;;  %v3074_v42 = vld [vmem:[%s4139_s3 + $0x220] sm:$0xff]  }
  0x66   : > { %1430 = vmatprep.mubr.bf16.mxu1 %v3449_v30  ;;  %2801 = vmatpush3.bf16.msra.mxu1 %v3068_v11  ;;  %v3072_v30 = vld [vmem:[%s4139_s3 + $0x218] sm:$0xff]  }
  0x67   : > { %2802 = vmatprep.subr.bf16.mxu1 %v3070_v35 }
  0x69   : > { %1125 = vmatmul.mubr.bf16.gmra.mrb[28].mxu0 %v724_v13 }
  0x6a   : > { %1817 = vmatprep.mubr.bf16.mxu0 %v3510_v59  ;;  %2803 = vmatpush3.bf16.msra.mxu1 %v3070_v35 }
  0x6b   : > { %2804 = vmatprep.subr.bf16.mxu1 %v3071_v7 }
  0x6d   : > { %1431 = vmatmul.mubr.bf16.gmra.mrb[28].mxu1 %v3533_v10  ;;  %v3076_v10 = vld [vmem:[%s4139_s3 + $0x230] sm:$0xff]  }
  0x6e   : > { %1438 = vmatprep.mubr.bf16.mxu1 %v3510_v59  ;;  %2805 = vmatpush3.bf16.msra.mxu1 %v3071_v7  ;;  %v3075_v59 = vld [vmem:[%s4139_s3 + $0x228] sm:$0xff]  }
  0x6f   : > { %2806 = vmatprep.subr.bf16.mxu1 %v3073_v8 }
  0x71   : > { %2499 = vmatmul.mubr.msk.bf16.vlgmr.msra.gmra.mrb[32].mxu0 %vm3636_vm11, %v3593_v53 }
  0x72   : > { %2825 = vmatpush3.bf16.msra.mxu0 %v3789_v47  ;;  %1825 = vmatprep.mubr.bf16.mxu0 %v3609_v60 }
  0x73   : > { %2826 = vmatprep.subr.bf16.mxu0 %v3067_v16  ;;  %2807 = vmatpush3.bf16.msra.mxu1 %v3073_v8 }
  0x74   : > { %2856 = vmatprep.subr.bf16.mxu1 %v3789_v47 }
  0x75   : > { %2479 = vmatmul.mubr.msk.bf16.gmra.mrb[32].mxu1 %vm3636_vm11, %v3593_v53  ;;  %v3077_v53 = vld [vmem:[%s4139_s3 + $0x238] sm:$0xff]  }
  0x76   : > { %2827 = vmatpush3.bf16.msra.mxu0 %v3067_v16  ;;  %1446 = vmatprep.mubr.bf16.mxu1 %v3609_v60 }
  0x77   : > { %2828 = vmatprep.subr.bf16.mxu0 %v3069_v20 }
  0x79   : > { %1826 = vmatmul.mubr.bf16.gmra.mrb[36].mxu0 %v3700_v55 }
  0x7a   : > { %1833 = vmatprep.mubr.bf16.mxu0 %v3712_v62  ;;  %2829 = vmatpush3.bf16.msra.mxu0 %v3069_v20 }
  0x7b   : > { %2830 = vmatprep.subr.bf16.mxu0 %v3072_v30 }
  0x7d   : > { %1447 = vmatmul.mubr.bf16.gmra.mrb[36].mxu1 %v3700_v55 }
  0x7e   : > { %2831 = vmatpush3.bf16.msra.mxu0 %v3072_v30  ;;  %1454 = vmatprep.mubr.bf16.mxu1 %v3712_v62 }
  0x7f   : > { %2832 = vmatprep.subr.bf16.mxu0 %v3074_v42 }
  0x81   : > { %2503 = vmatmul.mubr.msk.bf16.gmra.mrb[40].mxu0 %vm3767_vm1, %v3771_v18 }
  0x82   : > { %1841 = vmatprep.mubr.bf16.mxu0 %v3779_v44  ;;  %2833 = vmatpush3.bf16.msra.mxu0 %v3074_v42 }
  0x83   : > { %2834 = vmatprep.subr.bf16.mxu0 %v3075_v59 }
  0x85   : > { %2483 = vmatmul.mubr.msk.bf16.gmra.mrb[40].mxu1 %vm3767_vm1, %v3771_v18 }
  0x86   : > { %2835 = vmatpush3.bf16.msra.mxu0 %v3075_v59  ;;  %1462 = vmatprep.mubr.bf16.mxu1 %v3779_v44 }
  0x87   : > { %2836 = vmatprep.subr.bf16.mxu0 %v3076_v10 }
  0x89   : > { %1842 = vmatmul.mubr.bf16.gmra.mrb[44].mxu0 %v3803_v27 }
  0x8a   : > { %1849 = vmatprep.mubr.bf16.mxu0 %v3808_v54  ;;  %2837 = vmatpush3.bf16.msra.mxu0 %v3076_v10 }
  0x8b   : > { %2838 = vmatprep.subr.bf16.mxu0 %v3077_v53 }
  0x8d   : > { %1463 = vmatmul.mubr.bf16.gmra.mrb[44].mxu1 %v3803_v27 }
  0x8e   : > { %2839 = vmatpush3.bf16.msra.mxu0 %v3077_v53  ;;  %2808 = vmatprep.mubr.bf16.mxu1 %v3175_v46 }
  0x91   : > { %2507 = vmatmul.mubr.msk.bf16.gmra.mrb[48].mxu0 %vm3829_vm3, %v3825_v58 }
  0x92   : > { %1857 = vmatprep.mubr.bf16.mxu0 %v3835_v3 }
  0x95   : > { %2809 = vmatmul.mubr.bf16.vlgmr.msra.gmra.mrb[0].mxu1 %v3175_v46 }
  0x96   : > { %2864 = vmatpush3.bf16.msra.mxu1 %v3789_v47  ;;  %2812 = vmatprep.mubr.bf16.mxu1 %v3469_v40 }
  0x97   : > { %2857 = vmatprep.subr.bf16.mxu1 %v3067_v16 }
  0x99   : > { %1858 = vmatmul.mubr.bf16.gmra.mrb[52].mxu0 %v724_v13 }
  0x9a   : > { %1865 = vmatprep.mubr.bf16.mxu0 %v3175_v46  ;;  %2865 = vmatpush3.bf16.msra.mxu1 %v3067_v16 }
  0x9b   : > { %2858 = vmatprep.subr.bf16.mxu1 %v3069_v20 }
  0x9d   : > { %2813 = vmatmul.mubr.msk.bf16.gmra.mrb[4].mxu1 %vm3437_vm6, %v3493_v50 }
  0x9e   : > { %2866 = vmatpush3.bf16.msra.mxu1 %v3069_v20  ;;  %2816 = vmatprep.mubr.bf16.mxu1 %v3572_v21 }
  0x9f   : > { %2859 = vmatprep.subr.bf16.mxu1 %v3072_v30 }
  0xa1   : > { %1866 = vmatmul.mubr.bf16.gmra.mrb[56].mxu0 %v3175_v46 }
  0xa2   : > { %1873 = vmatprep.mubr.bf16.mxu0 %v3175_v46  ;;  %2867 = vmatpush3.bf16.msra.mxu1 %v3072_v30 }
  0xa3   : > { %2860 = vmatprep.subr.bf16.mxu1 %v3074_v42 }
  0xa5   : > { %2817 = vmatmul.mubr.msk.bf16.gmra.mrb[8].mxu1 %vm3581_vm10, %v3611_v63 }
  0xa6   : > { %2868 = vmatpush3.bf16.msra.mxu1 %v3074_v42  ;;  %2820 = vmatprep.mubr.bf16.mxu1 %v3648_v28 }
  0xa7   : > { %2861 = vmatprep.subr.bf16.mxu1 %v3075_v59 }
  0xa9   : > { %1874 = vmatmul.mubr.bf16.gmra.mrb[60].mxu0 %v3175_v46 }
  0xaa   : > { %2840 = vmatprep.mubr.bf16.mxu0 %v3572_v21  ;;  %2869 = vmatpush3.bf16.msra.mxu1 %v3075_v59 }
  0xab   : > { %2862 = vmatprep.subr.bf16.mxu1 %v3076_v10 }
  0xad   : > { %2821 = vmatmul.mubr.msk.bf16.gmra.mrb[12].mxu1 %vm3689_vm12, %v3693_v32 }
  0xae   : > { %2870 = vmatpush3.bf16.msra.mxu1 %v3076_v10  ;;  %2848 = vmatprep.mubr.bf16.mxu1 %v3717_v0 }
  0xaf   : > { %2863 = vmatprep.subr.bf16.mxu1 %v3077_v53 }
  0xb1   : > { %2841 = vmatmul.mubr.msk.bf16.vlgmr.msra.gmra.mrb[64].mxu0 %vm3581_vm10, %v3611_v63 }
  0xb2   : > { %2844 = vmatprep.mubr.bf16.mxu0 %v3648_v28  ;;  %2871 = vmatpush3.bf16.msra.mxu1 %v3077_v53 }
  0xb5   : > { %2849 = vmatmul.mubr.msk.bf16.vlgmr.msra.gmra.mrb[8].mxu1 %vm3756_vm15, %v3742_v19 }
  0xb6   : > { %2852 = vmatprep.mubr.bf16.mxu1 %v3175_v46 }
  0xb9   : > { %2845 = vmatmul.mubr.msk.bf16.gmra.mrb[68].mxu0 %vm3689_vm12, %v3693_v32 }
  0xbd   : > { %2853 = vmatmul.mubr.bf16.gmra.mrb[12].mxu1 %v3175_v46 }
 0x104   : > { %v2536_v23 = vpop.f32.mrb[0].mxu0 }
 0x105   : > { %v2537_v40 = vpop.f32.mrb[1].mxu0 }
 0x106   : > { %v2538_v50 = vadd.f32 %v2537_v40, %v2536_v23  ;;  %v2539_v21 = vpop.f32.mrb[2].mxu0 }
 0x107   : > { %v2540_v51 = vpop.f32.mrb[3].mxu0 }
 0x108   : > { %v2541_v60 = vadd.f32 %v2540_v51, %v2539_v21 }
 0x10c   : > { %v2542_v63 = vpop.f32.mrb[4].mxu0 }
 0x10d   : > { %v2543_v24 = vpop.f32.mrb[5].mxu0 }
 0x10e   : > { %v2544_v28 = vadd.f32 %v2543_v24, %v2542_v63  ;;  %v2545_v55 = vpop.f32.mrb[6].mxu0 }
 0x10f   : > { %v2546_v62 = vpop.f32.mrb[7].mxu0 }
 0x110   : > { %v2547_v0 = vadd.f32 %v2546_v62, %v2545_v55 }
 0x114   : > { %v2548_v25 = vpop.f32.mrb[8].mxu0 }
 0x115   : > { %v2549_v29 = vpop.f32.mrb[9].mxu0 }
 0x116   : > { %v2550_v33 = vadd.f32 %v2549_v29, %v2548_v25  ;;  %v2551_v2 = vpop.f32.mrb[10].mxu0 }
 0x117   : > { %v2552_v48 = vpop.f32.mrb[11].mxu0 }
 0x118   : > { %v2553_v32 = vadd.f32 %v2552_v48, %v2551_v2 }
 0x11c   : > { %v2554_v31 = vpop.f32.mrb[12].mxu0 }
 0x11d   : > { %v2555_v19 = vpop.f32.mrb[13].mxu0 }
 0x11e   : > { %v2556_v15 = vadd.f32 %v2555_v19, %v2554_v31  ;;  %v2557_v5 = vpop.f32.mrb[14].mxu0 }
 0x11f   : > { %v2558_v4 = vpop.f32.mrb[15].mxu0 }
 0x120   : > { %v2559_v36 = vadd.f32 %v2558_v4, %v2557_v5 }
 0x124   : > { %v2560_v37 = vpop.f32.mrb[16].mxu0 }
 0x125   : > { %v2561_v38 = vpop.f32.mrb[17].mxu0 }
 0x126   : > { %v3951_v6 = vadd.f32 %v2561_v38, %v2560_v37  ;;  %v2563_v43 = vpop.f32.mrb[18].mxu0 }
 0x127   : > { %v2564_v18 = vpop.f32.mrb[19].mxu0 }
 0x128   : > { %v3953_v41 = vadd.f32 %v2564_v18, %v2563_v43  ;;  %v2616_v44 = vpop.f32.mrb[16].mxu1 }
 0x129   : > { %v2617_v61 = vpop.f32.mrb[17].mxu1 }
 0x12a   : > { %v2618_v45 = vadd.f32 %v2617_v61, %v2616_v44  ;;  %v2619_v46 = vpop.f32.mrb[18].mxu1 }
 0x12b   : > { %v2620_v47 = vpop.f32.mrb[19].mxu1 }
 0x12c   : > { %v2566_v52 = vpop.f32.mrb[20].mxu0  ;;  %v2621_v34 = vadd.f32 %v2620_v47, %v2619_v46  ;;  %v3955_v27 = vadd.f32 %v2618_v45, %v2538_v50 }
 0x12d   : > { %v2567_v49 = vpop.f32.mrb[21].mxu0 }
 0x12e   : > { %v3957_v54 = vadd.f32 %v2567_v49, %v2566_v52  ;;  %v2569_v39 = vpop.f32.mrb[22].mxu0  ;;  %v3959_v56 = vadd.f32 %v2621_v34, %v2541_v60 }
 0x12f   : > { %v2570_v17 = vpop.f32.mrb[23].mxu0 }
 0x130   : > { %v3961_v57 = vadd.f32 %v2570_v17, %v2569_v39  ;;  %v2622_v26 = vpop.f32.mrb[20].mxu1 }
 0x131   : > { %v2623_v22 = vpop.f32.mrb[21].mxu1 }
 0x132   : > { %v2624_v58 = vadd.f32 %v2623_v22, %v2622_v26  ;;  %v2625_v1 = vpop.f32.mrb[22].mxu1 }
 0x133   : > { %v2626_v3 = vpop.f32.mrb[23].mxu1 }
 0x134   : > { %v2572_v9 = vpop.f32.mrb[24].mxu0  ;;  %v2627_v11 = vadd.f32 %v2626_v3, %v2625_v1  ;;  %v3963_v14 = vadd.f32 %v2624_v58, %v2544_v28 }
 0x135   : > { %v2573_v12 = vpop.f32.mrb[25].mxu0 }
 0x136   : > { %v3965_v35 = vadd.f32 %v2573_v12, %v2572_v9  ;;  %v2575_v13 = vpop.f32.mrb[26].mxu0  ;;  %v3967_v8 = vadd.f32 %v2627_v11, %v2547_v0 }
 0x137   : > { %v2576_v7 = vpop.f32.mrb[27].mxu0 }
 0x138   : > { %v3969_v16 = vadd.f32 %v2576_v7, %v2575_v13  ;;  %v2628_v20 = vpop.f32.mrb[24].mxu1 }
 0x139   : > { %v2629_v30 = vpop.f32.mrb[25].mxu1 }
 0x13a   : > { %v2630_v42 = vadd.f32 %v2629_v30, %v2628_v20  ;;  %v2631_v59 = vpop.f32.mrb[26].mxu1 }
 0x13b   : > { %v2632_v10 = vpop.f32.mrb[27].mxu1 }
 0x13c   : > { %v2578_v53 = vpop.f32.mrb[28].mxu0  ;;  %v2633_v23 = vadd.f32 %v2632_v10, %v2631_v59  ;;  %v3971_v50 = vadd.f32 %v2630_v42, %v2550_v33 }
 0x13d   : > { %v2579_v40 = vpop.f32.mrb[29].mxu0 }
 0x13e   : > { %v3973_v21 = vadd.f32 %v2579_v40, %v2578_v53  ;;  %v2581_v51 = vpop.f32.mrb[30].mxu0  ;;  %v3975_v63 = vadd.f32 %v2633_v23, %v2553_v32 }
 0x13f   : > { %v2582_v60 = vpop.f32.mrb[31].mxu0 }
 0x140   : > { %v3977_v24 = vadd.f32 %v2582_v60, %v2581_v51  ;;  %v2634_v28 = vpop.f32.mrb[28].mxu1 }
 0x141   : > { %v2635_v55 = vpop.f32.mrb[29].mxu1 }
 0x142   : > { %v2636_v62 = vadd.f32 %v2635_v55, %v2634_v28  ;;  %v2637_v0 = vpop.f32.mrb[30].mxu1 }
 0x143   : > { %v2638_v25 = vpop.f32.mrb[31].mxu1 }
 0x144   : > { %v2696_v29 = vpop.f32.mrb[32].mxu0  ;;  %v2639_v2 = vadd.f32 %v2638_v25, %v2637_v0  ;;  %v3979_v31 = vadd.f32 %v2636_v62, %v2556_v15 }
 0x145   : > { %v2697_v48 = vpop.f32.mrb[33].mxu0 }
 0x146   : > { %v3981_v33 = vadd.f32 %v2697_v48, %v2696_v29  ;;  %v2699_v19 = vpop.f32.mrb[34].mxu0  ;;  %v3983_v4 = vadd.f32 %v2639_v2, %v2559_v36 }
 0x147   : > { %v2700_v5 = vpop.f32.mrb[35].mxu0 }
 0x148   : > { %v3985_v32 = vadd.f32 %v2700_v5, %v2699_v19  ;;  %v2640_v37 = vpop.f32.mrb[32].mxu1 }
 0x149   : > { %v2641_v38 = vpop.f32.mrb[33].mxu1 }
 0x14a   : > { %v2642_v43 = vadd.f32 %v2641_v38, %v2640_v37  ;;  %v2643_v18 = vpop.f32.mrb[34].mxu1 }
 0x14b   : > { %v2644_v44 = vpop.f32.mrb[35].mxu1 }
 0x14c   : > { %v2702_v61 = vpop.f32.mrb[36].mxu0  ;;  %v2907_v45 = vadd.f32 %v2642_v43, %v3951_v6  ;;  %v2645_v46 = vadd.f32 %v2644_v44, %v2643_v18 }
 0x14d   : > { %v2703_v47 = vpop.f32.mrb[37].mxu0 }
 0x14e   : > { %v2704_v15 = vadd.f32 %v2703_v47, %v2702_v61  ;;  %v2705_v52 = vpop.f32.mrb[38].mxu0  ;;  %v2913_v34 = vadd.f32 %v2645_v46, %v3953_v41 }
 0x14f   : > { %v2706_v49 = vpop.f32.mrb[39].mxu0 }
 0x150   : > { %v2707_v39 = vadd.f32 %v2706_v49, %v2705_v52  ;;  %v2646_v36 = vpop.f32.mrb[36].mxu1 }
 0x151   : > { %v2647_v17 = vpop.f32.mrb[37].mxu1 }
 0x152   : > { %v2648_v26 = vadd.f32 %v2647_v17, %v2646_v36  ;;  %v2649_v22 = vpop.f32.mrb[38].mxu1 }
 0x153   : > { %v2650_v58 = vpop.f32.mrb[39].mxu1 }
 0x154   : > { %v2708_v1 = vpop.f32.mrb[40].mxu0  ;;  %v2904_v3 = vadd.f32 %v2648_v26, %v3957_v54  ;;  %v2651_v9 = vadd.f32 %v2650_v58, %v2649_v22 }
 0x155   : > { %v2709_v11 = vpop.f32.mrb[41].mxu0 }
 0x156   : > { %v3990_v12 = vadd.f32 %v2709_v11, %v2708_v1  ;;  %v2711_v6 = vpop.f32.mrb[42].mxu0  ;;  %v2910_v13 = vadd.f32 %v2651_v9, %v3961_v57 }
 0x157   : > { %v2712_v7 = vpop.f32.mrb[43].mxu0 }
 0x158   : > { %v3993_v20 = vadd.f32 %v2712_v7, %v2711_v6  ;;  %v2652_v41 = vpop.f32.mrb[40].mxu1 }
 0x159   : > { %v2653_v30 = vpop.f32.mrb[41].mxu1 }
 0x15a   : > { %v2654_v42 = vadd.f32 %v2653_v30, %v2652_v41  ;;  %v2655_v59 = vpop.f32.mrb[42].mxu1 }
 0x15b   : > { %v2656_v10 = vpop.f32.mrb[43].mxu1 }
 0x15c   : > { %v2714_v53 = vpop.f32.mrb[44].mxu0  ;;  %v2919_v23 = vadd.f32 %v2654_v42, %v3965_v35  ;;  %v2657_v40 = vadd.f32 %v2656_v10, %v2655_v59 }
 0x15d   : > { %v2715_v54 = vpop.f32.mrb[45].mxu0 }
 0x15e   : > { %v2716_v51 = vadd.f32 %v2715_v54, %v2714_v53  ;;  %v2717_v60 = vpop.f32.mrb[46].mxu0  ;;  %v2925_v28 = vadd.f32 %v2657_v40, %v3969_v16 }
 0x15f   : > { %v2718_v55 = vpop.f32.mrb[47].mxu0 }
 0x160   : > { %v2719_v62 = vadd.f32 %v2718_v55, %v2717_v60  ;;  %v2658_v57 = vpop.f32.mrb[44].mxu1 }
 0x161   : > { %v2659_v0 = vpop.f32.mrb[45].mxu1 }
 0x162   : > { %v2660_v25 = vadd.f32 %v2659_v0, %v2658_v57  ;;  %v2661_v29 = vpop.f32.mrb[46].mxu1 }
 0x163   : > { %v2662_v2 = vpop.f32.mrb[47].mxu1 }
 0x164   : > { %v2720_v48 = vpop.f32.mrb[48].mxu0  ;;  %v2916_v19 = vadd.f32 %v2660_v25, %v3973_v21  ;;  %v2663_v5 = vadd.f32 %v2662_v2, %v2661_v29 }
 0x165   : > { %v2721_v37 = vpop.f32.mrb[49].mxu0 }
 0x166   : > { %v2722_v38 = vadd.f32 %v2721_v37, %v2720_v48  ;;  %v2723_v35 = vpop.f32.mrb[50].mxu0  ;;  %v2922_v43 = vadd.f32 %v2663_v5, %v3977_v24 }
 0x167   : > { %v2724_v18 = vpop.f32.mrb[51].mxu0 }
 0x168   : > { %v2725_v44 = vadd.f32 %v2724_v18, %v2723_v35  ;;  %v3999_v61 = vadd.f32 %v2907_v45, %v2722_v38  ;;  %v2810_v16 = vpop.f32.mrb[0].mxu1 }
 0x169   : > { %v2873_v46 = vadd.f32 %v3963_v14, %v2810_v16  ;;  %v1505_v47 = vpop.f32.mrb[1].mxu1 }
 0x16a   : > { %v4002_v52 = vadd.f32 %v2913_v34, %v2725_v44  ;;  %v2877_v49 = vadd.f32 %v3955_v27, %v1505_v47  ;;  %v2811_v36 = vpop.f32.mrb[2].mxu1 }
 0x16b   : > { %v2881_v21 = vadd.f32 %v3967_v8, %v2811_v36  ;;  %v1508_v17 = vpop.f32.mrb[3].mxu1  ;;  %v2874_v22 = vadd.f32 %v2873_v46, %v2704_v15 }
 0x16c   : > { %v2726_v26 = vpop.f32.mrb[52].mxu0  ;;  %v2885_v24 = vadd.f32 %v3959_v56, %v1508_v17  ;;  %v2878_v45 = vadd.f32 %v2877_v49, %v3981_v33 }
 0x16d   : > { %v2727_v58 = vpop.f32.mrb[53].mxu0  ;;  %v2882_v11 = vadd.f32 %v2881_v21, %v2707_v39 }
 0x16e   : > { %v2728_v1 = vadd.f32 %v2727_v58, %v2726_v26  ;;  %v2729_v9 = vpop.f32.mrb[54].mxu0  ;;  %v2886_v34 = vadd.f32 %v2885_v24, %v3985_v32 }
 0x16f   : > { %v2730_v14 = vpop.f32.mrb[55].mxu0 }
 0x170   : > { %v2731_v6 = vadd.f32 %v2730_v14, %v2729_v9  ;;  %v2905_v7 = vadd.f32 %v2904_v3, %v2728_v1  ;;  %v2814_v27 = vpop.f32.mrb[4].mxu1 }
 0x171   : > { %v2889_v41 = vadd.f32 %v3979_v31, %v2814_v27  ;;  %v1521_v8 = vpop.f32.mrb[5].mxu1 }
 0x172   : > { %v2911_v30 = vadd.f32 %v2910_v13, %v2731_v6  ;;  %v2893_v15 = vadd.f32 %v3971_v50, %v1521_v8  ;;  %v2815_v42 = vpop.f32.mrb[6].mxu1 }
 0x173   : > { %v2897_v56 = vadd.f32 %v3983_v4, %v2815_v42  ;;  %v1524_v59 = vpop.f32.mrb[7].mxu1  ;;  %v2890_v10 = vadd.f32 %v2889_v41, %v2716_v51 }
 0x174   : > { %v2732_v33 = vpop.f32.mrb[56].mxu0  ;;  %v2901_v39 = vadd.f32 %v3975_v63, %v1524_v59  ;;  %v2894_v32 = vadd.f32 %v2893_v15, %v3990_v12 }
 0x175   : > { %v2733_v53 = vpop.f32.mrb[57].mxu0  ;;  %v2898_v54 = vadd.f32 %v2897_v56, %v2719_v62 }
 0x176   : > { %v2734_v3 = vadd.f32 %v2733_v53, %v2732_v33  ;;  %v2735_v40 = vpop.f32.mrb[58].mxu0  ;;  %v2902_v13 = vadd.f32 %v2901_v39, %v3993_v20 }
 0x177   : > { %v2736_v31 = vpop.f32.mrb[59].mxu0 }
 0x178   : > { %v2737_v60 = vadd.f32 %v2736_v31, %v2735_v40  ;;  %v4015_v50 = vadd.f32 %v2919_v23, %v2734_v3 }
 0x17a   : > { %v4017_v55 = vadd.f32 %v2925_v28, %v2737_v60 }
 0x17c   : > { %v2738_v4 = vpop.f32.mrb[60].mxu0 }
 0x17d   : > { %v2739_v57 = vpop.f32.mrb[61].mxu0 }
 0x17e   : > { %v2740_v51 = vadd.f32 %v2739_v57, %v2738_v4  ;;  %v2741_v0 = vpop.f32.mrb[62].mxu0 }
 0x17f   : > { %v2742_v63 = vpop.f32.mrb[63].mxu0 }
 0x180   : > { %v2743_v25 = vadd.f32 %v2742_v63, %v2741_v0  ;;  %v2917_v29 = vadd.f32 %v2916_v19, %v2740_v51 }
 0x182   : > { %v2923_v12 = vadd.f32 %v2922_v43, %v2743_v25 }
 0x184   : > { %v2842_v20 = vpop.f32.mrb[64].mxu0 }
 0x185   : > { %v2875_v23 = vadd.f32 %v2874_v22, %v2842_v20  ;;  %v1916_v28 = vpop.f32.mrb[65].mxu0 }
 0x186   : > { %v2879_v62 = vadd.f32 %v2878_v45, %v1916_v28  ;;  %v2843_v2 = vpop.f32.mrb[66].mxu0 }
 0x187   : > { %1997 = vst [vmem:[%s4023_s11 + $0x10] sm:$0xff] %v2875_v23  ;;  %v2883_v48 = vadd.f32 %v2882_v11, %v2843_v2  ;;  %v1919_v19 = vpop.f32.mrb[67].mxu0  ;;  %v2035_v47 = vmul.f32 %v2875_v23, %v2875_v23 }
 0x188   : > { %1995 = vst [vmem:[%s4023_s11] sm:$0xff] %v2879_v62  ;;  %v2887_v5 = vadd.f32 %v2886_v34, %v1919_v19  ;;  %v2850_v37 = vpop.f32.mrb[8].mxu1  ;;  %v2033_v35 = vmul.f32 %v2879_v62, %v2879_v62 }
 0x189   : > { %1998 = vst [vmem:[%s4023_s11 + $0x18] sm:$0xff] %v2883_v48  ;;  %v4028_v38 = vadd.f32 %v2905_v7, %v2850_v37  ;;  %v1948_v43 = vpop.f32.mrb[9].mxu1  ;;  %v2036_v45 = vmul.f32 %v2883_v48, %v2883_v48 }
 0x18a   : > { %1996 = vst [vmem:[%s4023_s11 + $0x8] sm:$0xff] %v2887_v5  ;;  %v2011_v18 = vadd.f32 %v2887_v5, %v2879_v62  ;;  %v2034_v44 = vmul.f32 %v2887_v5, %v2887_v5  ;;  %v2909_v16 = vadd.f32 %v3999_v61, %v1948_v43  ;;  %v2851_v46 = vpop.f32.mrb[10].mxu1 }
 0x18b   : > { %2005 = vst [vmem:[%s4023_s11 + $0x50] sm:$0xff] %v4028_v38  ;;  %v2912_v49 = vadd.f32 %v2911_v30, %v2851_v46  ;;  %v1951_v17 = vpop.f32.mrb[11].mxu1  ;;  %v2043_v63 = vmul.f32 %v4028_v38, %v4028_v38 }
 0x18c   : > { %v2012_v36 = vadd.f32 %v2875_v23, %v2011_v18  ;;  %v2049_v21 = vadd.f32 %v2034_v44, %v2033_v35  ;;  %v2846_v26 = vpop.f32.mrb[68].mxu0  ;;  %2003 = vst [vmem:[%s4023_s11 + $0x40] sm:$0xff] %v2909_v16  ;;  %v2915_v22 = vadd.f32 %v4002_v52, %v1951_v17  ;;  %v2041_v60 = vmul.f32 %v2909_v16, %v2909_v16 }
 0x18d   : > { %v2891_v24 = vadd.f32 %v2890_v10, %v2846_v26  ;;  %v1932_v58 = vpop.f32.mrb[69].mxu0  ;;  %2006 = vst [vmem:[%s4023_s11 + $0x58] sm:$0xff] %v2912_v49 }
 0x18e   : > { %v2050_v61 = vadd.f32 %v2049_v21, %v2035_v47  ;;  %v2895_v1 = vadd.f32 %v2894_v32, %v1932_v58  ;;  %v2013_v9 = vadd.f32 %v2883_v48, %v2012_v36  ;;  %v2847_v11 = vpop.f32.mrb[70].mxu0  ;;  %2004 = vst [vmem:[%s4023_s11 + $0x48] sm:$0xff] %v2915_v22  ;;  %v2042_v51 = vmul.f32 %v2915_v22, %v2915_v22 }
 0x18f   : > { %2001 = vst [vmem:[%s4023_s11 + $0x30] sm:$0xff] %v2891_v24  ;;  %v2899_v14 = vadd.f32 %v2898_v54, %v2847_v11  ;;  %v1935_v34 = vpop.f32.mrb[71].mxu0  ;;  %v2039_v10 = vmul.f32 %v2891_v24, %v2891_v24 }
 0x190   : > { %1999 = vst [vmem:[%s4023_s11 + $0x20] sm:$0xff] %v2895_v1  ;;  %v2014_v6 = vadd.f32 %v2895_v1, %v2013_v9  ;;  %v2037_v7 = vmul.f32 %v2895_v1, %v2895_v1  ;;  %v2051_v27 = vadd.f32 %v2050_v61, %v2036_v45  ;;  %v2903_v52 = vadd.f32 %v2902_v13, %v1935_v34  ;;  %v2854_v41 = vpop.f32.mrb[12].mxu1 }
 0x191   : > { %2002 = vst [vmem:[%s4023_s11 + $0x38] sm:$0xff] %v2899_v14  ;;  %v2918_v8 = vadd.f32 %v2917_v29, %v2854_v41  ;;  %v1964_v15 = vpop.f32.mrb[13].mxu1  ;;  %v2040_v54 = vmul.f32 %v2899_v14, %v2899_v14 }
 0x192   : > { %v2052_v30 = vadd.f32 %v2051_v27, %v2037_v7  ;;  %2000 = vst [vmem:[%s4023_s11 + $0x28] sm:$0xff] %v2903_v52  ;;  %v2015_v42 = vadd.f32 %v2903_v52, %v2014_v6  ;;  %v2038_v56 = vmul.f32 %v2903_v52, %v2903_v52  ;;  %v2921_v59 = vadd.f32 %v4015_v50, %v1964_v15  ;;  %v2855_v33 = vpop.f32.mrb[14].mxu1 }
 0x193   : > { %2009 = vst [vmem:[%s4023_s11 + $0x70] sm:$0xff] %v2918_v8  ;;  %v2924_v39 = vadd.f32 %v2923_v12, %v2855_v33  ;;  %v1967_v3 = vpop.f32.mrb[15].mxu1  ;;  %v2044_v12 = vmul.f32 %v2912_v49, %v2912_v49  ;;  %v2047_v5 = vmul.f32 %v2918_v8, %v2918_v8 }
 0x194   : > { %v2016_v53 = vadd.f32 %v2891_v24, %v2015_v42  ;;  %v2053_v32 = vadd.f32 %v2052_v30, %v2038_v56  ;;  %2007 = vst [vmem:[%s4023_s11 + $0x60] sm:$0xff] %v2921_v59  ;;  %v2927_v40 = vadd.f32 %v4017_v55, %v1967_v3  ;;  %v2045_v23 = vmul.f32 %v2921_v59, %v2921_v59 }
 0x195   : > { %2010 = vst [vmem:[%s4023_s11 + $0x78] sm:$0xff] %v2924_v39  ;;  %v2048_v43 = vmul.f32 %v2924_v39, %v2924_v39 }
 0x196   : > { %v2017_v31 = vadd.f32 %v2899_v14, %v2016_v53  ;;  %v2054_v13 = vadd.f32 %v2053_v32, %v2039_v10  ;;  %2008 = vst [vmem:[%s4023_s11 + $0x68] sm:$0xff] %v2927_v40  ;;  %v2046_v48 = vmul.f32 %v2927_v40, %v2927_v40  ;;  %s3082_s11 = sshll.u32 %s3176_s10, 4  ;;  %s3083_s11 = int_to_ptr.vmem [resolvable:$false] %s3082_s11 }
 0x197   : > { %s3084_s16 = scalar_lea.vmem %s3083_s11, 32  ;;  %p3085_p0 = scmp.lt.s32.totalorder %s4064_s14, %s3083_s11 }
 0x198   : > { %v2018_v4 = vadd.f32 %v2909_v16, %v2017_v31  ;;  %v2055_v57 = vadd.f32 %v2054_v13, %v2040_v54  ;;  %p3086_p1 = scmp.lt.s32.totalorder %s3084_s16, %s3078_s28 }
 0x19a   : > { %v2056_v50 = vadd.f32 %v2055_v57, %v2041_v60  ;;  %v2019_v0 = vadd.f32 %v2915_v22, %v2018_v4  ;;  %p3087_p2 = por %p3086_p1, %p3085_p0 }
 0x19c   : > { %v2020_v25 = vadd.f32 %v4028_v38, %v2019_v0  ;;  %v2057_v29 = vadd.f32 %v2056_v50, %v2042_v51  ;;  %p3088_p3 = pnand %p3087_p2, %p3081_p13 }
 0x19e   : > { %v2021_v20 = vadd.f32 %v2912_v49, %v2020_v25  ;;  %v2058_v55 = vadd.f32 %v2057_v29, %v2043_v63 }
 0x1a0   : > { %v2022_v28 = vadd.f32 %v2921_v59, %v2021_v20  ;;  %v2059_v62 = vadd.f32 %v2058_v55, %v2044_v12 }
 0x1a2   : > { %v2023_v2 = vadd.f32 %v2927_v40, %v2022_v28  ;;  %v2060_v19 = vadd.f32 %v2059_v62, %v2045_v23 }
 0x1a4   : > { %v2024_v37 = vadd.f32 %v2918_v8, %v2023_v2  ;;  %v2061_v35 = vadd.f32 %v2060_v19, %v2046_v48 }
 0x1a6   : > { %v2025_v18 = vadd.f32 %v2924_v39, %v2024_v37  ;;  %v2062_v44 = vadd.f32 %v2061_v35, %v2047_v5 }
 0x1a8   : > { %v2026_v16 = vrot.slane %v2025_v18, 4  ;;  %v2063_v38 = vadd.f32 %v2062_v44, %v2048_v43 }
 0x1aa   : > { %v2027_v46 = vadd.f32 %v2026_v16, %v2025_v18  ;;  %v2064_v47 = vrot.slane %v2063_v38, 4 }
 0x1ac   : > { %v2028_v49 = vrot.slane %v2027_v46, 2  ;;  %v2065_v36 = vadd.f32 %v2064_v47, %v2063_v38 }
 0x1ae   : > { %v2029_v21 = vadd.f32 %v2028_v49, %v2027_v46  ;;  %v2066_v17 = vrot.slane %v2065_v36, 2 }
 0x1b0   : > { %v2030_v26 = vrot.slane %v2029_v21, 1  ;;  %v2067_v22 = vadd.f32 %v2066_v17, %v2065_v36 }
 0x1b2   : > { %v2031_v24 = vadd.f32 %v2030_v26, %v2029_v21  ;;  %v2068_v58 = vrot.slane %v2067_v22, 1 }
 0x1b4   : > { %2032 = vst [vmem:[%s254_s13] sm:$0x1] %v2031_v24  ;;  %v2069_v45 = vadd.f32 %v2068_v58, %v2067_v22 }
 0x1b5   : > { %3091 = shalt.err (!%p3088_p3)
}
 0x1b6   : > { %s3092_s12 = scalar_lea.hbm %s4062_s18, 16  ;;  %s3096_s25 = scalar_lea.hbm %s4141_s5, 32 }
 0x1b7   : > { %p3093_p4 = scmp.ne.s32.totalorder %s4062_s18, %s3092_s12  ;;  %p3097_p9 = scmp.lt.u32.totalorder %s4062_s18, %s4141_s5 }
 0x1b8   : > { %p3098_p10 = scmp.lt.u32.totalorder %s3096_s25, %s3092_s12  ;;  %p3100_p12 = scmp.lt.u32.totalorder %s3092_s12, %s4062_s18 }
 0x1b9   : > { %p3094_p7 = pnand %p3093_p4, %p3251_p5 }
 0x1ba   : > { %p3099_p11 = por %p3098_p10, %p3097_p9 }
 0x1bb   : > { %p3095_p8 = pneg %p3094_p7 }
 0x1bc   : > { %p3101_p13 = por %p3100_p12, %p3099_p11 }
 0x1be   : > { %p3102_p0 = pnand %p3101_p13, %p3095_p8 }
 0x1c0   : > { %3105 = shalt.err (!%p3102_p0)
}
 0x1c1   : > { %2952 = dma.vmem_to_hbm [thread:$0]  (%p3251_p5), %s4064_s14, 16, %s4062_s18, %s2077_s26   ;;  %2070 = vst [vmem:[%s260_s15] sm:$0x1] %v2069_v45 }
 0x1c2   : > { %s2081_s28 = scalar_lea.sflag [#allocation6], %s4052_s9  ;;  %s3106_s11 = scalar_lea.vmem %s4071_s29, 16 }
 0x1c3   : > { %p3107_p1 = scmp.ne.s32.totalorder %s4071_s29, %s3106_s11  ;;  %s3177_s16 = smov [#allocation5]  }
 0x1c4   : > { %s3110_s12 = sshll.u32 %s3177_s16, 4  ;;  %s3111_s12 = int_to_ptr.vmem [resolvable:$false] %s3110_s12 }
 0x1c5   : > { %p3108_p2 = pnand %p3107_p1, %p3251_p5  ;;  %s3112_s13 = scalar_lea.vmem %s3111_s12, 32 }
 0x1c6   : > { %p3113_p4 = scmp.lt.s32.totalorder %s4071_s29, %s3111_s12  ;;  %p3114_p7 = scmp.lt.s32.totalorder %s3112_s13, %s3106_s11 }
 0x1c7   : > { %p3109_p3 = pneg %p3108_p2 }
 0x1c8   : > { %p3115_p8 = por %p3114_p7, %p3113_p4 }
 0x1ca   : > { %p3116_p9 = pnand %p3115_p8, %p3109_p3 }
 0x1cc   : > { %3119 = shalt.err (!%p3116_p9)
}
 0x1cd   : > { %s3120_s9 = scalar_lea.hbm %s4069_s20, 16  ;;  %s3124_s18 = scalar_lea.hbm %s4142_s6, 32 }
 0x1ce   : > { %p3121_p10 = scmp.ne.s32.totalorder %s4069_s20, %s3120_s9  ;;  %p3125_p13 = scmp.lt.u32.totalorder %s4069_s20, %s4142_s6 }
 0x1cf   : > { %p3126_p0 = scmp.lt.u32.totalorder %s3124_s18, %s3120_s9  ;;  %p3128_p2 = scmp.lt.u32.totalorder %s3120_s9, %s4069_s20 }
 0x1d0   : > { %p3122_p11 = pnand %p3121_p10, %p3251_p5 }
 0x1d1   : > { %p3127_p1 = por %p3126_p0, %p3125_p13 }
 0x1d2   : > { %p3123_p12 = pneg %p3122_p11 }
 0x1d3   : > { %p3129_p3 = por %p3128_p2, %p3127_p1 }
 0x1d5   : > { %p3130_p4 = pnand %p3129_p3, %p3123_p12 }
 0x1d7   : > { %3133 = shalt.err (!%p3130_p4)
}
 0x1d8   : > { %2953 = dma.vmem_to_hbm [thread:$0]  (%p3251_p5), %s4071_s29, 16, %s4069_s20, %s2081_s28  }
 0x1d9 PF: > { %p2971_p7 = scmp.ge.s32.totalorder %s3172_s24, 2  ;;  %s2129_s25 = sand.u32 1, %s3160_s21  }
 0x1da   : > { %s2130_s19 = scalar_lea.sflag [#allocation4], %s2129_s25 }
 0x1db   : > { %p2957_p8 = pnand %p2971_p7, %p3255_p6 }
 0x1dd   : > { %3151 = dma.done.wait (!%p2957_p8), %s2130_s19, 16  }
 0x1de   : > { %3153 = vsyncadd (!%p2957_p8), %s2130_s19, 4294967280  ;;  %s2138_s10 = scalar_lea.sflag [#allocation6], %s2129_s25 }
 0x1df   : > { %3155 = dma.done.wait (!%p2957_p8), %s2138_s10, 16  }
 0x1e0   : > { %3157 = vsyncadd (!%p2957_p8), %s2138_s10, 4294967280  ;;  %p20_p5 = scmp.ge.s32.totalorder %s3238_s27, 4   ;;  %s4171_s21 = smov %s3164_s22 }
 0x1e1   : > { %s4172_s22 = smov %s3168_s23  ;;  %s4173_s23 = smov %s3249_s30 }
 0x1e2   : > { %s4174_s24 = smov %s3238_s27  ;;  %22 = sbr.rel (!%p20_p5) target bundleno = 5 (0x5), region = 102 }
 0x1e9   :  { %2142 = vsyncpa [#allocation4], 1 }
 0x1ea   :  { %2144 = vsyncpa [#allocation4 + $0x1], 1 }
 0x1eb   :  { %2145 = vsyncpa [#allocation6], 1 }
 0x1ec   :  { %2147 = vsyncpa [#allocation6 + $0x1], 1 }

</bundles_post_ra>
